<compile_context>
chip_gen: v7x
topology: tpu7x:2x2x1
jax: 0.10.0
libtpu: 0.0.40
codegen_flags: <defaults>
</compile_context>

<pallas_src>
import jax
import jax.numpy as jnp
from jax import lax
from jax.experimental import pallas as pl
from jax.experimental.pallas import tpu as pltpu

HIDDEN = 32          # hidden_size (small, review's lane analysis assumes H=32)
VOCAB = 64           # output_size (vocab)
SRC_LEN = 8          # encoder sequence length
BATCH = 2
MAX_LENGTH = 10      # same as the tutorial constant
SOS_TOKEN = 0


def attn_decoder_kernel(enc_hid_ref, eih_ref, uak_ref, va_ref, encproj_ref,
                        wbig_ref, bbig_ref, bih_ref,
                        logp_ref, hid_ref, attn_ref):
    B, S, H4 = uak_ref.shape
    H = H4 // 4
    H2, H3 = 2 * H, 3 * H
    V = eih_ref.shape[0]

    e_ih = eih_ref[...]                                  # (V, 3H)   bf16
    w_big = wbig_ref[...]                                # (H, 4H+V) bf16
    enc_proj = encproj_ref[...]                          # (B, S, 3H) f32
    ua_keys = uak_ref[...]                               # (B, S, 4H) f32 (data in lanes 3H:4H)

    # ---- hoisted broadcasts / constants (not re-materialized per unrolled step) ----
    b_big = jnp.broadcast_to(bbig_ref[...], (B, H4 + V))          # (B, 4H+V)
    bih_b = jnp.broadcast_to(bih_ref[...], (B, H3))                # (B, 3H)
    va_b = jnp.broadcast_to(va_ref[...], (B, S, H4))               # (B, S, 4H), zeros in 0:3H
    vocab_iota = lax.broadcasted_iota(jnp.int32, (B, V), 1)

    h = enc_hid_ref[...]                                           # (B, H) f32
    # GRU input projection of the embedded SOS token (embedding lookup fused with
    # Wih_emb in the wrapper).  Dropout is identity (eval mode).
    gi_emb = jnp.broadcast_to(e_ih[SOS_TOKEN:SOS_TOKEN + 1, :],
                              (B, H3)).astype(jnp.float32)

    # Fused h-projection: [ Whh(h) | Wa(h) | Wout(h) ] in a single bf16 MXU push.
    big = (jnp.dot(h.astype(jnp.bfloat16), w_big,
                   preferred_element_type=jnp.float32) + b_big)    # (B, 4H+V)

    logp_steps = []
    attn_steps = []
    for t in range(MAX_LENGTH):
        gh = big[:, 0:H3]                                          # (B, 3H) = Whh(h)+bhh

        # ---- Bahdanau attention on VPU/XLU/EUP; query add is lane-aligned ----
        # lanes 3H:4H carry Wa(h)+ba + Ua(keys)+bu; lanes 0:3H are junk zeroed by va_b.
        tt = jnp.tanh(big[:, None, 0:H4] + ua_keys)                # (B, S, 4H)
        e = jnp.exp(jnp.sum(tt * va_b, axis=-1))                   # (B, S); bounded, no max-sub
        weights = e * pl.reciprocal(jnp.sum(e, axis=-1, keepdims=True),
                                    approx=True)                   # (B, S)
        attn_steps.append(weights)

        # context @ Wih_ctx re-associated onto pre-projected keys (no MXU this step).
        gi_ctx = jnp.sum(weights[:, :, None] * enc_proj, axis=1)   # (B, 3H)
        gi = gi_emb + gi_ctx + bih_b                               # (B, 3H)

        # ---- GRU cell (PyTorch gate order: r, z, n); gi/gh lane-aligned ----
        gsum = gi + gh
        rz = jax.nn.sigmoid(gsum[:, 0:H2])
        r = rz[:, 0:H]
        z = rz[:, H:H2]
        n = jnp.tanh(gi[:, H2:H3] + r * gh[:, H2:H3])
        h = (1.0 - z) * n + z * h                                  # (B, H)

        # Fused projection of the new h: this step's logits AND next step's
        # attention query / hidden-gate pre-activations in one matmul.
        big = (jnp.dot(h.astype(jnp.bfloat16), w_big,
                       preferred_element_type=jnp.float32) + b_big)
        logits = big[:, H4:H4 + V]                                 # (B, V) = Wout(h)+bout

        # ---- per-step log_softmax; stored once, lane-dense, at the end ----
        m = jnp.max(logits, axis=-1, keepdims=True)
        lse = m + jnp.log(jnp.sum(jnp.exp(logits - m), axis=-1, keepdims=True))
        logp_steps.append(logits - lse)                            # (B, V)

        # ---- greedy next token: argmax via reused max, then one-hot @ E_ih ----
        idx = jnp.min(jnp.where(logits == m, vocab_iota, V),
                      axis=-1, keepdims=True)                      # (B, 1)
        onehot = (vocab_iota == idx).astype(jnp.bfloat16)          # (B, V)
        gi_emb = jnp.dot(onehot, e_ih, preferred_element_type=jnp.float32)

    hid_ref[...] = h
    logp_ref[...] = jnp.concatenate(logp_steps, axis=1)            # (B, T*V) lane-dense
    attn_ref[...] = jnp.concatenate(attn_steps, axis=1)            # (B, T*S)


def attn_decoder_forward(encoder_outputs, encoder_hidden, params):
    B, S, H = encoder_outputs.shape
    V = params["emb"].shape[0]
    H3, H4 = 3 * H, 4 * H

    # ---- one-time (outside-kernel) weight fusion / pre-computation ----
    # Fused h-projection weight, reordered [Whh | Wa | Wout]: GRU gates land in
    # lanes 0:3H (aligned with gi) and Wout starts at the 128-lane tile boundary.
    w_big = jnp.concatenate([params["Whh"], params["Wa"], params["Wout"]],
                            axis=1).astype(jnp.bfloat16)            # (H, 4H+V)
    b_big = jnp.concatenate([params["bhh"], params["ba"], params["bout"]],
                            axis=1)                                  # (1, 4H+V)

    wih_emb = params["Wih"][:H, :]                                   # (H, 3H)
    wih_ctx = params["Wih"][H:, :]                                   # (H, 3H)
    e_ih = jnp.dot(params["emb"], wih_emb).astype(jnp.bfloat16)      # (V, 3H)

    enc = encoder_outputs.astype(jnp.float32)
    # Ua(keys)+bu is query-independent: precompute here and lane-shift into lanes
    # 3H:4H so it adds directly against the Wa(h) slice of the fused projection.
    ua_keys = jnp.einsum("bsh,hk->bsk", enc, params["Ua"]) + params["bu"]
    uak_pad = jnp.concatenate(
        [jnp.zeros((B, S, H3), jnp.float32), ua_keys], axis=-1)      # (B, S, 4H)
    # Va lane-shifted the same way (zeros elsewhere mask the junk lanes in tanh).
    # NOTE: Va's bias is omitted — constant over the source axis, cancels exactly
    # in the softmax.
    va_pad = jnp.concatenate(
        [jnp.zeros((1, H3), jnp.float32), params["Va"]],
        axis=-1).reshape(1, 1, H4)                                   # (1, 1, 4H)
    # context @ Wih_ctx re-associated: project the static keys once.
    enc_proj = jnp.einsum("bsh,hk->bsk", enc, wih_ctx)               # (B, S, 3H)

    args = (encoder_hidden[0].astype(jnp.float32),                   # (1,B,H) -> (B,H)
            e_ih, uak_pad, va_pad, enc_proj,
            w_big, b_big, params["bih"])

    vmem = pl.BlockSpec(memory_space=pltpu.MemorySpace.VMEM)
    out_shapes = (
        jax.ShapeDtypeStruct((B, MAX_LENGTH * V), jnp.float32),      # flat log-probs
        jax.ShapeDtypeStruct((B, H), jnp.float32),
        jax.ShapeDtypeStruct((B, MAX_LENGTH * S), jnp.float32),      # flat attn weights
    )
    logp_flat, hid, attn_flat = pl.pallas_call(
        attn_decoder_kernel,
        out_shape=out_shapes,
        in_specs=[vmem] * len(args),
        out_specs=(vmem, vmem, vmem),
    )(*args)
    # Match PyTorch return convention: (B, T, V), (num_layers=1, B, H), (B, T, S)
    return (logp_flat.reshape(B, MAX_LENGTH, V),
            hid[None, :, :],
            attn_flat.reshape(B, MAX_LENGTH, S))


def make_params(key, hidden_size, output_size):
    ks = jax.random.split(key, 16)
    H, V = hidden_size, output_size

    def u(k, shape, fan_in):
        bound = 1.0 / jnp.sqrt(jnp.float32(fan_in))
        return jax.random.uniform(k, shape, jnp.float32, -bound, bound)

    return {
        # nn.Embedding(output_size, hidden_size)
        "emb": jax.random.normal(ks[0], (V, H), jnp.float32),
        # BahdanauAttention: Wa, Ua stored as (in, out); Va kept in PyTorch
        # nn.Linear(H, 1).weight layout (1, H) since it is applied on the VPU.
        "Wa": u(ks[1], (H, H), H),  "ba": u(ks[2], (1, H), H),
        "Ua": u(ks[3], (H, H), H),  "bu": u(ks[4], (1, H), H),
        "Va": u(ks[5], (1, H), H),  "bv": u(ks[6], (1, 1), H),   # bv unused (cancels in softmax)
        # nn.GRU(2H -> H): weight_ih (3H, 2H), weight_hh (3H, H) pre-transposed
        "Wih": u(ks[7], (2 * H, 3 * H), H),  "bih": u(ks[8], (1, 3 * H), H),
        "Whh": u(ks[9], (H, 3 * H), H),      "bhh": u(ks[10], (1, 3 * H), H),
        # nn.Linear(H, V) stored as (in, out)
        "Wout": u(ks[11], (H, V), H), "bout": u(ks[12], (1, V), H),
    }


if __name__ == "__main__":
    key = jax.random.PRNGKey(0)
    k_par, k_enc, k_hid = jax.random.split(key, 3)

    params = make_params(k_par, HIDDEN, VOCAB)
    encoder_outputs = jax.random.normal(k_enc, (BATCH, SRC_LEN, HIDDEN), jnp.float32)
    encoder_hidden = jax.random.normal(k_hid, (1, BATCH, HIDDEN), jnp.float32)

    logp, hidden, attn = attn_decoder_forward(encoder_outputs, encoder_hidden, params)
    jax.block_until_ready((logp, hidden, attn))

    assert logp.shape == (BATCH, MAX_LENGTH, VOCAB)
    assert hidden.shape == (1, BATCH, HIDDEN)
    assert attn.shape == (BATCH, MAX_LENGTH, SRC_LEN)
    assert bool(jnp.all(jnp.isfinite(logp)))
    assert bool(jnp.all(jnp.isfinite(attn)))
    print("KERNEL_OK")
</pallas_src>

<mosaic_0001>
module attributes {stable_mosaic.version = 11 : i64} {
  func.func @attn_decoder_kernel(%arg0: memref<2x32xf32, #tpu.memory_space<vmem>>, %arg1: memref<64x96xbf16, #tpu.memory_space<vmem>>, %arg2: memref<2x8x128xf32, #tpu.memory_space<vmem>>, %arg3: memref<1x1x128xf32, #tpu.memory_space<vmem>>, %arg4: memref<2x8x96xf32, #tpu.memory_space<vmem>>, %arg5: memref<32x192xbf16, #tpu.memory_space<vmem>>, %arg6: memref<1x192xf32, #tpu.memory_space<vmem>>, %arg7: memref<1x96xf32, #tpu.memory_space<vmem>>, %arg8: memref<2x640xf32, #tpu.memory_space<vmem>>, %arg9: memref<2x32xf32, #tpu.memory_space<vmem>>, %arg10: memref<2x80xf32, #tpu.memory_space<vmem>>) attributes {dimension_semantics = [], scalar_prefetch = 0 : i64, scratch_operands = 0 : i64, tpu.core_type = #tpu.core_type<tc>} {
    %c0 = arith.constant 0 : index
    %c0_0 = arith.constant 0 : index
    %0 = vector.load %arg1[%c0, %c0_0] : memref<64x96xbf16, #tpu.memory_space<vmem>>, vector<64x96xbf16>
    %c0_1 = arith.constant 0 : index
    %c0_2 = arith.constant 0 : index
    %1 = vector.load %arg5[%c0_1, %c0_2] : memref<32x192xbf16, #tpu.memory_space<vmem>>, vector<32x192xbf16>
    %c0_3 = arith.constant 0 : index
    %c0_4 = arith.constant 0 : index
    %c0_5 = arith.constant 0 : index
    %2 = vector.load %arg4[%c0_3, %c0_4, %c0_5] : memref<2x8x96xf32, #tpu.memory_space<vmem>>, vector<2x8x96xf32>
    %c0_6 = arith.constant 0 : index
    %c0_7 = arith.constant 0 : index
    %c0_8 = arith.constant 0 : index
    %3 = vector.load %arg2[%c0_6, %c0_7, %c0_8] : memref<2x8x128xf32, #tpu.memory_space<vmem>>, vector<2x8x128xf32>
    %c0_9 = arith.constant 0 : index
    %c0_10 = arith.constant 0 : index
    %4 = vector.load %arg6[%c0_9, %c0_10] : memref<1x192xf32, #tpu.memory_space<vmem>>, vector<1x192xf32>
    %5 = vector.shape_cast %4 : vector<1x192xf32> to vector<1x192xf32>
    %6 = vector.broadcast %5 : vector<1x192xf32> to vector<2x192xf32>
    %c0_11 = arith.constant 0 : index
    %c0_12 = arith.constant 0 : index
    %7 = vector.load %arg7[%c0_11, %c0_12] : memref<1x96xf32, #tpu.memory_space<vmem>>, vector<1x96xf32>
    %8 = vector.shape_cast %7 : vector<1x96xf32> to vector<1x96xf32>
    %9 = vector.broadcast %8 : vector<1x96xf32> to vector<2x96xf32>
    %c0_13 = arith.constant 0 : index
    %c0_14 = arith.constant 0 : index
    %c0_15 = arith.constant 0 : index
    %10 = vector.load %arg3[%c0_13, %c0_14, %c0_15] : memref<1x1x128xf32, #tpu.memory_space<vmem>>, vector<1x1x128xf32>
    %11 = vector.shape_cast %10 : vector<1x1x128xf32> to vector<1x1x128xf32>
    %12 = vector.broadcast %11 : vector<1x1x128xf32> to vector<2x8x128xf32>
    %13 = tpu.iota {dimensions = array<i32: 1>} : vector<2x64xi32>
    %c0_16 = arith.constant 0 : index
    %c0_17 = arith.constant 0 : index
    %14 = vector.load %arg0[%c0_16, %c0_17] : memref<2x32xf32, #tpu.memory_space<vmem>>, vector<2x32xf32>
    %15 = vector.extract_strided_slice %0 {offsets = [0, 0], sizes = [1, 96], strides = [1, 1]} : vector<64x96xbf16> to vector<1x96xbf16>
    %16 = vector.shape_cast %15 : vector<1x96xbf16> to vector<1x96xbf16>
    %17 = vector.broadcast %16 : vector<1x96xbf16> to vector<2x96xbf16>
    %18 = arith.extf %17 : vector<2x96xbf16> to vector<2x96xf32>
    %19 = arith.truncf %14 : vector<2x32xf32> to vector<2x32xbf16>
    %cst = arith.constant dense<0.000000e+00> : vector<2x192xf32>
    %20 = tpu.matmul %19, %1, %cst {dimension_numbers = #tpu.dot_dimension_numbers<[1], [0], [0], [1], [0, 0, 1, 1], [], []>} : vector<2x32xbf16>, vector<32x192xbf16>, vector<2x192xf32> -> vector<2x192xf32>
    %21 = arith.addf %20, %6 : vector<2x192xf32>
    %22 = vector.extract_strided_slice %21 {offsets = [0, 0], sizes = [2, 96], strides = [1, 1]} : vector<2x192xf32> to vector<2x96xf32>
    %23 = vector.extract_strided_slice %21 {offsets = [0, 0], sizes = [2, 128], strides = [1, 1]} : vector<2x192xf32> to vector<2x128xf32>
    %24 = vector.shape_cast %23 : vector<2x128xf32> to vector<2x1x128xf32>
    %25 = vector.broadcast %24 : vector<2x1x128xf32> to vector<2x8x128xf32>
    %26 = arith.addf %25, %3 : vector<2x8x128xf32>
    %27 = math.tanh %26 : vector<2x8x128xf32>
    %28 = arith.mulf %27, %12 : vector<2x8x128xf32>
    %cst_18 = arith.constant dense<0.000000e+00> : vector<2x8xf32>
    %29 = vector.multi_reduction <add>, %28, %cst_18 [2] : vector<2x8x128xf32> to vector<2x8xf32>
    %30 = math.exp %29 : vector<2x8xf32>
    %cst_19 = arith.constant dense<0.000000e+00> : vector<2xf32>
    %31 = vector.multi_reduction <add>, %30, %cst_19 [1] : vector<2x8xf32> to vector<2xf32>
    %32 = vector.shape_cast %31 : vector<2xf32> to vector<2x1xf32>
    %33 = tpu.reciprocal %32 {approx = true} : vector<2x1xf32> -> vector<2x1xf32>
    %34 = vector.broadcast %33 : vector<2x1xf32> to vector<2x8xf32>
    %35 = arith.mulf %30, %34 : vector<2x8xf32>
    %36 = vector.shape_cast %35 : vector<2x8xf32> to vector<2x8x1xf32>
    %37 = vector.broadcast %36 : vector<2x8x1xf32> to vector<2x8x96xf32>
    %38 = arith.mulf %37, %2 : vector<2x8x96xf32>
    %cst_20 = arith.constant dense<0.000000e+00> : vector<2x96xf32>
    %39 = vector.multi_reduction <add>, %38, %cst_20 [1] : vector<2x8x96xf32> to vector<2x96xf32>
    %40 = arith.addf %18, %39 : vector<2x96xf32>
    %41 = arith.addf %40, %9 : vector<2x96xf32>
    %42 = arith.addf %41, %22 : vector<2x96xf32>
    %43 = vector.extract_strided_slice %42 {offsets = [0, 0], sizes = [2, 64], strides = [1, 1]} : vector<2x96xf32> to vector<2x64xf32>
    %44 = arith.negf %43 : vector<2x64xf32>
    %45 = math.exp %44 : vector<2x64xf32>
    %cst_21 = arith.constant 1.000000e+00 : f32
    %46 = vector.broadcast %cst_21 : f32 to vector<2x64xf32>
    %47 = arith.addf %46, %45 : vector<2x64xf32>
    %48 = arith.divf %46, %47 : vector<2x64xf32>
    %49 = vector.extract_strided_slice %48 {offsets = [0, 0], sizes = [2, 32], strides = [1, 1]} : vector<2x64xf32> to vector<2x32xf32>
    %50 = vector.extract_strided_slice %48 {offsets = [0, 32], sizes = [2, 32], strides = [1, 1]} : vector<2x64xf32> to vector<2x32xf32>
    %51 = vector.extract_strided_slice %41 {offsets = [0, 64], sizes = [2, 32], strides = [1, 1]} : vector<2x96xf32> to vector<2x32xf32>
    %52 = vector.extract_strided_slice %22 {offsets = [0, 64], sizes = [2, 32], strides = [1, 1]} : vector<2x96xf32> to vector<2x32xf32>
    %53 = arith.mulf %49, %52 : vector<2x32xf32>
    %54 = arith.addf %51, %53 : vector<2x32xf32>
    %55 = math.tanh %54 : vector<2x32xf32>
    %cst_22 = arith.constant 1.000000e+00 : f32
    %56 = vector.broadcast %cst_22 : f32 to vector<2x32xf32>
    %57 = arith.subf %56, %50 : vector<2x32xf32>
    %58 = arith.mulf %57, %55 : vector<2x32xf32>
    %59 = arith.mulf %50, %14 : vector<2x32xf32>
    %60 = arith.addf %58, %59 : vector<2x32xf32>
    %61 = arith.truncf %60 : vector<2x32xf32> to vector<2x32xbf16>
    %cst_23 = arith.constant dense<0.000000e+00> : vector<2x192xf32>
    %62 = tpu.matmul %61, %1, %cst_23 {dimension_numbers = #tpu.dot_dimension_numbers<[1], [0], [0], [1], [0, 0, 1, 1], [], []>} : vector<2x32xbf16>, vector<32x192xbf16>, vector<2x192xf32> -> vector<2x192xf32>
    %63 = arith.addf %62, %6 : vector<2x192xf32>
    %64 = vector.extract_strided_slice %63 {offsets = [0, 128], sizes = [2, 64], strides = [1, 1]} : vector<2x192xf32> to vector<2x64xf32>
    %cst_24 = arith.constant dense<0xFF800000> : vector<2xf32>
    %65 = vector.multi_reduction <maximumf>, %64, %cst_24 [1] : vector<2x64xf32> to vector<2xf32>
    %66 = vector.shape_cast %65 : vector<2xf32> to vector<2x1xf32>
    %67 = vector.broadcast %66 : vector<2x1xf32> to vector<2x64xf32>
    %68 = arith.subf %64, %67 : vector<2x64xf32>
    %69 = math.exp %68 : vector<2x64xf32>
    %cst_25 = arith.constant dense<0.000000e+00> : vector<2xf32>
    %70 = vector.multi_reduction <add>, %69, %cst_25 [1] : vector<2x64xf32> to vector<2xf32>
    %71 = vector.shape_cast %70 : vector<2xf32> to vector<2x1xf32>
    %72 = math.log %71 : vector<2x1xf32>
    %73 = arith.addf %66, %72 : vector<2x1xf32>
    %74 = vector.broadcast %73 : vector<2x1xf32> to vector<2x64xf32>
    %75 = arith.subf %64, %74 : vector<2x64xf32>
    %76 = vector.broadcast %66 : vector<2x1xf32> to vector<2x64xf32>
    %77 = arith.cmpf oeq, %64, %76 : vector<2x64xf32>
    %c64_i32 = arith.constant 64 : i32
    %78 = vector.broadcast %c64_i32 : i32 to vector<2x64xi32>
    %79 = arith.select %77, %13, %78 : vector<2x64xi1>, vector<2x64xi32>
    %cst_26 = arith.constant dense<2147483647> : vector<2xi32>
    %80 = vector.multi_reduction <minsi>, %79, %cst_26 [1] : vector<2x64xi32> to vector<2xi32>
    %81 = vector.shape_cast %80 : vector<2xi32> to vector<2x1xi32>
    %82 = vector.broadcast %81 : vector<2x1xi32> to vector<2x64xi32>
    %83 = arith.cmpi eq, %13, %82 : vector<2x64xi32>
    %84 = arith.extui %83 : vector<2x64xi1> to vector<2x64xi32>
    %85 = arith.sitofp %84 : vector<2x64xi32> to vector<2x64xf32>
    %86 = arith.truncf %85 : vector<2x64xf32> to vector<2x64xbf16>
    %cst_27 = arith.constant dense<0.000000e+00> : vector<2x96xf32>
    %87 = tpu.matmul %86, %0, %cst_27 {dimension_numbers = #tpu.dot_dimension_numbers<[1], [0], [0], [1], [0, 0, 1, 1], [], []>} : vector<2x64xbf16>, vector<64x96xbf16>, vector<2x96xf32> -> vector<2x96xf32>
    %88 = vector.extract_strided_slice %63 {offsets = [0, 0], sizes = [2, 96], strides = [1, 1]} : vector<2x192xf32> to vector<2x96xf32>
    %89 = vector.extract_strided_slice %63 {offsets = [0, 0], sizes = [2, 128], strides = [1, 1]} : vector<2x192xf32> to vector<2x128xf32>
    %90 = vector.shape_cast %89 : vector<2x128xf32> to vector<2x1x128xf32>
    %91 = vector.broadcast %90 : vector<2x1x128xf32> to vector<2x8x128xf32>
    %92 = arith.addf %91, %3 : vector<2x8x128xf32>
    %93 = math.tanh %92 : vector<2x8x128xf32>
    %94 = arith.mulf %93, %12 : vector<2x8x128xf32>
    %cst_28 = arith.constant dense<0.000000e+00> : vector<2x8xf32>
    %95 = vector.multi_reduction <add>, %94, %cst_28 [2] : vector<2x8x128xf32> to vector<2x8xf32>
    %96 = math.exp %95 : vector<2x8xf32>
    %cst_29 = arith.constant dense<0.000000e+00> : vector<2xf32>
    %97 = vector.multi_reduction <add>, %96, %cst_29 [1] : vector<2x8xf32> to vector<2xf32>
    %98 = vector.shape_cast %97 : vector<2xf32> to vector<2x1xf32>
    %99 = tpu.reciprocal %98 {approx = true} : vector<2x1xf32> -> vector<2x1xf32>
    %100 = vector.broadcast %99 : vector<2x1xf32> to vector<2x8xf32>
    %101 = arith.mulf %96, %100 : vector<2x8xf32>
    %102 = vector.shape_cast %101 : vector<2x8xf32> to vector<2x8x1xf32>
    %103 = vector.broadcast %102 : vector<2x8x1xf32> to vector<2x8x96xf32>
    %104 = arith.mulf %103, %2 : vector<2x8x96xf32>
    %cst_30 = arith.constant dense<0.000000e+00> : vector<2x96xf32>
    %105 = vector.multi_reduction <add>, %104, %cst_30 [1] : vector<2x8x96xf32> to vector<2x96xf32>
    %106 = arith.addf %87, %105 : vector<2x96xf32>
    %107 = arith.addf %106, %9 : vector<2x96xf32>
    %108 = arith.addf %107, %88 : vector<2x96xf32>
    %109 = vector.extract_strided_slice %108 {offsets = [0, 0], sizes = [2, 64], strides = [1, 1]} : vector<2x96xf32> to vector<2x64xf32>
    %110 = arith.negf %109 : vector<2x64xf32>
    %111 = math.exp %110 : vector<2x64xf32>
    %cst_31 = arith.constant 1.000000e+00 : f32
    %112 = vector.broadcast %cst_31 : f32 to vector<2x64xf32>
    %113 = arith.addf %112, %111 : vector<2x64xf32>
    %114 = arith.divf %112, %113 : vector<2x64xf32>
    %115 = vector.extract_strided_slice %114 {offsets = [0, 0], sizes = [2, 32], strides = [1, 1]} : vector<2x64xf32> to vector<2x32xf32>
    %116 = vector.extract_strided_slice %114 {offsets = [0, 32], sizes = [2, 32], strides = [1, 1]} : vector<2x64xf32> to vector<2x32xf32>
    %117 = vector.extract_strided_slice %107 {offsets = [0, 64], sizes = [2, 32], strides = [1, 1]} : vector<2x96xf32> to vector<2x32xf32>
    %118 = vector.extract_strided_slice %88 {offsets = [0, 64], sizes = [2, 32], strides = [1, 1]} : vector<2x96xf32> to vector<2x32xf32>
    %119 = arith.mulf %115, %118 : vector<2x32xf32>
    %120 = arith.addf %117, %119 : vector<2x32xf32>
    %121 = math.tanh %120 : vector<2x32xf32>
    %cst_32 = arith.constant 1.000000e+00 : f32
    %122 = vector.broadcast %cst_32 : f32 to vector<2x32xf32>
    %123 = arith.subf %122, %116 : vector<2x32xf32>
    %124 = arith.mulf %123, %121 : vector<2x32xf32>
    %125 = arith.mulf %116, %60 : vector<2x32xf32>
    %126 = arith.addf %124, %125 : vector<2x32xf32>
    %127 = arith.truncf %126 : vector<2x32xf32> to vector<2x32xbf16>
    %cst_33 = arith.constant dense<0.000000e+00> : vector<2x192xf32>
    %128 = tpu.matmul %127, %1, %cst_33 {dimension_numbers = #tpu.dot_dimension_numbers<[1], [0], [0], [1], [0, 0, 1, 1], [], []>} : vector<2x32xbf16>, vector<32x192xbf16>, vector<2x192xf32> -> vector<2x192xf32>
    %129 = arith.addf %128, %6 : vector<2x192xf32>
    %130 = vector.extract_strided_slice %129 {offsets = [0, 128], sizes = [2, 64], strides = [1, 1]} : vector<2x192xf32> to vector<2x64xf32>
    %cst_34 = arith.constant dense<0xFF800000> : vector<2xf32>
    %131 = vector.multi_reduction <maximumf>, %130, %cst_34 [1] : vector<2x64xf32> to vector<2xf32>
    %132 = vector.shape_cast %131 : vector<2xf32> to vector<2x1xf32>
    %133 = vector.broadcast %132 : vector<2x1xf32> to vector<2x64xf32>
    %134 = arith.subf %130, %133 : vector<2x64xf32>
    %135 = math.exp %134 : vector<2x64xf32>
    %cst_35 = arith.constant dense<0.000000e+00> : vector<2xf32>
    %136 = vector.multi_reduction <add>, %135, %cst_35 [1] : vector<2x64xf32> to vector<2xf32>
    %137 = vector.shape_cast %136 : vector<2xf32> to vector<2x1xf32>
    %138 = math.log %137 : vector<2x1xf32>
    %139 = arith.addf %132, %138 : vector<2x1xf32>
    %140 = vector.broadcast %139 : vector<2x1xf32> to vector<2x64xf32>
    %141 = arith.subf %130, %140 : vector<2x64xf32>
    %142 = vector.broadcast %132 : vector<2x1xf32> to vector<2x64xf32>
    %143 = arith.cmpf oeq, %130, %142 : vector<2x64xf32>
    %c64_i32_36 = arith.constant 64 : i32
    %144 = vector.broadcast %c64_i32_36 : i32 to vector<2x64xi32>
    %145 = arith.select %143, %13, %144 : vector<2x64xi1>, vector<2x64xi32>
    %cst_37 = arith.constant dense<2147483647> : vector<2xi32>
    %146 = vector.multi_reduction <minsi>, %145, %cst_37 [1] : vector<2x64xi32> to vector<2xi32>
    %147 = vector.shape_cast %146 : vector<2xi32> to vector<2x1xi32>
    %148 = vector.broadcast %147 : vector<2x1xi32> to vector<2x64xi32>
    %149 = arith.cmpi eq, %13, %148 : vector<2x64xi32>
    %150 = arith.extui %149 : vector<2x64xi1> to vector<2x64xi32>
    %151 = arith.sitofp %150 : vector<2x64xi32> to vector<2x64xf32>
    %152 = arith.truncf %151 : vector<2x64xf32> to vector<2x64xbf16>
    %cst_38 = arith.constant dense<0.000000e+00> : vector<2x96xf32>
    %153 = tpu.matmul %152, %0, %cst_38 {dimension_numbers = #tpu.dot_dimension_numbers<[1], [0], [0], [1], [0, 0, 1, 1], [], []>} : vector<2x64xbf16>, vector<64x96xbf16>, vector<2x96xf32> -> vector<2x96xf32>
    %154 = vector.extract_strided_slice %129 {offsets = [0, 0], sizes = [2, 96], strides = [1, 1]} : vector<2x192xf32> to vector<2x96xf32>
    %155 = vector.extract_strided_slice %129 {offsets = [0, 0], sizes = [2, 128], strides = [1, 1]} : vector<2x192xf32> to vector<2x128xf32>
    %156 = vector.shape_cast %155 : vector<2x128xf32> to vector<2x1x128xf32>
    %157 = vector.broadcast %156 : vector<2x1x128xf32> to vector<2x8x128xf32>
    %158 = arith.addf %157, %3 : vector<2x8x128xf32>
    %159 = math.tanh %158 : vector<2x8x128xf32>
    %160 = arith.mulf %159, %12 : vector<2x8x128xf32>
    %cst_39 = arith.constant dense<0.000000e+00> : vector<2x8xf32>
    %161 = vector.multi_reduction <add>, %160, %cst_39 [2] : vector<2x8x128xf32> to vector<2x8xf32>
    %162 = math.exp %161 : vector<2x8xf32>
    %cst_40 = arith.constant dense<0.000000e+00> : vector<2xf32>
    %163 = vector.multi_reduction <add>, %162, %cst_40 [1] : vector<2x8xf32> to vector<2xf32>
    %164 = vector.shape_cast %163 : vector<2xf32> to vector<2x1xf32>
    %165 = tpu.reciprocal %164 {approx = true} : vector<2x1xf32> -> vector<2x1xf32>
    %166 = vector.broadcast %165 : vector<2x1xf32> to vector<2x8xf32>
    %167 = arith.mulf %162, %166 : vector<2x8xf32>
    %168 = vector.shape_cast %167 : vector<2x8xf32> to vector<2x8x1xf32>
    %169 = vector.broadcast %168 : vector<2x8x1xf32> to vector<2x8x96xf32>
    %170 = arith.mulf %169, %2 : vector<2x8x96xf32>
    %cst_41 = arith.constant dense<0.000000e+00> : vector<2x96xf32>
    %171 = vector.multi_reduction <add>, %170, %cst_41 [1] : vector<2x8x96xf32> to vector<2x96xf32>
    %172 = arith.addf %153, %171 : vector<2x96xf32>
    %173 = arith.addf %172, %9 : vector<2x96xf32>
    %174 = arith.addf %173, %154 : vector<2x96xf32>
    %175 = vector.extract_strided_slice %174 {offsets = [0, 0], sizes = [2, 64], strides = [1, 1]} : vector<2x96xf32> to vector<2x64xf32>
    %176 = arith.negf %175 : vector<2x64xf32>
    %177 = math.exp %176 : vector<2x64xf32>
    %cst_42 = arith.constant 1.000000e+00 : f32
    %178 = vector.broadcast %cst_42 : f32 to vector<2x64xf32>
    %179 = arith.addf %178, %177 : vector<2x64xf32>
    %180 = arith.divf %178, %179 : vector<2x64xf32>
    %181 = vector.extract_strided_slice %180 {offsets = [0, 0], sizes = [2, 32], strides = [1, 1]} : vector<2x64xf32> to vector<2x32xf32>
    %182 = vector.extract_strided_slice %180 {offsets = [0, 32], sizes = [2, 32], strides = [1, 1]} : vector<2x64xf32> to vector<2x32xf32>
    %183 = vector.extract_strided_slice %173 {offsets = [0, 64], sizes = [2, 32], strides = [1, 1]} : vector<2x96xf32> to vector<2x32xf32>
    %184 = vector.extract_strided_slice %154 {offsets = [0, 64], sizes = [2, 32], strides = [1, 1]} : vector<2x96xf32> to vector<2x32xf32>
    %185 = arith.mulf %181, %184 : vector<2x32xf32>
    %186 = arith.addf %183, %185 : vector<2x32xf32>
    %187 = math.tanh %186 : vector<2x32xf32>
    %cst_43 = arith.constant 1.000000e+00 : f32
    %188 = vector.broadcast %cst_43 : f32 to vector<2x32xf32>
    %189 = arith.subf %188, %182 : vector<2x32xf32>
    %190 = arith.mulf %189, %187 : vector<2x32xf32>
    %191 = arith.mulf %182, %126 : vector<2x32xf32>
    %192 = arith.addf %190, %191 : vector<2x32xf32>
    %193 = arith.truncf %192 : vector<2x32xf32> to vector<2x32xbf16>
    %cst_44 = arith.constant dense<0.000000e+00> : vector<2x192xf32>
    %194 = tpu.matmul %193, %1, %cst_44 {dimension_numbers = #tpu.dot_dimension_numbers<[1], [0], [0], [1], [0, 0, 1, 1], [], []>} : vector<2x32xbf16>, vector<32x192xbf16>, vector<2x192xf32> -> vector<2x192xf32>
    %195 = arith.addf %194, %6 : vector<2x192xf32>
    %196 = vector.extract_strided_slice %195 {offsets = [0, 128], sizes = [2, 64], strides = [1, 1]} : vector<2x192xf32> to vector<2x64xf32>
    %cst_45 = arith.constant dense<0xFF800000> : vector<2xf32>
    %197 = vector.multi_reduction <maximumf>, %196, %cst_45 [1] : vector<2x64xf32> to vector<2xf32>
    %198 = vector.shape_cast %197 : vector<2xf32> to vector<2x1xf32>
    %199 = vector.broadcast %198 : vector<2x1xf32> to vector<2x64xf32>
    %200 = arith.subf %196, %199 : vector<2x64xf32>
    %201 = math.exp %200 : vector<2x64xf32>
    %cst_46 = arith.constant dense<0.000000e+00> : vector<2xf32>
    %202 = vector.multi_reduction <add>, %201, %cst_46 [1] : vector<2x64xf32> to vector<2xf32>
    %203 = vector.shape_cast %202 : vector<2xf32> to vector<2x1xf32>
    %204 = math.log %203 : vector<2x1xf32>
    %205 = arith.addf %198, %204 : vector<2x1xf32>
    %206 = vector.broadcast %205 : vector<2x1xf32> to vector<2x64xf32>
    %207 = arith.subf %196, %206 : vector<2x64xf32>
    %208 = vector.broadcast %198 : vector<2x1xf32> to vector<2x64xf32>
    %209 = arith.cmpf oeq, %196, %208 : vector<2x64xf32>
    %c64_i32_47 = arith.constant 64 : i32
    %210 = vector.broadcast %c64_i32_47 : i32 to vector<2x64xi32>
    %211 = arith.select %209, %13, %210 : vector<2x64xi1>, vector<2x64xi32>
    %cst_48 = arith.constant dense<2147483647> : vector<2xi32>
    %212 = vector.multi_reduction <minsi>, %211, %cst_48 [1] : vector<2x64xi32> to vector<2xi32>
    %213 = vector.shape_cast %212 : vector<2xi32> to vector<2x1xi32>
    %214 = vector.broadcast %213 : vector<2x1xi32> to vector<2x64xi32>
    %215 = arith.cmpi eq, %13, %214 : vector<2x64xi32>
    %216 = arith.extui %215 : vector<2x64xi1> to vector<2x64xi32>
    %217 = arith.sitofp %216 : vector<2x64xi32> to vector<2x64xf32>
    %218 = arith.truncf %217 : vector<2x64xf32> to vector<2x64xbf16>
    %cst_49 = arith.constant dense<0.000000e+00> : vector<2x96xf32>
    %219 = tpu.matmul %218, %0, %cst_49 {dimension_numbers = #tpu.dot_dimension_numbers<[1], [0], [0], [1], [0, 0, 1, 1], [], []>} : vector<2x64xbf16>, vector<64x96xbf16>, vector<2x96xf32> -> vector<2x96xf32>
    %220 = vector.extract_strided_slice %195 {offsets = [0, 0], sizes = [2, 96], strides = [1, 1]} : vector<2x192xf32> to vector<2x96xf32>
    %221 = vector.extract_strided_slice %195 {offsets = [0, 0], sizes = [2, 128], strides = [1, 1]} : vector<2x192xf32> to vector<2x128xf32>
    %222 = vector.shape_cast %221 : vector<2x128xf32> to vector<2x1x128xf32>
    %223 = vector.broadcast %222 : vector<2x1x128xf32> to vector<2x8x128xf32>
    %224 = arith.addf %223, %3 : vector<2x8x128xf32>
    %225 = math.tanh %224 : vector<2x8x128xf32>
    %226 = arith.mulf %225, %12 : vector<2x8x128xf32>
    %cst_50 = arith.constant dense<0.000000e+00> : vector<2x8xf32>
    %227 = vector.multi_reduction <add>, %226, %cst_50 [2] : vector<2x8x128xf32> to vector<2x8xf32>
    %228 = math.exp %227 : vector<2x8xf32>
    %cst_51 = arith.constant dense<0.000000e+00> : vector<2xf32>
    %229 = vector.multi_reduction <add>, %228, %cst_51 [1] : vector<2x8xf32> to vector<2xf32>
    %230 = vector.shape_cast %229 : vector<2xf32> to vector<2x1xf32>
    %231 = tpu.reciprocal %230 {approx = true} : vector<2x1xf32> -> vector<2x1xf32>
    %232 = vector.broadcast %231 : vector<2x1xf32> to vector<2x8xf32>
    %233 = arith.mulf %228, %232 : vector<2x8xf32>
    %234 = vector.shape_cast %233 : vector<2x8xf32> to vector<2x8x1xf32>
    %235 = vector.broadcast %234 : vector<2x8x1xf32> to vector<2x8x96xf32>
    %236 = arith.mulf %235, %2 : vector<2x8x96xf32>
    %cst_52 = arith.constant dense<0.000000e+00> : vector<2x96xf32>
    %237 = vector.multi_reduction <add>, %236, %cst_52 [1] : vector<2x8x96xf32> to vector<2x96xf32>
    %238 = arith.addf %219, %237 : vector<2x96xf32>
    %239 = arith.addf %238, %9 : vector<2x96xf32>
    %240 = arith.addf %239, %220 : vector<2x96xf32>
    %241 = vector.extract_strided_slice %240 {offsets = [0, 0], sizes = [2, 64], strides = [1, 1]} : vector<2x96xf32> to vector<2x64xf32>
    %242 = arith.negf %241 : vector<2x64xf32>
    %243 = math.exp %242 : vector<2x64xf32>
    %cst_53 = arith.constant 1.000000e+00 : f32
    %244 = vector.broadcast %cst_53 : f32 to vector<2x64xf32>
    %245 = arith.addf %244, %243 : vector<2x64xf32>
    %246 = arith.divf %244, %245 : vector<2x64xf32>
    %247 = vector.extract_strided_slice %246 {offsets = [0, 0], sizes = [2, 32], strides = [1, 1]} : vector<2x64xf32> to vector<2x32xf32>
    %248 = vector.extract_strided_slice %246 {offsets = [0, 32], sizes = [2, 32], strides = [1, 1]} : vector<2x64xf32> to vector<2x32xf32>
    %249 = vector.extract_strided_slice %239 {offsets = [0, 64], sizes = [2, 32], strides = [1, 1]} : vector<2x96xf32> to vector<2x32xf32>
    %250 = vector.extract_strided_slice %220 {offsets = [0, 64], sizes = [2, 32], strides = [1, 1]} : vector<2x96xf32> to vector<2x32xf32>
    %251 = arith.mulf %247, %250 : vector<2x32xf32>
    %252 = arith.addf %249, %251 : vector<2x32xf32>
    %253 = math.tanh %252 : vector<2x32xf32>
    %cst_54 = arith.constant 1.000000e+00 : f32
    %254 = vector.broadcast %cst_54 : f32 to vector<2x32xf32>
    %255 = arith.subf %254, %248 : vector<2x32xf32>
    %256 = arith.mulf %255, %253 : vector<2x32xf32>
    %257 = arith.mulf %248, %192 : vector<2x32xf32>
    %258 = arith.addf %256, %257 : vector<2x32xf32>
    %259 = arith.truncf %258 : vector<2x32xf32> to vector<2x32xbf16>
    %cst_55 = arith.constant dense<0.000000e+00> : vector<2x192xf32>
    %260 = tpu.matmul %259, %1, %cst_55 {dimension_numbers = #tpu.dot_dimension_numbers<[1], [0], [0], [1], [0, 0, 1, 1], [], []>} : vector<2x32xbf16>, vector<32x192xbf16>, vector<2x192xf32> -> vector<2x192xf32>
    %261 = arith.addf %260, %6 : vector<2x192xf32>
    %262 = vector.extract_strided_slice %261 {offsets = [0, 128], sizes = [2, 64], strides = [1, 1]} : vector<2x192xf32> to vector<2x64xf32>
    %cst_56 = arith.constant dense<0xFF800000> : vector<2xf32>
    %263 = vector.multi_reduction <maximumf>, %262, %cst_56 [1] : vector<2x64xf32> to vector<2xf32>
    %264 = vector.shape_cast %263 : vector<2xf32> to vector<2x1xf32>
    %265 = vector.broadcast %264 : vector<2x1xf32> to vector<2x64xf32>
    %266 = arith.subf %262, %265 : vector<2x64xf32>
    %267 = math.exp %266 : vector<2x64xf32>
    %cst_57 = arith.constant dense<0.000000e+00> : vector<2xf32>
    %268 = vector.multi_reduction <add>, %267, %cst_57 [1] : vector<2x64xf32> to vector<2xf32>
    %269 = vector.shape_cast %268 : vector<2xf32> to vector<2x1xf32>
    %270 = math.log %269 : vector<2x1xf32>
    %271 = arith.addf %264, %270 : vector<2x1xf32>
    %272 = vector.broadcast %271 : vector<2x1xf32> to vector<2x64xf32>
    %273 = arith.subf %262, %272 : vector<2x64xf32>
    %274 = vector.broadcast %264 : vector<2x1xf32> to vector<2x64xf32>
    %275 = arith.cmpf oeq, %262, %274 : vector<2x64xf32>
    %c64_i32_58 = arith.constant 64 : i32
    %276 = vector.broadcast %c64_i32_58 : i32 to vector<2x64xi32>
    %277 = arith.select %275, %13, %276 : vector<2x64xi1>, vector<2x64xi32>
    %cst_59 = arith.constant dense<2147483647> : vector<2xi32>
    %278 = vector.multi_reduction <minsi>, %277, %cst_59 [1] : vector<2x64xi32> to vector<2xi32>
    %279 = vector.shape_cast %278 : vector<2xi32> to vector<2x1xi32>
    %280 = vector.broadcast %279 : vector<2x1xi32> to vector<2x64xi32>
    %281 = arith.cmpi eq, %13, %280 : vector<2x64xi32>
    %282 = arith.extui %281 : vector<2x64xi1> to vector<2x64xi32>
    %283 = arith.sitofp %282 : vector<2x64xi32> to vector<2x64xf32>
    %284 = arith.truncf %283 : vector<2x64xf32> to vector<2x64xbf16>
    %cst_60 = arith.constant dense<0.000000e+00> : vector<2x96xf32>
    %285 = tpu.matmul %284, %0, %cst_60 {dimension_numbers = #tpu.dot_dimension_numbers<[1], [0], [0], [1], [0, 0, 1, 1], [], []>} : vector<2x64xbf16>, vector<64x96xbf16>, vector<2x96xf32> -> vector<2x96xf32>
    %286 = vector.extract_strided_slice %261 {offsets = [0, 0], sizes = [2, 96], strides = [1, 1]} : vector<2x192xf32> to vector<2x96xf32>
    %287 = vector.extract_strided_slice %261 {offsets = [0, 0], sizes = [2, 128], strides = [1, 1]} : vector<2x192xf32> to vector<2x128xf32>
    %288 = vector.shape_cast %287 : vector<2x128xf32> to vector<2x1x128xf32>
    %289 = vector.broadcast %288 : vector<2x1x128xf32> to vector<2x8x128xf32>
    %290 = arith.addf %289, %3 : vector<2x8x128xf32>
    %291 = math.tanh %290 : vector<2x8x128xf32>
    %292 = arith.mulf %291, %12 : vector<2x8x128xf32>
    %cst_61 = arith.constant dense<0.000000e+00> : vector<2x8xf32>
    %293 = vector.multi_reduction <add>, %292, %cst_61 [2] : vector<2x8x128xf32> to vector<2x8xf32>
    %294 = math.exp %293 : vector<2x8xf32>
    %cst_62 = arith.constant dense<0.000000e+00> : vector<2xf32>
    %295 = vector.multi_reduction <add>, %294, %cst_62 [1] : vector<2x8xf32> to vector<2xf32>
    %296 = vector.shape_cast %295 : vector<2xf32> to vector<2x1xf32>
    %297 = tpu.reciprocal %296 {approx = true} : vector<2x1xf32> -> vector<2x1xf32>
    %298 = vector.broadcast %297 : vector<2x1xf32> to vector<2x8xf32>
    %299 = arith.mulf %294, %298 : vector<2x8xf32>
    %300 = vector.shape_cast %299 : vector<2x8xf32> to vector<2x8x1xf32>
    %301 = vector.broadcast %300 : vector<2x8x1xf32> to vector<2x8x96xf32>
    %302 = arith.mulf %301, %2 : vector<2x8x96xf32>
    %cst_63 = arith.constant dense<0.000000e+00> : vector<2x96xf32>
    %303 = vector.multi_reduction <add>, %302, %cst_63 [1] : vector<2x8x96xf32> to vector<2x96xf32>
    %304 = arith.addf %285, %303 : vector<2x96xf32>
    %305 = arith.addf %304, %9 : vector<2x96xf32>
    %306 = arith.addf %305, %286 : vector<2x96xf32>
    %307 = vector.extract_strided_slice %306 {offsets = [0, 0], sizes = [2, 64], strides = [1, 1]} : vector<2x96xf32> to vector<2x64xf32>
    %308 = arith.negf %307 : vector<2x64xf32>
    %309 = math.exp %308 : vector<2x64xf32>
    %cst_64 = arith.constant 1.000000e+00 : f32
    %310 = vector.broadcast %cst_64 : f32 to vector<2x64xf32>
    %311 = arith.addf %310, %309 : vector<2x64xf32>
    %312 = arith.divf %310, %311 : vector<2x64xf32>
    %313 = vector.extract_strided_slice %312 {offsets = [0, 0], sizes = [2, 32], strides = [1, 1]} : vector<2x64xf32> to vector<2x32xf32>
    %314 = vector.extract_strided_slice %312 {offsets = [0, 32], sizes = [2, 32], strides = [1, 1]} : vector<2x64xf32> to vector<2x32xf32>
    %315 = vector.extract_strided_slice %305 {offsets = [0, 64], sizes = [2, 32], strides = [1, 1]} : vector<2x96xf32> to vector<2x32xf32>
    %316 = vector.extract_strided_slice %286 {offsets = [0, 64], sizes = [2, 32], strides = [1, 1]} : vector<2x96xf32> to vector<2x32xf32>
    %317 = arith.mulf %313, %316 : vector<2x32xf32>
    %318 = arith.addf %315, %317 : vector<2x32xf32>
    %319 = math.tanh %318 : vector<2x32xf32>
    %cst_65 = arith.constant 1.000000e+00 : f32
    %320 = vector.broadcast %cst_65 : f32 to vector<2x32xf32>
    %321 = arith.subf %320, %314 : vector<2x32xf32>
    %322 = arith.mulf %321, %319 : vector<2x32xf32>
    %323 = arith.mulf %314, %258 : vector<2x32xf32>
    %324 = arith.addf %322, %323 : vector<2x32xf32>
    %325 = arith.truncf %324 : vector<2x32xf32> to vector<2x32xbf16>
    %cst_66 = arith.constant dense<0.000000e+00> : vector<2x192xf32>
    %326 = tpu.matmul %325, %1, %cst_66 {dimension_numbers = #tpu.dot_dimension_numbers<[1], [0], [0], [1], [0, 0, 1, 1], [], []>} : vector<2x32xbf16>, vector<32x192xbf16>, vector<2x192xf32> -> vector<2x192xf32>
    %327 = arith.addf %326, %6 : vector<2x192xf32>
    %328 = vector.extract_strided_slice %327 {offsets = [0, 128], sizes = [2, 64], strides = [1, 1]} : vector<2x192xf32> to vector<2x64xf32>
    %cst_67 = arith.constant dense<0xFF800000> : vector<2xf32>
    %329 = vector.multi_reduction <maximumf>, %328, %cst_67 [1] : vector<2x64xf32> to vector<2xf32>
    %330 = vector.shape_cast %329 : vector<2xf32> to vector<2x1xf32>
    %331 = vector.broadcast %330 : vector<2x1xf32> to vector<2x64xf32>
    %332 = arith.subf %328, %331 : vector<2x64xf32>
    %333 = math.exp %332 : vector<2x64xf32>
    %cst_68 = arith.constant dense<0.000000e+00> : vector<2xf32>
    %334 = vector.multi_reduction <add>, %333, %cst_68 [1] : vector<2x64xf32> to vector<2xf32>
    %335 = vector.shape_cast %334 : vector<2xf32> to vector<2x1xf32>
    %336 = math.log %335 : vector<2x1xf32>
    %337 = arith.addf %330, %336 : vector<2x1xf32>
    %338 = vector.broadcast %337 : vector<2x1xf32> to vector<2x64xf32>
    %339 = arith.subf %328, %338 : vector<2x64xf32>
    %340 = vector.broadcast %330 : vector<2x1xf32> to vector<2x64xf32>
    %341 = arith.cmpf oeq, %328, %340 : vector<2x64xf32>
    %c64_i32_69 = arith.constant 64 : i32
    %342 = vector.broadcast %c64_i32_69 : i32 to vector<2x64xi32>
    %343 = arith.select %341, %13, %342 : vector<2x64xi1>, vector<2x64xi32>
    %cst_70 = arith.constant dense<2147483647> : vector<2xi32>
    %344 = vector.multi_reduction <minsi>, %343, %cst_70 [1] : vector<2x64xi32> to vector<2xi32>
    %345 = vector.shape_cast %344 : vector<2xi32> to vector<2x1xi32>
    %346 = vector.broadcast %345 : vector<2x1xi32> to vector<2x64xi32>
    %347 = arith.cmpi eq, %13, %346 : vector<2x64xi32>
    %348 = arith.extui %347 : vector<2x64xi1> to vector<2x64xi32>
    %349 = arith.sitofp %348 : vector<2x64xi32> to vector<2x64xf32>
    %350 = arith.truncf %349 : vector<2x64xf32> to vector<2x64xbf16>
    %cst_71 = arith.constant dense<0.000000e+00> : vector<2x96xf32>
    %351 = tpu.matmul %350, %0, %cst_71 {dimension_numbers = #tpu.dot_dimension_numbers<[1], [0], [0], [1], [0, 0, 1, 1], [], []>} : vector<2x64xbf16>, vector<64x96xbf16>, vector<2x96xf32> -> vector<2x96xf32>
    %352 = vector.extract_strided_slice %327 {offsets = [0, 0], sizes = [2, 96], strides = [1, 1]} : vector<2x192xf32> to vector<2x96xf32>
    %353 = vector.extract_strided_slice %327 {offsets = [0, 0], sizes = [2, 128], strides = [1, 1]} : vector<2x192xf32> to vector<2x128xf32>
    %354 = vector.shape_cast %353 : vector<2x128xf32> to vector<2x1x128xf32>
    %355 = vector.broadcast %354 : vector<2x1x128xf32> to vector<2x8x128xf32>
    %356 = arith.addf %355, %3 : vector<2x8x128xf32>
    %357 = math.tanh %356 : vector<2x8x128xf32>
    %358 = arith.mulf %357, %12 : vector<2x8x128xf32>
    %cst_72 = arith.constant dense<0.000000e+00> : vector<2x8xf32>
    %359 = vector.multi_reduction <add>, %358, %cst_72 [2] : vector<2x8x128xf32> to vector<2x8xf32>
    %360 = math.exp %359 : vector<2x8xf32>
    %cst_73 = arith.constant dense<0.000000e+00> : vector<2xf32>
    %361 = vector.multi_reduction <add>, %360, %cst_73 [1] : vector<2x8xf32> to vector<2xf32>
    %362 = vector.shape_cast %361 : vector<2xf32> to vector<2x1xf32>
    %363 = tpu.reciprocal %362 {approx = true} : vector<2x1xf32> -> vector<2x1xf32>
    %364 = vector.broadcast %363 : vector<2x1xf32> to vector<2x8xf32>
    %365 = arith.mulf %360, %364 : vector<2x8xf32>
    %366 = vector.shape_cast %365 : vector<2x8xf32> to vector<2x8x1xf32>
    %367 = vector.broadcast %366 : vector<2x8x1xf32> to vector<2x8x96xf32>
    %368 = arith.mulf %367, %2 : vector<2x8x96xf32>
    %cst_74 = arith.constant dense<0.000000e+00> : vector<2x96xf32>
    %369 = vector.multi_reduction <add>, %368, %cst_74 [1] : vector<2x8x96xf32> to vector<2x96xf32>
    %370 = arith.addf %351, %369 : vector<2x96xf32>
    %371 = arith.addf %370, %9 : vector<2x96xf32>
    %372 = arith.addf %371, %352 : vector<2x96xf32>
    %373 = vector.extract_strided_slice %372 {offsets = [0, 0], sizes = [2, 64], strides = [1, 1]} : vector<2x96xf32> to vector<2x64xf32>
    %374 = arith.negf %373 : vector<2x64xf32>
    %375 = math.exp %374 : vector<2x64xf32>
    %cst_75 = arith.constant 1.000000e+00 : f32
    %376 = vector.broadcast %cst_75 : f32 to vector<2x64xf32>
    %377 = arith.addf %376, %375 : vector<2x64xf32>
    %378 = arith.divf %376, %377 : vector<2x64xf32>
    %379 = vector.extract_strided_slice %378 {offsets = [0, 0], sizes = [2, 32], strides = [1, 1]} : vector<2x64xf32> to vector<2x32xf32>
    %380 = vector.extract_strided_slice %378 {offsets = [0, 32], sizes = [2, 32], strides = [1, 1]} : vector<2x64xf32> to vector<2x32xf32>
    %381 = vector.extract_strided_slice %371 {offsets = [0, 64], sizes = [2, 32], strides = [1, 1]} : vector<2x96xf32> to vector<2x32xf32>
    %382 = vector.extract_strided_slice %352 {offsets = [0, 64], sizes = [2, 32], strides = [1, 1]} : vector<2x96xf32> to vector<2x32xf32>
    %383 = arith.mulf %379, %382 : vector<2x32xf32>
    %384 = arith.addf %381, %383 : vector<2x32xf32>
    %385 = math.tanh %384 : vector<2x32xf32>
    %cst_76 = arith.constant 1.000000e+00 : f32
    %386 = vector.broadcast %cst_76 : f32 to vector<2x32xf32>
    %387 = arith.subf %386, %380 : vector<2x32xf32>
    %388 = arith.mulf %387, %385 : vector<2x32xf32>
    %389 = arith.mulf %380, %324 : vector<2x32xf32>
    %390 = arith.addf %388, %389 : vector<2x32xf32>
    %391 = arith.truncf %390 : vector<2x32xf32> to vector<2x32xbf16>
    %cst_77 = arith.constant dense<0.000000e+00> : vector<2x192xf32>
    %392 = tpu.matmul %391, %1, %cst_77 {dimension_numbers = #tpu.dot_dimension_numbers<[1], [0], [0], [1], [0, 0, 1, 1], [], []>} : vector<2x32xbf16>, vector<32x192xbf16>, vector<2x192xf32> -> vector<2x192xf32>
    %393 = arith.addf %392, %6 : vector<2x192xf32>
    %394 = vector.extract_strided_slice %393 {offsets = [0, 128], sizes = [2, 64], strides = [1, 1]} : vector<2x192xf32> to vector<2x64xf32>
    %cst_78 = arith.constant dense<0xFF800000> : vector<2xf32>
    %395 = vector.multi_reduction <maximumf>, %394, %cst_78 [1] : vector<2x64xf32> to vector<2xf32>
    %396 = vector.shape_cast %395 : vector<2xf32> to vector<2x1xf32>
    %397 = vector.broadcast %396 : vector<2x1xf32> to vector<2x64xf32>
    %398 = arith.subf %394, %397 : vector<2x64xf32>
    %399 = math.exp %398 : vector<2x64xf32>
    %cst_79 = arith.constant dense<0.000000e+00> : vector<2xf32>
    %400 = vector.multi_reduction <add>, %399, %cst_79 [1] : vector<2x64xf32> to vector<2xf32>
    %401 = vector.shape_cast %400 : vector<2xf32> to vector<2x1xf32>
    %402 = math.log %401 : vector<2x1xf32>
    %403 = arith.addf %396, %402 : vector<2x1xf32>
    %404 = vector.broadcast %403 : vector<2x1xf32> to vector<2x64xf32>
    %405 = arith.subf %394, %404 : vector<2x64xf32>
    %406 = vector.broadcast %396 : vector<2x1xf32> to vector<2x64xf32>
    %407 = arith.cmpf oeq, %394, %406 : vector<2x64xf32>
    %c64_i32_80 = arith.constant 64 : i32
    %408 = vector.broadcast %c64_i32_80 : i32 to vector<2x64xi32>
    %409 = arith.select %407, %13, %408 : vector<2x64xi1>, vector<2x64xi32>
    %cst_81 = arith.constant dense<2147483647> : vector<2xi32>
    %410 = vector.multi_reduction <minsi>, %409, %cst_81 [1] : vector<2x64xi32> to vector<2xi32>
    %411 = vector.shape_cast %410 : vector<2xi32> to vector<2x1xi32>
    %412 = vector.broadcast %411 : vector<2x1xi32> to vector<2x64xi32>
    %413 = arith.cmpi eq, %13, %412 : vector<2x64xi32>
    %414 = arith.extui %413 : vector<2x64xi1> to vector<2x64xi32>
    %415 = arith.sitofp %414 : vector<2x64xi32> to vector<2x64xf32>
    %416 = arith.truncf %415 : vector<2x64xf32> to vector<2x64xbf16>
    %cst_82 = arith.constant dense<0.000000e+00> : vector<2x96xf32>
    %417 = tpu.matmul %416, %0, %cst_82 {dimension_numbers = #tpu.dot_dimension_numbers<[1], [0], [0], [1], [0, 0, 1, 1], [], []>} : vector<2x64xbf16>, vector<64x96xbf16>, vector<2x96xf32> -> vector<2x96xf32>
    %418 = vector.extract_strided_slice %393 {offsets = [0, 0], sizes = [2, 96], strides = [1, 1]} : vector<2x192xf32> to vector<2x96xf32>
    %419 = vector.extract_strided_slice %393 {offsets = [0, 0], sizes = [2, 128], strides = [1, 1]} : vector<2x192xf32> to vector<2x128xf32>
    %420 = vector.shape_cast %419 : vector<2x128xf32> to vector<2x1x128xf32>
    %421 = vector.broadcast %420 : vector<2x1x128xf32> to vector<2x8x128xf32>
    %422 = arith.addf %421, %3 : vector<2x8x128xf32>
    %423 = math.tanh %422 : vector<2x8x128xf32>
    %424 = arith.mulf %423, %12 : vector<2x8x128xf32>
    %cst_83 = arith.constant dense<0.000000e+00> : vector<2x8xf32>
    %425 = vector.multi_reduction <add>, %424, %cst_83 [2] : vector<2x8x128xf32> to vector<2x8xf32>
    %426 = math.exp %425 : vector<2x8xf32>
    %cst_84 = arith.constant dense<0.000000e+00> : vector<2xf32>
    %427 = vector.multi_reduction <add>, %426, %cst_84 [1] : vector<2x8xf32> to vector<2xf32>
    %428 = vector.shape_cast %427 : vector<2xf32> to vector<2x1xf32>
    %429 = tpu.reciprocal %428 {approx = true} : vector<2x1xf32> -> vector<2x1xf32>
    %430 = vector.broadcast %429 : vector<2x1xf32> to vector<2x8xf32>
    %431 = arith.mulf %426, %430 : vector<2x8xf32>
    %432 = vector.shape_cast %431 : vector<2x8xf32> to vector<2x8x1xf32>
    %433 = vector.broadcast %432 : vector<2x8x1xf32> to vector<2x8x96xf32>
    %434 = arith.mulf %433, %2 : vector<2x8x96xf32>
    %cst_85 = arith.constant dense<0.000000e+00> : vector<2x96xf32>
    %435 = vector.multi_reduction <add>, %434, %cst_85 [1] : vector<2x8x96xf32> to vector<2x96xf32>
    %436 = arith.addf %417, %435 : vector<2x96xf32>
    %437 = arith.addf %436, %9 : vector<2x96xf32>
    %438 = arith.addf %437, %418 : vector<2x96xf32>
    %439 = vector.extract_strided_slice %438 {offsets = [0, 0], sizes = [2, 64], strides = [1, 1]} : vector<2x96xf32> to vector<2x64xf32>
    %440 = arith.negf %439 : vector<2x64xf32>
    %441 = math.exp %440 : vector<2x64xf32>
    %cst_86 = arith.constant 1.000000e+00 : f32
    %442 = vector.broadcast %cst_86 : f32 to vector<2x64xf32>
    %443 = arith.addf %442, %441 : vector<2x64xf32>
    %444 = arith.divf %442, %443 : vector<2x64xf32>
    %445 = vector.extract_strided_slice %444 {offsets = [0, 0], sizes = [2, 32], strides = [1, 1]} : vector<2x64xf32> to vector<2x32xf32>
    %446 = vector.extract_strided_slice %444 {offsets = [0, 32], sizes = [2, 32], strides = [1, 1]} : vector<2x64xf32> to vector<2x32xf32>
    %447 = vector.extract_strided_slice %437 {offsets = [0, 64], sizes = [2, 32], strides = [1, 1]} : vector<2x96xf32> to vector<2x32xf32>
    %448 = vector.extract_strided_slice %418 {offsets = [0, 64], sizes = [2, 32], strides = [1, 1]} : vector<2x96xf32> to vector<2x32xf32>
    %449 = arith.mulf %445, %448 : vector<2x32xf32>
    %450 = arith.addf %447, %449 : vector<2x32xf32>
    %451 = math.tanh %450 : vector<2x32xf32>
    %cst_87 = arith.constant 1.000000e+00 : f32
    %452 = vector.broadcast %cst_87 : f32 to vector<2x32xf32>
    %453 = arith.subf %452, %446 : vector<2x32xf32>
    %454 = arith.mulf %453, %451 : vector<2x32xf32>
    %455 = arith.mulf %446, %390 : vector<2x32xf32>
    %456 = arith.addf %454, %455 : vector<2x32xf32>
    %457 = arith.truncf %456 : vector<2x32xf32> to vector<2x32xbf16>
    %cst_88 = arith.constant dense<0.000000e+00> : vector<2x192xf32>
    %458 = tpu.matmul %457, %1, %cst_88 {dimension_numbers = #tpu.dot_dimension_numbers<[1], [0], [0], [1], [0, 0, 1, 1], [], []>} : vector<2x32xbf16>, vector<32x192xbf16>, vector<2x192xf32> -> vector<2x192xf32>
    %459 = arith.addf %458, %6 : vector<2x192xf32>
    %460 = vector.extract_strided_slice %459 {offsets = [0, 128], sizes = [2, 64], strides = [1, 1]} : vector<2x192xf32> to vector<2x64xf32>
    %cst_89 = arith.constant dense<0xFF800000> : vector<2xf32>
    %461 = vector.multi_reduction <maximumf>, %460, %cst_89 [1] : vector<2x64xf32> to vector<2xf32>
    %462 = vector.shape_cast %461 : vector<2xf32> to vector<2x1xf32>
    %463 = vector.broadcast %462 : vector<2x1xf32> to vector<2x64xf32>
    %464 = arith.subf %460, %463 : vector<2x64xf32>
    %465 = math.exp %464 : vector<2x64xf32>
    %cst_90 = arith.constant dense<0.000000e+00> : vector<2xf32>
    %466 = vector.multi_reduction <add>, %465, %cst_90 [1] : vector<2x64xf32> to vector<2xf32>
    %467 = vector.shape_cast %466 : vector<2xf32> to vector<2x1xf32>
    %468 = math.log %467 : vector<2x1xf32>
    %469 = arith.addf %462, %468 : vector<2x1xf32>
    %470 = vector.broadcast %469 : vector<2x1xf32> to vector<2x64xf32>
    %471 = arith.subf %460, %470 : vector<2x64xf32>
    %472 = vector.broadcast %462 : vector<2x1xf32> to vector<2x64xf32>
    %473 = arith.cmpf oeq, %460, %472 : vector<2x64xf32>
    %c64_i32_91 = arith.constant 64 : i32
    %474 = vector.broadcast %c64_i32_91 : i32 to vector<2x64xi32>
    %475 = arith.select %473, %13, %474 : vector<2x64xi1>, vector<2x64xi32>
    %cst_92 = arith.constant dense<2147483647> : vector<2xi32>
    %476 = vector.multi_reduction <minsi>, %475, %cst_92 [1] : vector<2x64xi32> to vector<2xi32>
    %477 = vector.shape_cast %476 : vector<2xi32> to vector<2x1xi32>
    %478 = vector.broadcast %477 : vector<2x1xi32> to vector<2x64xi32>
    %479 = arith.cmpi eq, %13, %478 : vector<2x64xi32>
    %480 = arith.extui %479 : vector<2x64xi1> to vector<2x64xi32>
    %481 = arith.sitofp %480 : vector<2x64xi32> to vector<2x64xf32>
    %482 = arith.truncf %481 : vector<2x64xf32> to vector<2x64xbf16>
    %cst_93 = arith.constant dense<0.000000e+00> : vector<2x96xf32>
    %483 = tpu.matmul %482, %0, %cst_93 {dimension_numbers = #tpu.dot_dimension_numbers<[1], [0], [0], [1], [0, 0, 1, 1], [], []>} : vector<2x64xbf16>, vector<64x96xbf16>, vector<2x96xf32> -> vector<2x96xf32>
    %484 = vector.extract_strided_slice %459 {offsets = [0, 0], sizes = [2, 96], strides = [1, 1]} : vector<2x192xf32> to vector<2x96xf32>
    %485 = vector.extract_strided_slice %459 {offsets = [0, 0], sizes = [2, 128], strides = [1, 1]} : vector<2x192xf32> to vector<2x128xf32>
    %486 = vector.shape_cast %485 : vector<2x128xf32> to vector<2x1x128xf32>
    %487 = vector.broadcast %486 : vector<2x1x128xf32> to vector<2x8x128xf32>
    %488 = arith.addf %487, %3 : vector<2x8x128xf32>
    %489 = math.tanh %488 : vector<2x8x128xf32>
    %490 = arith.mulf %489, %12 : vector<2x8x128xf32>
    %cst_94 = arith.constant dense<0.000000e+00> : vector<2x8xf32>
    %491 = vector.multi_reduction <add>, %490, %cst_94 [2] : vector<2x8x128xf32> to vector<2x8xf32>
    %492 = math.exp %491 : vector<2x8xf32>
    %cst_95 = arith.constant dense<0.000000e+00> : vector<2xf32>
    %493 = vector.multi_reduction <add>, %492, %cst_95 [1] : vector<2x8xf32> to vector<2xf32>
    %494 = vector.shape_cast %493 : vector<2xf32> to vector<2x1xf32>
    %495 = tpu.reciprocal %494 {approx = true} : vector<2x1xf32> -> vector<2x1xf32>
    %496 = vector.broadcast %495 : vector<2x1xf32> to vector<2x8xf32>
    %497 = arith.mulf %492, %496 : vector<2x8xf32>
    %498 = vector.shape_cast %497 : vector<2x8xf32> to vector<2x8x1xf32>
    %499 = vector.broadcast %498 : vector<2x8x1xf32> to vector<2x8x96xf32>
    %500 = arith.mulf %499, %2 : vector<2x8x96xf32>
    %cst_96 = arith.constant dense<0.000000e+00> : vector<2x96xf32>
    %501 = vector.multi_reduction <add>, %500, %cst_96 [1] : vector<2x8x96xf32> to vector<2x96xf32>
    %502 = arith.addf %483, %501 : vector<2x96xf32>
    %503 = arith.addf %502, %9 : vector<2x96xf32>
    %504 = arith.addf %503, %484 : vector<2x96xf32>
    %505 = vector.extract_strided_slice %504 {offsets = [0, 0], sizes = [2, 64], strides = [1, 1]} : vector<2x96xf32> to vector<2x64xf32>
    %506 = arith.negf %505 : vector<2x64xf32>
    %507 = math.exp %506 : vector<2x64xf32>
    %cst_97 = arith.constant 1.000000e+00 : f32
    %508 = vector.broadcast %cst_97 : f32 to vector<2x64xf32>
    %509 = arith.addf %508, %507 : vector<2x64xf32>
    %510 = arith.divf %508, %509 : vector<2x64xf32>
    %511 = vector.extract_strided_slice %510 {offsets = [0, 0], sizes = [2, 32], strides = [1, 1]} : vector<2x64xf32> to vector<2x32xf32>
    %512 = vector.extract_strided_slice %510 {offsets = [0, 32], sizes = [2, 32], strides = [1, 1]} : vector<2x64xf32> to vector<2x32xf32>
    %513 = vector.extract_strided_slice %503 {offsets = [0, 64], sizes = [2, 32], strides = [1, 1]} : vector<2x96xf32> to vector<2x32xf32>
    %514 = vector.extract_strided_slice %484 {offsets = [0, 64], sizes = [2, 32], strides = [1, 1]} : vector<2x96xf32> to vector<2x32xf32>
    %515 = arith.mulf %511, %514 : vector<2x32xf32>
    %516 = arith.addf %513, %515 : vector<2x32xf32>
    %517 = math.tanh %516 : vector<2x32xf32>
    %cst_98 = arith.constant 1.000000e+00 : f32
    %518 = vector.broadcast %cst_98 : f32 to vector<2x32xf32>
    %519 = arith.subf %518, %512 : vector<2x32xf32>
    %520 = arith.mulf %519, %517 : vector<2x32xf32>
    %521 = arith.mulf %512, %456 : vector<2x32xf32>
    %522 = arith.addf %520, %521 : vector<2x32xf32>
    %523 = arith.truncf %522 : vector<2x32xf32> to vector<2x32xbf16>
    %cst_99 = arith.constant dense<0.000000e+00> : vector<2x192xf32>
    %524 = tpu.matmul %523, %1, %cst_99 {dimension_numbers = #tpu.dot_dimension_numbers<[1], [0], [0], [1], [0, 0, 1, 1], [], []>} : vector<2x32xbf16>, vector<32x192xbf16>, vector<2x192xf32> -> vector<2x192xf32>
    %525 = arith.addf %524, %6 : vector<2x192xf32>
    %526 = vector.extract_strided_slice %525 {offsets = [0, 128], sizes = [2, 64], strides = [1, 1]} : vector<2x192xf32> to vector<2x64xf32>
    %cst_100 = arith.constant dense<0xFF800000> : vector<2xf32>
    %527 = vector.multi_reduction <maximumf>, %526, %cst_100 [1] : vector<2x64xf32> to vector<2xf32>
    %528 = vector.shape_cast %527 : vector<2xf32> to vector<2x1xf32>
    %529 = vector.broadcast %528 : vector<2x1xf32> to vector<2x64xf32>
    %530 = arith.subf %526, %529 : vector<2x64xf32>
    %531 = math.exp %530 : vector<2x64xf32>
    %cst_101 = arith.constant dense<0.000000e+00> : vector<2xf32>
    %532 = vector.multi_reduction <add>, %531, %cst_101 [1] : vector<2x64xf32> to vector<2xf32>
    %533 = vector.shape_cast %532 : vector<2xf32> to vector<2x1xf32>
    %534 = math.log %533 : vector<2x1xf32>
    %535 = arith.addf %528, %534 : vector<2x1xf32>
    %536 = vector.broadcast %535 : vector<2x1xf32> to vector<2x64xf32>
    %537 = arith.subf %526, %536 : vector<2x64xf32>
    %538 = vector.broadcast %528 : vector<2x1xf32> to vector<2x64xf32>
    %539 = arith.cmpf oeq, %526, %538 : vector<2x64xf32>
    %c64_i32_102 = arith.constant 64 : i32
    %540 = vector.broadcast %c64_i32_102 : i32 to vector<2x64xi32>
    %541 = arith.select %539, %13, %540 : vector<2x64xi1>, vector<2x64xi32>
    %cst_103 = arith.constant dense<2147483647> : vector<2xi32>
    %542 = vector.multi_reduction <minsi>, %541, %cst_103 [1] : vector<2x64xi32> to vector<2xi32>
    %543 = vector.shape_cast %542 : vector<2xi32> to vector<2x1xi32>
    %544 = vector.broadcast %543 : vector<2x1xi32> to vector<2x64xi32>
    %545 = arith.cmpi eq, %13, %544 : vector<2x64xi32>
    %546 = arith.extui %545 : vector<2x64xi1> to vector<2x64xi32>
    %547 = arith.sitofp %546 : vector<2x64xi32> to vector<2x64xf32>
    %548 = arith.truncf %547 : vector<2x64xf32> to vector<2x64xbf16>
    %cst_104 = arith.constant dense<0.000000e+00> : vector<2x96xf32>
    %549 = tpu.matmul %548, %0, %cst_104 {dimension_numbers = #tpu.dot_dimension_numbers<[1], [0], [0], [1], [0, 0, 1, 1], [], []>} : vector<2x64xbf16>, vector<64x96xbf16>, vector<2x96xf32> -> vector<2x96xf32>
    %550 = vector.extract_strided_slice %525 {offsets = [0, 0], sizes = [2, 96], strides = [1, 1]} : vector<2x192xf32> to vector<2x96xf32>
    %551 = vector.extract_strided_slice %525 {offsets = [0, 0], sizes = [2, 128], strides = [1, 1]} : vector<2x192xf32> to vector<2x128xf32>
    %552 = vector.shape_cast %551 : vector<2x128xf32> to vector<2x1x128xf32>
    %553 = vector.broadcast %552 : vector<2x1x128xf32> to vector<2x8x128xf32>
    %554 = arith.addf %553, %3 : vector<2x8x128xf32>
    %555 = math.tanh %554 : vector<2x8x128xf32>
    %556 = arith.mulf %555, %12 : vector<2x8x128xf32>
    %cst_105 = arith.constant dense<0.000000e+00> : vector<2x8xf32>
    %557 = vector.multi_reduction <add>, %556, %cst_105 [2] : vector<2x8x128xf32> to vector<2x8xf32>
    %558 = math.exp %557 : vector<2x8xf32>
    %cst_106 = arith.constant dense<0.000000e+00> : vector<2xf32>
    %559 = vector.multi_reduction <add>, %558, %cst_106 [1] : vector<2x8xf32> to vector<2xf32>
    %560 = vector.shape_cast %559 : vector<2xf32> to vector<2x1xf32>
    %561 = tpu.reciprocal %560 {approx = true} : vector<2x1xf32> -> vector<2x1xf32>
    %562 = vector.broadcast %561 : vector<2x1xf32> to vector<2x8xf32>
    %563 = arith.mulf %558, %562 : vector<2x8xf32>
    %564 = vector.shape_cast %563 : vector<2x8xf32> to vector<2x8x1xf32>
    %565 = vector.broadcast %564 : vector<2x8x1xf32> to vector<2x8x96xf32>
    %566 = arith.mulf %565, %2 : vector<2x8x96xf32>
    %cst_107 = arith.constant dense<0.000000e+00> : vector<2x96xf32>
    %567 = vector.multi_reduction <add>, %566, %cst_107 [1] : vector<2x8x96xf32> to vector<2x96xf32>
    %568 = arith.addf %549, %567 : vector<2x96xf32>
    %569 = arith.addf %568, %9 : vector<2x96xf32>
    %570 = arith.addf %569, %550 : vector<2x96xf32>
    %571 = vector.extract_strided_slice %570 {offsets = [0, 0], sizes = [2, 64], strides = [1, 1]} : vector<2x96xf32> to vector<2x64xf32>
    %572 = arith.negf %571 : vector<2x64xf32>
    %573 = math.exp %572 : vector<2x64xf32>
    %cst_108 = arith.constant 1.000000e+00 : f32
    %574 = vector.broadcast %cst_108 : f32 to vector<2x64xf32>
    %575 = arith.addf %574, %573 : vector<2x64xf32>
    %576 = arith.divf %574, %575 : vector<2x64xf32>
    %577 = vector.extract_strided_slice %576 {offsets = [0, 0], sizes = [2, 32], strides = [1, 1]} : vector<2x64xf32> to vector<2x32xf32>
    %578 = vector.extract_strided_slice %576 {offsets = [0, 32], sizes = [2, 32], strides = [1, 1]} : vector<2x64xf32> to vector<2x32xf32>
    %579 = vector.extract_strided_slice %569 {offsets = [0, 64], sizes = [2, 32], strides = [1, 1]} : vector<2x96xf32> to vector<2x32xf32>
    %580 = vector.extract_strided_slice %550 {offsets = [0, 64], sizes = [2, 32], strides = [1, 1]} : vector<2x96xf32> to vector<2x32xf32>
    %581 = arith.mulf %577, %580 : vector<2x32xf32>
    %582 = arith.addf %579, %581 : vector<2x32xf32>
    %583 = math.tanh %582 : vector<2x32xf32>
    %cst_109 = arith.constant 1.000000e+00 : f32
    %584 = vector.broadcast %cst_109 : f32 to vector<2x32xf32>
    %585 = arith.subf %584, %578 : vector<2x32xf32>
    %586 = arith.mulf %585, %583 : vector<2x32xf32>
    %587 = arith.mulf %578, %522 : vector<2x32xf32>
    %588 = arith.addf %586, %587 : vector<2x32xf32>
    %589 = arith.truncf %588 : vector<2x32xf32> to vector<2x32xbf16>
    %cst_110 = arith.constant dense<0.000000e+00> : vector<2x192xf32>
    %590 = tpu.matmul %589, %1, %cst_110 {dimension_numbers = #tpu.dot_dimension_numbers<[1], [0], [0], [1], [0, 0, 1, 1], [], []>} : vector<2x32xbf16>, vector<32x192xbf16>, vector<2x192xf32> -> vector<2x192xf32>
    %591 = arith.addf %590, %6 : vector<2x192xf32>
    %592 = vector.extract_strided_slice %591 {offsets = [0, 128], sizes = [2, 64], strides = [1, 1]} : vector<2x192xf32> to vector<2x64xf32>
    %cst_111 = arith.constant dense<0xFF800000> : vector<2xf32>
    %593 = vector.multi_reduction <maximumf>, %592, %cst_111 [1] : vector<2x64xf32> to vector<2xf32>
    %594 = vector.shape_cast %593 : vector<2xf32> to vector<2x1xf32>
    %595 = vector.broadcast %594 : vector<2x1xf32> to vector<2x64xf32>
    %596 = arith.subf %592, %595 : vector<2x64xf32>
    %597 = math.exp %596 : vector<2x64xf32>
    %cst_112 = arith.constant dense<0.000000e+00> : vector<2xf32>
    %598 = vector.multi_reduction <add>, %597, %cst_112 [1] : vector<2x64xf32> to vector<2xf32>
    %599 = vector.shape_cast %598 : vector<2xf32> to vector<2x1xf32>
    %600 = math.log %599 : vector<2x1xf32>
    %601 = arith.addf %594, %600 : vector<2x1xf32>
    %602 = vector.broadcast %601 : vector<2x1xf32> to vector<2x64xf32>
    %603 = arith.subf %592, %602 : vector<2x64xf32>
    %604 = vector.broadcast %594 : vector<2x1xf32> to vector<2x64xf32>
    %605 = arith.cmpf oeq, %592, %604 : vector<2x64xf32>
    %c64_i32_113 = arith.constant 64 : i32
    %606 = vector.broadcast %c64_i32_113 : i32 to vector<2x64xi32>
    %607 = arith.select %605, %13, %606 : vector<2x64xi1>, vector<2x64xi32>
    %cst_114 = arith.constant dense<2147483647> : vector<2xi32>
    %608 = vector.multi_reduction <minsi>, %607, %cst_114 [1] : vector<2x64xi32> to vector<2xi32>
    %609 = vector.shape_cast %608 : vector<2xi32> to vector<2x1xi32>
    %610 = vector.broadcast %609 : vector<2x1xi32> to vector<2x64xi32>
    %611 = arith.cmpi eq, %13, %610 : vector<2x64xi32>
    %612 = arith.extui %611 : vector<2x64xi1> to vector<2x64xi32>
    %613 = arith.sitofp %612 : vector<2x64xi32> to vector<2x64xf32>
    %614 = arith.truncf %613 : vector<2x64xf32> to vector<2x64xbf16>
    %cst_115 = arith.constant dense<0.000000e+00> : vector<2x96xf32>
    %615 = tpu.matmul %614, %0, %cst_115 {dimension_numbers = #tpu.dot_dimension_numbers<[1], [0], [0], [1], [0, 0, 1, 1], [], []>} : vector<2x64xbf16>, vector<64x96xbf16>, vector<2x96xf32> -> vector<2x96xf32>
    %616 = vector.extract_strided_slice %591 {offsets = [0, 0], sizes = [2, 96], strides = [1, 1]} : vector<2x192xf32> to vector<2x96xf32>
    %617 = vector.extract_strided_slice %591 {offsets = [0, 0], sizes = [2, 128], strides = [1, 1]} : vector<2x192xf32> to vector<2x128xf32>
    %618 = vector.shape_cast %617 : vector<2x128xf32> to vector<2x1x128xf32>
    %619 = vector.broadcast %618 : vector<2x1x128xf32> to vector<2x8x128xf32>
    %620 = arith.addf %619, %3 : vector<2x8x128xf32>
    %621 = math.tanh %620 : vector<2x8x128xf32>
    %622 = arith.mulf %621, %12 : vector<2x8x128xf32>
    %cst_116 = arith.constant dense<0.000000e+00> : vector<2x8xf32>
    %623 = vector.multi_reduction <add>, %622, %cst_116 [2] : vector<2x8x128xf32> to vector<2x8xf32>
    %624 = math.exp %623 : vector<2x8xf32>
    %cst_117 = arith.constant dense<0.000000e+00> : vector<2xf32>
    %625 = vector.multi_reduction <add>, %624, %cst_117 [1] : vector<2x8xf32> to vector<2xf32>
    %626 = vector.shape_cast %625 : vector<2xf32> to vector<2x1xf32>
    %627 = tpu.reciprocal %626 {approx = true} : vector<2x1xf32> -> vector<2x1xf32>
    %628 = vector.broadcast %627 : vector<2x1xf32> to vector<2x8xf32>
    %629 = arith.mulf %624, %628 : vector<2x8xf32>
    %630 = vector.shape_cast %629 : vector<2x8xf32> to vector<2x8x1xf32>
    %631 = vector.broadcast %630 : vector<2x8x1xf32> to vector<2x8x96xf32>
    %632 = arith.mulf %631, %2 : vector<2x8x96xf32>
    %cst_118 = arith.constant dense<0.000000e+00> : vector<2x96xf32>
    %633 = vector.multi_reduction <add>, %632, %cst_118 [1] : vector<2x8x96xf32> to vector<2x96xf32>
    %634 = arith.addf %615, %633 : vector<2x96xf32>
    %635 = arith.addf %634, %9 : vector<2x96xf32>
    %636 = arith.addf %635, %616 : vector<2x96xf32>
    %637 = vector.extract_strided_slice %636 {offsets = [0, 0], sizes = [2, 64], strides = [1, 1]} : vector<2x96xf32> to vector<2x64xf32>
    %638 = arith.negf %637 : vector<2x64xf32>
    %639 = math.exp %638 : vector<2x64xf32>
    %cst_119 = arith.constant 1.000000e+00 : f32
    %640 = vector.broadcast %cst_119 : f32 to vector<2x64xf32>
    %641 = arith.addf %640, %639 : vector<2x64xf32>
    %642 = arith.divf %640, %641 : vector<2x64xf32>
    %643 = vector.extract_strided_slice %642 {offsets = [0, 0], sizes = [2, 32], strides = [1, 1]} : vector<2x64xf32> to vector<2x32xf32>
    %644 = vector.extract_strided_slice %642 {offsets = [0, 32], sizes = [2, 32], strides = [1, 1]} : vector<2x64xf32> to vector<2x32xf32>
    %645 = vector.extract_strided_slice %635 {offsets = [0, 64], sizes = [2, 32], strides = [1, 1]} : vector<2x96xf32> to vector<2x32xf32>
    %646 = vector.extract_strided_slice %616 {offsets = [0, 64], sizes = [2, 32], strides = [1, 1]} : vector<2x96xf32> to vector<2x32xf32>
    %647 = arith.mulf %643, %646 : vector<2x32xf32>
    %648 = arith.addf %645, %647 : vector<2x32xf32>
    %649 = math.tanh %648 : vector<2x32xf32>
    %cst_120 = arith.constant 1.000000e+00 : f32
    %650 = vector.broadcast %cst_120 : f32 to vector<2x32xf32>
    %651 = arith.subf %650, %644 : vector<2x32xf32>
    %652 = arith.mulf %651, %649 : vector<2x32xf32>
    %653 = arith.mulf %644, %588 : vector<2x32xf32>
    %654 = arith.addf %652, %653 : vector<2x32xf32>
    %655 = arith.truncf %654 : vector<2x32xf32> to vector<2x32xbf16>
    %cst_121 = arith.constant dense<0.000000e+00> : vector<2x192xf32>
    %656 = tpu.matmul %655, %1, %cst_121 {dimension_numbers = #tpu.dot_dimension_numbers<[1], [0], [0], [1], [0, 0, 1, 1], [], []>} : vector<2x32xbf16>, vector<32x192xbf16>, vector<2x192xf32> -> vector<2x192xf32>
    %657 = arith.addf %656, %6 : vector<2x192xf32>
    %658 = vector.extract_strided_slice %657 {offsets = [0, 128], sizes = [2, 64], strides = [1, 1]} : vector<2x192xf32> to vector<2x64xf32>
    %cst_122 = arith.constant dense<0xFF800000> : vector<2xf32>
    %659 = vector.multi_reduction <maximumf>, %658, %cst_122 [1] : vector<2x64xf32> to vector<2xf32>
    %660 = vector.shape_cast %659 : vector<2xf32> to vector<2x1xf32>
    %661 = vector.broadcast %660 : vector<2x1xf32> to vector<2x64xf32>
    %662 = arith.subf %658, %661 : vector<2x64xf32>
    %663 = math.exp %662 : vector<2x64xf32>
    %cst_123 = arith.constant dense<0.000000e+00> : vector<2xf32>
    %664 = vector.multi_reduction <add>, %663, %cst_123 [1] : vector<2x64xf32> to vector<2xf32>
    %665 = vector.shape_cast %664 : vector<2xf32> to vector<2x1xf32>
    %666 = math.log %665 : vector<2x1xf32>
    %667 = arith.addf %660, %666 : vector<2x1xf32>
    %668 = vector.broadcast %667 : vector<2x1xf32> to vector<2x64xf32>
    %669 = arith.subf %658, %668 : vector<2x64xf32>
    %c0_124 = arith.constant 0 : index
    %c0_125 = arith.constant 0 : index
    %670 = vector.load %arg9[%c0_124, %c0_125] : memref<2x32xf32, #tpu.memory_space<vmem>>, vector<2x32xf32>
    tpu.vector_store %arg9[%c0_124, %c0_125], %654 {strides = array<i32>} : memref<2x32xf32, #tpu.memory_space<vmem>>, vector<2x32xf32>,
    %671 = tpu.concatenate %75, %141, %207, %273, %339, %405, %471, %537, %603, %669 in 1 : vector<2x64xf32>, vector<2x64xf32>, vector<2x64xf32>, vector<2x64xf32>, vector<2x64xf32>, vector<2x64xf32>, vector<2x64xf32>, vector<2x64xf32>, vector<2x64xf32>, vector<2x64xf32> -> vector<2x640xf32>
    %c0_126 = arith.constant 0 : index
    %c0_127 = arith.constant 0 : index
    %672 = vector.load %arg8[%c0_126, %c0_127] : memref<2x640xf32, #tpu.memory_space<vmem>>, vector<2x640xf32>
    tpu.vector_store %arg8[%c0_126, %c0_127], %671 {strides = array<i32>} : memref<2x640xf32, #tpu.memory_space<vmem>>, vector<2x640xf32>,
    %673 = tpu.concatenate %35, %101, %167, %233, %299, %365, %431, %497, %563, %629 in 1 : vector<2x8xf32>, vector<2x8xf32>, vector<2x8xf32>, vector<2x8xf32>, vector<2x8xf32>, vector<2x8xf32>, vector<2x8xf32>, vector<2x8xf32>, vector<2x8xf32>, vector<2x8xf32> -> vector<2x80xf32>
    %c0_128 = arith.constant 0 : index
    %c0_129 = arith.constant 0 : index
    %674 = vector.load %arg10[%c0_128, %c0_129] : memref<2x80xf32, #tpu.memory_space<vmem>>, vector<2x80xf32>
    tpu.vector_store %arg10[%c0_128, %c0_129], %673 {strides = array<i32>} : memref<2x80xf32, #tpu.memory_space<vmem>>, vector<2x80xf32>,
    return
  }
}

</mosaic_0001>

<bundles_post_ra>
// kernel: tpu_custom_call.1
= control target key start
LH: loop header
LB: loop body
LE: loop exit
PB: predicated region body
PF: predicated region fallthrough
CT: control target
= control target key end

     0   :  { %16 = vsyncpa [#allocation3], 0  ;;  %s4731_s0 = inlined_call_operand.hbm [shape: f32[2,32], index: 0, kind: input, shape index: {}]   ;;  %s4732_s1 = inlined_call_operand.hbm [shape: bf16[64,96], index: 1, kind: input, shape index: {}]   ;;  %s4733_s2 = inlined_call_operand.hbm [shape: f32[2,8,128], index: 2, kind: input, shape index: {}]   ;;  %s4734_s3 = inlined_call_operand.vmem [shape: f32[1,1,128], index: 3, kind: input, shape index: {}]   ;;  %s4735_s4 = inlined_call_operand.hbm [shape: f32[2,8,96], index: 4, kind: input, shape index: {}]   ;;  %s4736_s5 = inlined_call_operand.hbm [shape: bf16[32,192], index: 5, kind: input, shape index: {}]   ;;  %s4737_s6 = inlined_call_operand.vmem [shape: f32[1,192], index: 6, kind: input, shape index: {}]   ;;  %s4738_s7 = inlined_call_operand.vmem [shape: f32[1,96], index: 7, kind: input, shape index: {}]   ;;  %s4739_s8 = inlined_call_operand.hbm [shape: f32[2,640], index: 8, kind: output, shape index: {0}]   ;;  %s4740_s9 = inlined_call_operand.hbm [shape: f32[2,32], index: 9, kind: output, shape index: {1}]   ;;  %s4741_s10 = inlined_call_operand.hbm [shape: f32[2,80], index: 10, kind: output, shape index: {2}]  }
   0x1   :  { %17 = vsyncpa [#allocation6], 0 }
   0x2   :  { %18 = vsyncpa [#allocation9], 0 }
   0x3   :  { %19 = vsyncpa [#allocation4], 0 }
   0x4   :  { %20 = vsyncpa [#allocation13], 0  ;;  %s3639_s13 = smov [#allocation5]   ;;  %s3453_s17 = scalar_lea.hbm %s4732_s1, 512 }
   0x5   :  { %s36_s14 = sshll.u32 %s3639_s13, 4  ;;  %p3454_p0 = scmp.ne.s32.totalorder %s4732_s1, %s3453_s17  ;;  %s37_s14 = int_to_ptr.vmem [resolvable:$true] %s36_s14 }
   0x6   :  { %p3457_p1 = scmp.lt.u32.totalorder %s3453_s17, %s4732_s1 }
   0x8   :  { %p3459_p2 = pnand %p3457_p1, %p3454_p0 }
   0xa   :  { %3462 = shalt.err (!%p3459_p2)
}
   0xb   :  { %s3463_s22 = scalar_lea.vmem %s37_s14, 512  ;;  %p3468_p4 = scmp.lt.s32.totalorder %s37_s14, %s37_s14 }
   0xc   :  { %p3464_p3 = scmp.ne.s32.totalorder %s37_s14, %s3463_s22  ;;  %p3469_p5 = scmp.lt.s32.totalorder %s3463_s22, %s3463_s22 }
   0xe   :  { %p3470_p6 = por %p3469_p5, %p3468_p4 }
  0x10   :  { %p3471_p7 = pnand %p3470_p6, %p3464_p3 }
  0x12   :  { %3474 = shalt.err (!%p3471_p7)
}
  0x13   :  { %s3640_s23 = smov 64   ;;  %s3641_s24 = smov 4  }
  0x14   :  { %42 = dma.hbm_to_vmem [thread:$0]  %s4732_s1, 512, %s37_s14, [#allocation6], %s3640_s23, %s3640_s23, %s3641_s24  }
  0x15   :  { %s3642_s27 = smov [#allocation8]   ;;  %s3643_s29 = smov [#allocation2]  }
  0x16   :  { %s62_s28 = sshll.u32 %s3642_s27, 4  ;;  %s27_s30 = sshll.u32 %s3643_s29, 4  ;;  %s63_s28 = int_to_ptr.vmem [resolvable:$true] %s62_s28  ;;  %s28_s30 = int_to_ptr.vmem [resolvable:$true] %s27_s30 }
  0x17   :  { %s3475_s13 = scalar_lea.hbm %s4735_s4, 256 }
  0x18   :  { %p3476_p8 = scmp.ne.s32.totalorder %s4735_s4, %s3475_s13  ;;  %p3479_p9 = scmp.lt.u32.totalorder %s3475_s13, %s4735_s4 }
  0x1a   :  { %p3481_p10 = pnand %p3479_p9, %p3476_p8 }
  0x1c   :  { %3484 = shalt.err (!%p3481_p10)
}
  0x1d   :  { %s3485_s1 = scalar_lea.vmem %s63_s28, 256  ;;  %p3490_p12 = scmp.lt.s32.totalorder %s63_s28, %s63_s28 }
  0x1e   :  { %p3486_p11 = scmp.ne.s32.totalorder %s63_s28, %s3485_s1  ;;  %p3491_p13 = scmp.lt.s32.totalorder %s3485_s1, %s3485_s1 }
  0x20   :  { %p3492_p0 = por %p3491_p13, %p3490_p12 }
  0x22   :  { %p3493_p1 = pnand %p3492_p0, %p3486_p11 }
  0x24   :  { %3496 = shalt.err (!%p3493_p1)
}
  0x25   :  { %s3644_s14 = smov 128   ;;  %s3645_s19 = smov 8  }
  0x26   :  { %68 = dma.hbm_to_vmem [thread:$0]  %s4735_s4, 256, %s63_s28, [#allocation9], %s3644_s14, %s3644_s14, %s3645_s19  }
  0x27   :  { %s3497_s25 = scalar_lea.hbm %s4731_s0, 32 }
  0x28   :  { %p3498_p2 = scmp.ne.s32.totalorder %s4731_s0, %s3497_s25  ;;  %p3501_p3 = scmp.lt.u32.totalorder %s3497_s25, %s4731_s0 }
  0x2a   :  { %p3503_p4 = pnand %p3501_p3, %p3498_p2 }
  0x2c   :  { %3506 = shalt.err (!%p3503_p4)
}
  0x2d   :  { %s3507_s12 = scalar_lea.vmem %s28_s30, 32  ;;  %p3512_p6 = scmp.lt.s32.totalorder %s28_s30, %s28_s30 }
  0x2e   :  { %p3508_p5 = scmp.ne.s32.totalorder %s28_s30, %s3507_s12  ;;  %p3513_p7 = scmp.lt.s32.totalorder %s3507_s12, %s3507_s12 }
  0x30   :  { %p3514_p8 = por %p3513_p7, %p3512_p6 }
  0x32   :  { %p3515_p9 = pnand %p3514_p8, %p3508_p5 }
  0x34   :  { %3518 = shalt.err (!%p3515_p9)
}
  0x35   :  { %30 = dma.hbm_to_vmem [thread:$0]  %s4731_s0, 32, %s28_s30, [#allocation3]  }
  0x36   :  { %s3646_s13 = smov [#allocation7]   ;;  %s3647_s16 = smov [#allocation10]  }
  0x37   :  { %s48_s15 = sshll.u32 %s3646_s13, 4  ;;  %s74_s17 = sshll.u32 %s3647_s16, 4  ;;  %s49_s15 = int_to_ptr.vmem [resolvable:$true] %s48_s15  ;;  %s75_s17 = int_to_ptr.vmem [resolvable:$true] %s74_s17 }
  0x38   :  { %s3519_s20 = scalar_lea.hbm %s4733_s2, 256 }
  0x39   :  { %p3520_p10 = scmp.ne.s32.totalorder %s4733_s2, %s3519_s20  ;;  %p3523_p11 = scmp.lt.u32.totalorder %s3519_s20, %s4733_s2 }
  0x3b   :  { %p3525_p12 = pnand %p3523_p11, %p3520_p10 }
  0x3d   :  { %3528 = shalt.err (!%p3525_p12)
}
  0x3e   :  { %s3529_s0 = scalar_lea.vmem %s49_s15, 256  ;;  %p3534_p0 = scmp.lt.s32.totalorder %s49_s15, %s49_s15 }
  0x3f   :  { %p3530_p13 = scmp.ne.s32.totalorder %s49_s15, %s3529_s0  ;;  %p3535_p1 = scmp.lt.s32.totalorder %s3529_s0, %s3529_s0 }
  0x41   :  { %p3536_p2 = por %p3535_p1, %p3534_p0 }
  0x43   :  { %p3537_p3 = pnand %p3536_p2, %p3530_p13 }
  0x45   :  { %3540 = shalt.err (!%p3537_p3)
}
  0x46   :  { %54 = dma.hbm_to_vmem [thread:$0]  %s4733_s2, 256, %s49_s15, [#allocation6], %s3644_s14, %s3644_s14, %s3645_s19  }
  0x47   :  { %s3541_s11 = scalar_lea.hbm %s4736_s5, 512 }
  0x48   :  { %p3542_p4 = scmp.ne.s32.totalorder %s4736_s5, %s3541_s11  ;;  %p3545_p5 = scmp.lt.u32.totalorder %s3541_s11, %s4736_s5 }
  0x4a   :  { %p3547_p6 = pnand %p3545_p5, %p3542_p4 }
  0x4c   :  { %3550 = shalt.err (!%p3547_p6)
}
  0x4d   :  { %s3551_s16 = scalar_lea.vmem %s75_s17, 512  ;;  %p3556_p8 = scmp.lt.s32.totalorder %s75_s17, %s75_s17 }
  0x4e   :  { %p3552_p7 = scmp.ne.s32.totalorder %s75_s17, %s3551_s16  ;;  %p3557_p9 = scmp.lt.s32.totalorder %s3551_s16, %s3551_s16 }
  0x50   :  { %p3558_p10 = por %p3557_p9, %p3556_p8 }
  0x52   :  { %p3559_p11 = pnand %p3558_p10, %p3552_p7 }
  0x54   :  { %3562 = shalt.err (!%p3559_p11)
}
  0x55   :  { %80 = dma.hbm_to_vmem [thread:$0]  %s4736_s5, 512, %s75_s17, [#allocation9], %s3644_s14, %s3644_s14, %s3645_s19  }
  0x56   :  { %3629 = dma.done.wait [#allocation3], 32  }
  0x57   :  { %3630 = vsyncadd [#allocation3], 4294967264 }
  0x58   :  { %3631 = dma.done.wait [#allocation6], 768  }
  0x59   :  { %3632 = vsyncadd [#allocation6], 4294966528 }
  0x5a   :  { %3633 = dma.done.wait [#allocation9], 768  }
  0x5b   :  { %3634 = vsyncadd [#allocation9], 4294966528  ;;  %v3648_v0 = vmov 0   ;;  %v3788_v1 = vld [vmem:[#allocation10 + $0x4] ss:$8 sps:$4 sm:$0xff]   ;;  %vm175_vm0 = vcmask 261120   ;;  %v119_v7 = vlaneseq }
  0x5c   :  { %211 = vmatprep.mubr.bf16.mxu0 %v3648_v0  ;;  %3216 = vset.pattern.permute.xlu0 %v3648_v0  ;;  %v3790_v2 = vld [vmem:[#allocation10] ss:$8 sps:$4 sm:$0xff]   ;;  %v3793_v3 = vld [vmem:[#allocation10 + $0x14] ss:$8 sps:$4 sm:$0xff]   ;;  %v3797_v4 = vld [vmem:[#allocation10 + $0x10] ss:$8 sps:$4 sm:$0xff]  }
  0x5d   :  { %3215 = vset.pattern.permute.xlu1 %v3648_v0  ;;  %398 = vmatprep.mubr.bf16.mxu1 %v3648_v0  ;;  %v3799_v5 = vld [vmem:[#allocation2] sm:$0x3]  ;;  %v3810_v8 = vshrl.u32 %v119_v7, 7  ;;  %v3649_v9 = vmov 1966171168   ;;  %v3833_v24 = vld [vmem:[#allocation7] sm:$0xff] }
  0x5e   :  { %179 = vmatprep.subr.bf16.mxu0 %v3788_v1  ;;  %366 = vmatprep.subr.bf16.mxu1 %v3788_v1  ;;  %v154_v6 = vpack.c.bf16 %v3799_v5, %v3799_v5  ;;  %v221_v10 = vunpack.c.l.s4 %v3649_v9  ;;  %v3818_v12 = vld [vmem:[%s4737_s6] sm:$0x3]  ;;  %v3837_v27 = vld [vmem:[#allocation7 + $0x8] sm:$0xff]  ;;  %v3849_v40 = vand.u32 127, %v119_v7  ;;  %vm276_vm1 = vcmask 1041409   ;;  %v3868_v56 = vld [vmem:[#allocation8] sm:$0xff] }
  0x5f   :  { %180 = vmatpush1.bf16.msra.mxu0 %v3790_v2  ;;  %367 = vmatpush1.bf16.msra.mxu1 %v3790_v2  ;;  %v3813_v11 = vsub.s32 0, %v3810_v8  ;;  %v3845_v31 = vld [vmem:[%s4734_s3] ss:$0 sm:$0xff]  ;;  %vm279_vm2 = vcmask 58368   ;;  %v3860_v49 = vsub.s32 1, %v3810_v8  ;;  %vm309_vm3 = vcmask 785408  }
  0x60   :  { %181 = vmatprep.subr.bf16.mxu0 %v3793_v3  ;;  %368 = vmatprep.subr.bf16.mxu1 %v3793_v3  ;;  %v222_v13 = vunpack.c.0.s8 %v221_v10  ;;  %v3853_v41 = vsub.s32 %v3849_v40, %v3810_v8  ;;  %v3866_v55 = vld [vmem:[#allocation8 + $0x8] sm:$0xff]  ;;  %v3878_v61 = vld [vmem:[#allocation5] sm:$0xf]  ;;  %s3650_s1 = smov 96   ;;  %s3651_s20 = smov 32   ;;  %vm407_vm4 = vcmask 517120  }
  0x61   :  { %v3822_v14 = vrot.slane %v3818_v12, %v3813_v11  ;;  %v147_v9 = vpack.i.b16 %v3878_v61, %v3878_v61  ;;  %vm3653_vm7 = vmmov 0   ;;  %vm572_vm9 = vcmask 523264  }
  0x62   :  { %v3825_v15 = vsub.s32 %v222_v13, %v3810_v8 }
  0x63   :  { %182 = vmatpush1.bf16.msra.mxu0 %v3797_v4  ;;  %369 = vmatpush1.bf16.msra.mxu1 %v3797_v4 }
  0x64   :  { %649 = vmatprep.subr.bf16.mxu1 %v3788_v1 }
  0x66   :  { %2999 = vmatmul.mubr.msk.bf16.vlgmr.msra.gmra.mrb[0].mxu0 %vm175_vm0, %v154_v6 }
 0x139   :  { %v213_v16 = vpop.f32.mrb[0].mxu0 }
 0x13a   :  { %v3828_v17 = vadd.f32 %v213_v16, %v3822_v14  ;;  %v215_v18 = vpop.f32.mrb[1].mxu0 }
 0x13b   :  { %v216_v19 = vpop.f32.mrb[2].mxu0 }
 0x13c   :  { %v226_v20 = vrot.slane %v3828_v17, %v3825_v15  ;;  %v217_v21 = vpop.f32.mrb[3].mxu0  ;;  %v152_v19 = vrot.slane %v147_v9, %v3813_v11 }
 0x13e   :  { %v227_v22 = vcombine.high %v226_v20, %v226_v20  ;;  %v234_v23 = vrot.slane %v226_v20, %v3825_v15 }
 0x140   :  { %v241_v25 = vrot.slane %v227_v22, %v3825_v15  ;;  %v245_v26 = vrot.slane %v234_v23, %v3813_v11 }
 0x142   :  { %v249_v28 = vrot.slane %v241_v25, %v3813_v11  ;;  %v252_v29 = vadd.f32 %v245_v26, %v3833_v24  ;;  %v153_v25 = vunpack.c.l.bf16 %v152_v19 }
 0x144   :  { %3227 = vtanh.f32 %v252_v29  ;;  %v253_v30 = vadd.f32 %v249_v28, %v3837_v27  ;;  %v3888_v29 = vld [vmem:[%s4738_s7] ss:$0 sm:$0xff] }
 0x146   :  { %3229 = vtanh.f32 %v253_v30 }
 0x14e   :  { %v3228_v32 = vpop.eup %3227 }
 0x14f   :  { %v256_v33 = vmul.f32 %v3228_v32, %v3845_v31 }
 0x150   :  { %v3230_v34 = vpop.eup %3229 }
 0x151   :  { %258 = vadd.xlane.f32.xlu0 %v256_v33  ;;  %v257_v35 = vmul.f32 %v3230_v34, %v3845_v31 }
 0x155   :  { %260 = vadd.xlane.f32.xlu0 %v257_v35 }
 0x1de   :  { %v259_v36 = vpop.xlane.xlu0 %258 }
 0x1df   :  { %v262_v37 = vmul.f32 1.442695, %v259_v36 }
 0x1e1   :  { %3231 = vpow2.f32 %v262_v37 }
 0x1e2   :  { %v261_v38 = vpop.xlane.xlu0 %260 }
 0x1e3   :  { %v264_v39 = vmul.f32 1.442695, %v261_v38 }
 0x1e5   :  { %3233 = vpow2.f32 %v264_v39 }
 0x1eb   :  { %v3232_v42 = vpop.eup %3231 }
 0x1ec   :  { %v271_v44 = vrot.slane %v3232_v42, %v3853_v41 }
 0x1ef   :  { %v3234_v43 = vpop.eup %3233 }
 0x1f0   :  { %v275_v45 = vrot.slane %v3234_v43, %v3853_v41 }
 0x1f2   :  { %v277_v46 = vsel %vm276_vm1, %v275_v45, %v271_v44 }
 0x1f3   :  { %v280_v47 = vsel %vm279_vm2, %v277_v46, 0.0 }
 0x1f4   :  { %281 = vadd.xlane.f32.xlu1 %v280_v47 }
 0x281   :  { %v282_v48 = vpop.xlane.xlu1 %281 }
 0x282   :  { %3235 = vrcp.f32 %v282_v48 }
 0x28c   :  { %v3236_v50 = vpop.eup %3235 }
 0x28d   :  { %v292_v51 = vrot.slane %v3236_v50, %v3860_v49  ;;  %v288_v52 = vrot.slane %v3236_v50, %v3813_v11 }
 0x28f   :  { %v296_v53 = vmul.f32 %v3234_v43, %v292_v51  ;;  %v295_v54 = vmul.f32 %v3232_v42, %v288_v52 }
 0x291   :  { %304 = vperm.xlu0 %3216, %v296_v53   ;;  %299 = vperm.xlu1 %3215, %v295_v54  }
 0x295   :  { %337 = vrot.lane.b32.xlu1 %v3828_v17, %s3640_s23 }
 0x310   :  { %v3870_v57 = vpop.permute.xlu0 %304  ;;  %v3872_v58 = vpop.permute.xlu1 %299 }
 0x311   :  { %v308_v59 = vmul.f32 %v3870_v57, %v3866_v55  ;;  %v307_v60 = vmul.f32 %v3872_v58, %v3868_v56 }
 0x313   :  { %v317_v62 = vsel %vm309_vm3, %v308_v59, 0.0  ;;  %v310_v63 = vsel %vm309_vm3, %v307_v60, 0.0 }
 0x314   :  { %v318_v6 = vrot.slane %v317_v62, 4  ;;  %v311_v7 = vrot.slane %v310_v63, 4  ;;  %v338_v39 = vpop.permute.xlu1 %337 }
 0x316   :  { %v319_v10 = vadd.f32 %v318_v6, %v317_v62  ;;  %v312_v13 = vadd.f32 %v311_v7, %v310_v63 }
 0x318   :  { %v320_v16 = vrot.slane %v319_v10, 2  ;;  %v313_v18 = vrot.slane %v312_v13, 2 }
 0x31a   :  { %v321_v20 = vadd.f32 %v320_v16, %v319_v10  ;;  %v314_v21 = vadd.f32 %v313_v18, %v312_v13 }
 0x31c   :  { %v322_v22 = vrot.slane %v321_v20, 1  ;;  %v315_v23 = vrot.slane %v314_v21, 1 }
 0x31e   :  { %v323_v26 = vadd.f32 %v322_v22, %v321_v20  ;;  %v316_v28 = vadd.f32 %v315_v23, %v314_v21 }
 0x320   :  { %v326_v30 = vsel %vm276_vm1, %v323_v26, %v316_v28  ;;  %v102_v26 = vld [vmem:[#allocation5 + $0x4] sm:$0xf] }
 0x321   :  { %v328_v32 = vadd.f32 %v326_v30, %v153_v25  ;;  %v3931_v28 = vcombine.low %v3878_v61, %v102_v26  ;;  %v3652_v30 = vmov 0.0  }
 0x322   :  { %3088 = vmatprep.subr.bf16.mxu0 %v3652_v30  ;;  %3096 = vmatprep.mubr.msk.bf16.mxu0 %vm3653_vm7, %v3652_v30 }
 0x323   :  { %v329_v33 = vadd.f32 %v3888_v29, %v328_v32  ;;  %3089 = vmatpush3.bf16.msra.mxu0 %v3931_v28  ;;  %v3936_v32 = vld [vmem:[#allocation5 + $0x8] sm:$0xff]  }
 0x324   :  { %3090 = vmatprep.subr.bf16.mxu0 %v3652_v30 }
 0x325   :  { %v330_v34 = vadd.f32 %v329_v33, %v3828_v17 }
 0x327   :  { %v3000_v35 = vmul.f32 -1.442695, %v330_v34  ;;  %3091 = vmatpush3.bf16.msra.mxu0 %v3936_v32 }
 0x328   :  { %3092 = vmatprep.subr.bf16.mxu0 %v3652_v30 }
 0x329   :  { %3237 = vpow2.f32 %v3000_v35 }
 0x333   :  { %v3238_v36 = vpop.eup %3237 }
 0x334   :  { %v334_v37 = vadd.f32 1.0, %v3238_v36 }
 0x336   :  { %3239 = vrcp.f32 %v334_v37 }
 0x340   :  { %v3240_v38 = vpop.eup %3239 }
 0x341   :  { %v340_v42 = vmul.f32 %v3240_v38, %v338_v39  ;;  %v347_v46 = vsub.f32 1.0, %v3240_v38 }
 0x343   :  { %342 = vrot.lane.b32.xlu1 %v340_v42, %s3640_s23 }
 0x3b5   :  { %v343_v43 = vpop.permute.xlu1 %342 }
 0x3b6   :  { %v345_v44 = vadd.f32 %v343_v43, %v329_v33  ;;  %v3945_v43 = vld [vmem:[#allocation5 + $0x10] sm:$0xff]  }
 0x3b7   :  { %3093 = vmatpush3.bf16.msra.mxu0 %v3945_v43 }
 0x3b8   :  { %3241 = vtanh.f32 %v345_v44  ;;  %3094 = vmatprep.subr.bf16.mxu0 %v3652_v30  ;;  %v3949_v44 = vld [vmem:[#allocation5 + $0x18] sm:$0xff]  }
 0x3bb   :  { %3095 = vmatpush3.bf16.msra.mxu0 %v3949_v44 }
 0x3bc   :  { %906 = vmatprep.subr.bf16.mxu0 %v3788_v1 }
 0x3c2   :  { %v3242_v45 = vpop.eup %3241 }
 0x3c3   :  { %349 = vrot.lane.b32.xlu1 %v3242_v45, %s3650_s1 }
 0x3c7   :  { %354 = vrot.lane.b32.xlu1 %v3799_v5, %s3651_s20  ;;  %v3908_v5 = vrot.slane %v3818_v12, %v3860_v49 }
 0x435   :  { %v350_v17 = vpop.permute.xlu1 %349 }
 0x436   :  { %v352_v48 = vmul.f32 %v350_v17, %v347_v46 }
 0x439   :  { %v355_v47 = vpop.permute.xlu1 %354 }
 0x43a   :  { %v357_v50 = vmul.f32 %v3240_v38, %v355_v47 }
 0x43c   :  { %v3896_v51 = vadd.f32 %v357_v50, %v352_v48 }
 0x43e   :  { %v359_v52 = vpack.c.bf16 %v3896_v51, %v3896_v51 }
 0x440   :  { %361 = vrot.lane.b32.xlu1 %v359_v52, %s3650_s1 }
 0x4b2   :  { %v362_v53 = vpop.permute.xlu1 %361 }
 0x4b3   :  { %3001 = vmatmul.mubr.msk.bf16.vlgmr.msra.gmra.mrb[0].mxu1 %vm175_vm0, %v362_v53 }
 0x4b4   :  { %650 = vmatpush1.bf16.msra.mxu1 %v3790_v2  ;;  %681 = vmatprep.mubr.bf16.mxu1 %v3648_v0 }
 0x4b5   :  { %651 = vmatprep.subr.bf16.mxu1 %v3793_v3 }
 0x4b8   :  { %652 = vmatpush1.bf16.msra.mxu1 %v3797_v4 }
 0x4b9   :  { %3100 = vmatprep.subr.bf16.mxu1 %v3652_v30 }
 0x586   :  { %v400_v54 = vpop.f32.mrb[0].mxu1 }
 0x587   :  { %v402_v59 = vpop.f32.mrb[1].mxu1  ;;  %v3916_v7 = vadd.f32 %v400_v54, %v3822_v14 }
 0x588   :  { %v3911_v60 = vadd.f32 %v402_v59, %v3908_v5  ;;  %v404_v62 = vpop.f32.mrb[2].mxu1 }
 0x589   :  { %v405_v63 = vpop.f32.mrb[3].mxu1  ;;  %v449_v9 = vrot.slane %v3916_v7, %v3825_v15 }
 0x58a   :  { %v408_v6 = vsel %vm407_vm4, %v3911_v60, -inf }
 0x58b   :  { %409 = vmax.xlane.f32.xlu1 %v408_v6  ;;  %v450_v12 = vcombine.high %v449_v9, %v449_v9  ;;  %v457_v33 = vrot.slane %v449_v9, %v3825_v15 }
 0x58d   :  { %v464_v10 = vrot.slane %v450_v12, %v3825_v15  ;;  %v468_v61 = vrot.slane %v457_v33, %v3813_v11 }
 0x58f   :  { %v472_v13 = vrot.slane %v464_v10, %v3813_v11  ;;  %v475_v34 = vadd.f32 %v468_v61, %v3833_v24 }
 0x591   :  { %v476_v16 = vadd.f32 %v472_v13, %v3837_v27 }
 0x593   :  { %3243 = vtanh.f32 %v476_v16 }
 0x594   :  { %3245 = vtanh.f32 %v475_v34 }
 0x59d   :  { %v3244_v23 = vpop.eup %3243 }
 0x59e   :  { %v480_v25 = vmul.f32 %v3244_v23, %v3845_v31  ;;  %v3246_v38 = vpop.eup %3245 }
 0x59f   :  { %v479_v42 = vmul.f32 %v3246_v38, %v3845_v31 }
 0x618   :  { %v3923_v18 = vpop.xlane.xlu1 %409 }
 0x619   :  { %vm421_vm5 = vcmp.eq.f32.partialorder %v3911_v60, %v3923_v18 }
 0x61a   :  { %v422_v19 = vsel %vm421_vm5, %v3849_v40, 64 }
 0x61b   :  { %v423_v20 = vsel %vm407_vm4, %v422_v19, 2147483647 }
 0x61c   :  { %v425_v21 = vshra.s32 %v423_v20, 16  ;;  %v424_v35 = vand.u32 65535, %v423_v20 }
 0x61e   :  { %v427_v22 = vcvt.s32.f32 %v425_v21  ;;  %v426_v37 = vcvt.s32.f32 %v424_v35 }
 0x620   :  { %428 = vmin.xlane.f32.xlu0 %v427_v22 }
 0x624   :  { %483 = vadd.xlane.f32.xlu0 %v480_v25 }
 0x6ad   :  { %v429_v36 = vpop.xlane.xlu0 %428 }
 0x6ae   :  { %vm430_vm6 = vcmp.eq.f32.partialorder %v427_v22, %v429_v36  ;;  %v435_v45 = vcvt.f32.s32 %v429_v36 }
 0x6af   :  { %v431_v39 = vsel %vm430_vm6, %v426_v37, inf }
 0x6b0   :  { %432 = vmin.xlane.f32.xlu1 %v431_v39  ;;  %v436_v47 = vshll.u32 %v435_v45, 16 }
 0x6b1   :  { %v484_v17 = vpop.xlane.xlu0 %483 }
 0x6b2   :  { %v487_v48 = vmul.f32 1.442695, %v484_v17 }
 0x6b4   :  { %481 = vadd.xlane.f32.xlu1 %v479_v42  ;;  %3247 = vpow2.f32 %v487_v48 }
 0x6be   :  { %v3248_v63 = vpop.eup %3247 }
 0x6bf   :  { %v498_v12 = vrot.slane %v3248_v63, %v3853_v41 }
 0x73d   :  { %v433_v46 = vpop.xlane.xlu1 %432 }
 0x73e   :  { %v434_v50 = vcvt.f32.s32 %v433_v46 }
 0x740   :  { %v437_v52 = vadd.s32 %v436_v47, %v434_v50 }
 0x741   :  { %v482_v53 = vpop.xlane.xlu1 %481 }
 0x742   :  { %vm438_vm8 = vcmp.eq.s32.totalorder %v3849_v40, %v437_v52  ;;  %v485_v54 = vmul.f32 1.442695, %v482_v53 }
 0x743   :  { %v3002_v59 = vsel %vm438_vm8, 1.0, %v3652_v30 }
 0x744   :  { %v441_v62 = vpack.c.bf16 %v3002_v59, %v3002_v59  ;;  %3249 = vpow2.f32 %v485_v54 }
 0x746   :  { %3097 = vmatmul.mubr.msk.bf16.vlgmr.msra.gmra.mrb[4].mxu0 %vm572_vm9, %v441_v62 }
 0x747   :  { %907 = vmatpush1.bf16.msra.mxu0 %v3790_v2  ;;  %938 = vmatprep.mubr.bf16.mxu0 %v3648_v0 }
 0x748   :  { %908 = vmatprep.subr.bf16.mxu0 %v3793_v3 }
 0x74b   :  { %909 = vmatpush1.bf16.msra.mxu0 %v3797_v4 }
 0x74c   :  { %3112 = vmatprep.subr.bf16.mxu0 %v3652_v30 }
 0x74e   :  { %v3250_v6 = vpop.eup %3249 }
 0x74f   :  { %v494_v9 = vrot.slane %v3250_v6, %v3853_v41 }
 0x751   :  { %v499_v10 = vsel %vm276_vm1, %v498_v12, %v494_v9 }
 0x752   :  { %v501_v13 = vsel %vm279_vm2, %v499_v10, 0.0 }
 0x753   :  { %502 = vadd.xlane.f32.xlu1 %v501_v13 }
 0x7e0   :  { %v503_v16 = vpop.xlane.xlu1 %502 }
 0x7e1   :  { %3251 = vrcp.f32 %v503_v16 }
 0x7eb   :  { %v3252_v19 = vpop.eup %3251 }
 0x7ec   :  { %v513_v20 = vrot.slane %v3252_v19, %v3860_v49  ;;  %v509_v21 = vrot.slane %v3252_v19, %v3813_v11 }
 0x7ee   :  { %v517_v22 = vmul.f32 %v3248_v63, %v513_v20  ;;  %v516_v23 = vmul.f32 %v3250_v6, %v509_v21 }
 0x7f0   :  { %525 = vperm.xlu1 %3215, %v517_v22   ;;  %520 = vperm.xlu0 %3216, %v516_v23  }
 0x7f4   :  { %624 = vrot.lane.b32.xlu1 %v3916_v7, %s3640_s23 }
 0x819   :  { %v610_v25 = vpop.f32.mrb[4].mxu0 }
 0x81a   :  { %v3098_v26 = vpop.f32.mrb[5].mxu0 }
 0x81b   :  { %v613_v33 = vpop.f32.mrb[6].mxu0 }
 0x81c   :  { %v3099_v61 = vpop.f32.mrb[7].mxu0 }
 0x86f   :  { %v3971_v34 = vpop.permute.xlu1 %525  ;;  %v3973_v35 = vpop.permute.xlu0 %520 }
 0x870   :  { %v529_v36 = vmul.f32 %v3971_v34, %v3866_v55  ;;  %v528_v37 = vmul.f32 %v3973_v35, %v3868_v56 }
 0x872   :  { %v537_v38 = vsel %vm309_vm3, %v529_v36, 0.0  ;;  %v530_v39 = vsel %vm309_vm3, %v528_v37, 0.0 }
 0x873   :  { %v538_v42 = vrot.slane %v537_v38, 4  ;;  %v531_v45 = vrot.slane %v530_v39, 4  ;;  %v625_v20 = vpop.permute.xlu1 %624 }
 0x875   :  { %v539_v17 = vadd.f32 %v538_v42, %v537_v38  ;;  %v532_v46 = vadd.f32 %v531_v45, %v530_v39 }
 0x877   :  { %v540_v47 = vrot.slane %v539_v17, 2  ;;  %v533_v48 = vrot.slane %v532_v46, 2 }
 0x879   :  { %v541_v50 = vadd.f32 %v540_v47, %v539_v17  ;;  %v534_v52 = vadd.f32 %v533_v48, %v532_v46 }
 0x87b   :  { %v542_v53 = vrot.slane %v541_v50, 1  ;;  %v535_v54 = vrot.slane %v534_v52, 1 }
 0x87d   :  { %v543_v59 = vadd.f32 %v542_v53, %v541_v50  ;;  %v536_v62 = vadd.f32 %v535_v54, %v534_v52 }
 0x87f   :  { %v570_v63 = vsel %vm276_vm1, %v543_v59, %v536_v62 }
 0x880   :  { %v611_v6 = vadd.f32 %v610_v25, %v570_v63 }
 0x882   :  { %v616_v9 = vadd.f32 %v3888_v29, %v611_v6 }
 0x884   :  { %v617_v12 = vadd.f32 %v616_v9, %v3916_v7 }
 0x886   :  { %v3008_v10 = vmul.f32 -1.442695, %v617_v12 }
 0x888   :  { %3253 = vpow2.f32 %v3008_v10 }
 0x892   :  { %v3254_v13 = vpop.eup %3253 }
 0x893   :  { %v621_v16 = vadd.f32 1.0, %v3254_v13 }
 0x895   :  { %3255 = vrcp.f32 %v621_v16 }
 0x89f   :  { %v3256_v19 = vpop.eup %3255 }
 0x8a0   :  { %v627_v21 = vmul.f32 %v3256_v19, %v625_v20  ;;  %v634_v25 = vsub.f32 1.0, %v3256_v19  ;;  %v640_v7 = vmul.f32 %v3256_v19, %v3896_v51 }
 0x8a2   :  { %629 = vrot.lane.b32.xlu0 %v627_v21, %s3640_s23 }
 0x914   :  { %v630_v22 = vpop.permute.xlu0 %629 }
 0x915   :  { %v632_v23 = vadd.f32 %v630_v22, %v616_v9 }
 0x917   :  { %3257 = vtanh.f32 %v632_v23 }
 0x921   :  { %v3258_v26 = vpop.eup %3257 }
 0x922   :  { %636 = vrot.lane.b32.xlu1 %v3258_v26, %s3650_s1 }
 0x994   :  { %v637_v33 = vpop.permute.xlu1 %636 }
 0x995   :  { %v639_v61 = vmul.f32 %v637_v33, %v634_v25 }
 0x997   :  { %v3987_v36 = vadd.f32 %v640_v7, %v639_v61 }
 0x999   :  { %v642_v37 = vpack.c.bf16 %v3987_v36, %v3987_v36 }
 0x99b   :  { %644 = vrot.lane.b32.xlu0 %v642_v37, %s3650_s1 }
 0xa0d   :  { %v645_v38 = vpop.permute.xlu0 %644 }
 0xa0e   :  { %3009 = vmatmul.mubr.msk.bf16.vlgmr.msra.gmra.mrb[4].mxu1 %vm175_vm0, %v645_v38 }
 0xa0f   :  { %3101 = vmatpush3.bf16.msra.mxu1 %v3931_v28  ;;  %3108 = vmatprep.mubr.msk.bf16.mxu1 %vm3653_vm7, %v3652_v30 }
 0xa10   :  { %3102 = vmatprep.subr.bf16.mxu1 %v3652_v30 }
 0xa13   :  { %3103 = vmatpush3.bf16.msra.mxu1 %v3936_v32 }
 0xa14   :  { %3104 = vmatprep.subr.bf16.mxu1 %v3652_v30 }
 0xa17   :  { %3105 = vmatpush3.bf16.msra.mxu1 %v3945_v43 }
 0xa18   :  { %3106 = vmatprep.subr.bf16.mxu1 %v3652_v30 }
 0xa1b   :  { %3107 = vmatpush3.bf16.msra.mxu1 %v3949_v44 }
 0xa1c   :  { %1163 = vmatprep.subr.bf16.mxu1 %v3788_v1 }
 0xae1   :  { %v683_v51 = vpop.f32.mrb[4].mxu1 }
 0xae2   :  { %v4004_v39 = vadd.f32 %v683_v51, %v3822_v14  ;;  %v685_v42 = vpop.f32.mrb[5].mxu1 }
 0xae3   :  { %v4007_v45 = vadd.f32 %v685_v42, %v3908_v5  ;;  %v687_v17 = vpop.f32.mrb[6].mxu1 }
 0xae4   :  { %v731_v46 = vrot.slane %v4004_v39, %v3825_v15  ;;  %v688_v47 = vpop.f32.mrb[7].mxu1 }
 0xae5   :  { %v690_v48 = vsel %vm407_vm4, %v4007_v45, -inf }
 0xae6   :  { %v739_v50 = vrot.slane %v731_v46, %v3825_v15  ;;  %691 = vmax.xlane.f32.xlu1 %v690_v48  ;;  %v732_v10 = vcombine.high %v731_v46, %v731_v46 }
 0xae8   :  { %v750_v52 = vrot.slane %v739_v50, %v3813_v11  ;;  %v746_v13 = vrot.slane %v732_v10, %v3825_v15 }
 0xaea   :  { %v757_v53 = vadd.f32 %v750_v52, %v3833_v24  ;;  %v754_v16 = vrot.slane %v746_v13, %v3813_v11 }
 0xaec   :  { %3259 = vtanh.f32 %v757_v53  ;;  %v758_v19 = vadd.f32 %v754_v16, %v3837_v27 }
 0xaee   :  { %3261 = vtanh.f32 %v758_v19 }
 0xaf6   :  { %v3260_v54 = vpop.eup %3259 }
 0xaf7   :  { %v761_v59 = vmul.f32 %v3260_v54, %v3845_v31 }
 0xaf8   :  { %v3262_v23 = vpop.eup %3261 }
 0xaf9   :  { %763 = vadd.xlane.f32.xlu1 %v761_v59  ;;  %v762_v25 = vmul.f32 %v3262_v23, %v3845_v31 }
 0xb73   :  { %v4017_v62 = vpop.xlane.xlu1 %691 }
 0xb74   :  { %vm703_vm10 = vcmp.eq.f32.partialorder %v4007_v45, %v4017_v62 }
 0xb75   :  { %v704_v63 = vsel %vm703_vm10, %v3849_v40, 64  ;;  %vm2931_vm10 = vcmask 64512  }
 0xb76   :  { %v705_v6 = vsel %vm407_vm4, %v704_v63, 2147483647 }
 0xb77   :  { %v707_v9 = vshra.s32 %v705_v6, 16  ;;  %v706_v20 = vand.u32 65535, %v705_v6 }
 0xb79   :  { %v709_v12 = vcvt.s32.f32 %v707_v9  ;;  %v708_v22 = vcvt.s32.f32 %v706_v20 }
 0xb7b   :  { %710 = vmin.xlane.f32.xlu0 %v709_v12 }
 0xb86   :  { %v764_v7 = vpop.xlane.xlu1 %763 }
 0xb87   :  { %v767_v37 = vmul.f32 1.442695, %v764_v7 }
 0xb89   :  { %3263 = vpow2.f32 %v767_v37 }
 0xb93   :  { %v3264_v50 = vpop.eup %3263 }
 0xb94   :  { %v776_v53 = vrot.slane %v3264_v50, %v3853_v41 }
 0xc08   :  { %v711_v21 = vpop.xlane.xlu0 %710 }
 0xc09   :  { %vm712_vm11 = vcmp.eq.f32.partialorder %v709_v12, %v711_v21  ;;  %v717_v33 = vcvt.f32.s32 %v711_v21 }
 0xc0a   :  { %v713_v26 = vsel %vm712_vm11, %v708_v22, inf  ;;  %vm2933_vm11 = vcmask 130048  }
 0xc0b   :  { %714 = vmin.xlane.f32.xlu0 %v713_v26  ;;  %v718_v38 = vshll.u32 %v717_v33, 16 }
 0xc0f   :  { %765 = vadd.xlane.f32.xlu0 %v762_v25 }
 0xc98   :  { %v715_v61 = vpop.xlane.xlu0 %714 }
 0xc99   :  { %v716_v51 = vcvt.f32.s32 %v715_v61 }
 0xc9b   :  { %v719_v42 = vadd.s32 %v718_v38, %v716_v51 }
 0xc9c   :  { %v766_v17 = vpop.xlane.xlu0 %765 }
 0xc9d   :  { %vm720_vm12 = vcmp.eq.s32.totalorder %v3849_v40, %v719_v42  ;;  %v769_v46 = vmul.f32 1.442695, %v766_v17 }
 0xc9e   :  { %v3010_v47 = vsel %vm720_vm12, 1.0, %v3652_v30  ;;  %vm2935_vm12 = vcmask 195584  }
 0xc9f   :  { %v723_v48 = vpack.c.bf16 %v3010_v47, %v3010_v47  ;;  %3265 = vpow2.f32 %v769_v46 }
 0xca1   :  { %3109 = vmatmul.mubr.msk.bf16.vlgmr.msra.gmra.mrb[8].mxu1 %vm572_vm9, %v723_v48 }
 0xca2   :  { %1164 = vmatpush1.bf16.msra.mxu1 %v3790_v2  ;;  %1195 = vmatprep.mubr.bf16.mxu1 %v3648_v0 }
 0xca3   :  { %1165 = vmatprep.subr.bf16.mxu1 %v3793_v3 }
 0xca6   :  { %1166 = vmatpush1.bf16.msra.mxu1 %v3797_v4 }
 0xca7   :  { %3124 = vmatprep.subr.bf16.mxu1 %v3652_v30 }
 0xca9   :  { %v3266_v52 = vpop.eup %3265 }
 0xcaa   :  { %v780_v54 = vrot.slane %v3266_v52, %v3853_v41 }
 0xcac   :  { %v781_v59 = vsel %vm276_vm1, %v780_v54, %v776_v53 }
 0xcad   :  { %v783_v63 = vsel %vm279_vm2, %v781_v59, 0.0 }
 0xcae   :  { %784 = vadd.xlane.f32.xlu1 %v783_v63 }
 0xd3b   :  { %v785_v6 = vpop.xlane.xlu1 %784 }
 0xd3c   :  { %3267 = vrcp.f32 %v785_v6 }
 0xd46   :  { %v3268_v9 = vpop.eup %3267 }
 0xd47   :  { %v795_v12 = vrot.slane %v3268_v9, %v3860_v49  ;;  %v791_v10 = vrot.slane %v3268_v9, %v3813_v11 }
 0xd49   :  { %v799_v13 = vmul.f32 %v3266_v52, %v795_v12  ;;  %v798_v16 = vmul.f32 %v3264_v50, %v791_v10 }
 0xd4b   :  { %807 = vperm.xlu1 %3215, %v799_v13   ;;  %802 = vperm.xlu0 %3216, %v798_v16  }
 0xd4f   :  { %881 = vrot.lane.b32.xlu1 %v4004_v39, %s3640_s23 }
 0xd74   :  { %v867_v19 = vpop.f32.mrb[8].mxu1 }
 0xd75   :  { %v3110_v20 = vpop.f32.mrb[9].mxu1 }
 0xd76   :  { %v870_v21 = vpop.f32.mrb[10].mxu1 }
 0xd77   :  { %v3111_v22 = vpop.f32.mrb[11].mxu1 }
 0xdca   :  { %v4043_v23 = vpop.permute.xlu1 %807  ;;  %v4045_v26 = vpop.permute.xlu0 %802 }
 0xdcb   :  { %v811_v25 = vmul.f32 %v4043_v23, %v3866_v55  ;;  %v810_v33 = vmul.f32 %v4045_v26, %v3868_v56 }
 0xdcd   :  { %v819_v7 = vsel %vm309_vm3, %v811_v25, 0.0  ;;  %v812_v61 = vsel %vm309_vm3, %v810_v33, 0.0 }
 0xdce   :  { %v820_v37 = vrot.slane %v819_v7, 4  ;;  %v813_v38 = vrot.slane %v812_v61, 4  ;;  %v882_v20 = vpop.permute.xlu1 %881 }
 0xdd0   :  { %v821_v51 = vadd.f32 %v820_v37, %v819_v7  ;;  %v814_v42 = vadd.f32 %v813_v38, %v812_v61 }
 0xdd2   :  { %v822_v17 = vrot.slane %v821_v51, 2  ;;  %v815_v46 = vrot.slane %v814_v42, 2 }
 0xdd4   :  { %v823_v47 = vadd.f32 %v822_v17, %v821_v51  ;;  %v816_v48 = vadd.f32 %v815_v46, %v814_v42 }
 0xdd6   :  { %v824_v50 = vrot.slane %v823_v47, 1  ;;  %v817_v52 = vrot.slane %v816_v48, 1 }
 0xdd8   :  { %v825_v53 = vadd.f32 %v824_v50, %v823_v47  ;;  %v818_v54 = vadd.f32 %v817_v52, %v816_v48 }
 0xdda   :  { %v828_v59 = vsel %vm276_vm1, %v825_v53, %v818_v54 }
 0xddb   :  { %v868_v63 = vadd.f32 %v867_v19, %v828_v59 }
 0xddd   :  { %v873_v6 = vadd.f32 %v3888_v29, %v868_v63 }
 0xddf   :  { %v874_v9 = vadd.f32 %v873_v6, %v4004_v39 }
 0xde1   :  { %v3012_v12 = vmul.f32 -1.442695, %v874_v9 }
 0xde3   :  { %3269 = vpow2.f32 %v3012_v12 }
 0xded   :  { %v3270_v10 = vpop.eup %3269 }
 0xdee   :  { %v878_v13 = vadd.f32 1.0, %v3270_v10 }
 0xdf0   :  { %3271 = vrcp.f32 %v878_v13 }
 0xdfa   :  { %v3272_v16 = vpop.eup %3271 }
 0xdfb   :  { %v884_v21 = vmul.f32 %v3272_v16, %v882_v20  ;;  %v891_v19 = vsub.f32 1.0, %v3272_v16  ;;  %v897_v39 = vmul.f32 %v3272_v16, %v3987_v36 }
 0xdfd   :  { %886 = vrot.lane.b32.xlu0 %v884_v21, %s3640_s23 }
 0xe6f   :  { %v887_v22 = vpop.permute.xlu0 %886 }
 0xe70   :  { %v889_v25 = vadd.f32 %v887_v22, %v873_v6 }
 0xe72   :  { %3273 = vtanh.f32 %v889_v25 }
 0xe7c   :  { %v3274_v33 = vpop.eup %3273 }
 0xe7d   :  { %893 = vrot.lane.b32.xlu1 %v3274_v33, %s3650_s1 }
 0xeef   :  { %v894_v7 = vpop.permute.xlu1 %893 }
 0xef0   :  { %v896_v61 = vmul.f32 %v894_v7, %v891_v19 }
 0xef2   :  { %v4059_v37 = vadd.f32 %v897_v39, %v896_v61 }
 0xef4   :  { %v899_v38 = vpack.c.bf16 %v4059_v37, %v4059_v37 }
 0xef6   :  { %901 = vrot.lane.b32.xlu0 %v899_v38, %s3650_s1 }
 0xf68   :  { %v902_v51 = vpop.permute.xlu0 %901 }
 0xf69   :  { %3013 = vmatmul.mubr.msk.bf16.vlgmr.msra.gmra.mrb[8].mxu0 %vm175_vm0, %v902_v51 }
 0xf6a   :  { %3113 = vmatpush3.bf16.msra.mxu0 %v3931_v28  ;;  %3120 = vmatprep.mubr.msk.bf16.mxu0 %vm3653_vm7, %v3652_v30 }
 0xf6b   :  { %3114 = vmatprep.subr.bf16.mxu0 %v3652_v30 }
 0xf6e   :  { %3115 = vmatpush3.bf16.msra.mxu0 %v3936_v32 }
 0xf6f   :  { %3116 = vmatprep.subr.bf16.mxu0 %v3652_v30 }
 0xf72   :  { %3117 = vmatpush3.bf16.msra.mxu0 %v3945_v43 }
 0xf73   :  { %3118 = vmatprep.subr.bf16.mxu0 %v3652_v30 }
 0xf76   :  { %3119 = vmatpush3.bf16.msra.mxu0 %v3949_v44 }
 0xf77   :  { %1420 = vmatprep.subr.bf16.mxu0 %v3788_v1 }
0x103c   :  { %v940_v36 = vpop.f32.mrb[8].mxu0 }
0x103d   :  { %v4076_v42 = vadd.f32 %v940_v36, %v3822_v14  ;;  %v942_v17 = vpop.f32.mrb[9].mxu0 }
0x103e   :  { %v4079_v46 = vadd.f32 %v942_v17, %v3908_v5  ;;  %v944_v47 = vpop.f32.mrb[10].mxu0 }
0x103f   :  { %v988_v48 = vrot.slane %v4076_v42, %v3825_v15  ;;  %v945_v50 = vpop.f32.mrb[11].mxu0 }
0x1040   :  { %v947_v52 = vsel %vm407_vm4, %v4079_v46, -inf }
0x1041   :  { %v996_v53 = vrot.slane %v988_v48, %v3825_v15  ;;  %948 = vmax.xlane.f32.xlu1 %v947_v52  ;;  %v989_v16 = vcombine.high %v988_v48, %v988_v48 }
0x1043   :  { %v1007_v1 = vrot.slane %v996_v53, %v3813_v11 }
0x1045   :  { %v1014_v54 = vadd.f32 %v1007_v1, %v3833_v24  ;;  %v1003_v24 = vrot.slane %v989_v16, %v3825_v15 }
0x1047   :  { %3275 = vtanh.f32 %v1014_v54  ;;  %v1011_v20 = vrot.slane %v1003_v24, %v3813_v11 }
0x1049   :  { %v1015_v21 = vadd.f32 %v1011_v20, %v3837_v27 }
0x104b   :  { %3277 = vtanh.f32 %v1015_v21 }
0x1051   :  { %v3276_v59 = vpop.eup %3275 }
0x1052   :  { %v1018_v63 = vmul.f32 %v3276_v59, %v3845_v31 }
0x1054   :  { %1020 = vadd.xlane.f32.xlu1 %v1018_v63 }
0x1055   :  { %v3278_v19 = vpop.eup %3277 }
0x1056   :  { %v1019_v39 = vmul.f32 %v3278_v19, %v3845_v31 }
0x10ce   :  { %v4089_v6 = vpop.xlane.xlu1 %948 }
0x10cf   :  { %vm960_vm13 = vcmp.eq.f32.partialorder %v4079_v46, %v4089_v6 }
0x10d0   :  { %v961_v9 = vsel %vm960_vm13, %v3849_v40, 64 }
0x10d1   :  { %v962_v12 = vsel %vm407_vm4, %v961_v9, 2147483647 }
0x10d2   :  { %v964_v10 = vshra.s32 %v962_v12, 16  ;;  %v963_v22 = vand.u32 65535, %v962_v12 }
0x10d4   :  { %v966_v13 = vcvt.s32.f32 %v964_v10  ;;  %v965_v33 = vcvt.s32.f32 %v963_v22 }
0x10d6   :  { %967 = vmin.xlane.f32.xlu0 %v966_v13 }
0x10e1   :  { %v1021_v38 = vpop.xlane.xlu1 %1020 }
0x10e2   :  { %v1024_v36 = vmul.f32 1.442695, %v1021_v38 }
0x10e4   :  { %3279 = vpow2.f32 %v1024_v36 }
0x10ee   :  { %v3280_v31 = vpop.eup %3279 }
0x10ef   :  { %v1033_v54 = vrot.slane %v3280_v31, %v3853_v41 }
0x1163   :  { %v968_v25 = vpop.xlane.xlu0 %967 }
0x1164   :  { %vm969_vm14 = vcmp.eq.f32.partialorder %v966_v13, %v968_v25  ;;  %v974_v61 = vcvt.f32.s32 %v968_v25 }
0x1165   :  { %v970_v7 = vsel %vm969_vm14, %v965_v33, inf }
0x1166   :  { %971 = vmin.xlane.f32.xlu0 %v970_v7  ;;  %v975_v17 = vshll.u32 %v974_v61, 16 }
0x116a   :  { %1022 = vadd.xlane.f32.xlu0 %v1019_v39 }
0x11f3   :  { %v972_v51 = vpop.xlane.xlu0 %971 }
0x11f4   :  { %v973_v47 = vcvt.f32.s32 %v972_v51 }
0x11f6   :  { %v976_v48 = vadd.s32 %v975_v17, %v973_v47 }
0x11f7   :  { %v1023_v50 = vpop.xlane.xlu0 %1022 }
0x11f8   :  { %vm977_vm15 = vcmp.eq.s32.totalorder %v3849_v40, %v976_v48  ;;  %v1026_v27 = vmul.f32 1.442695, %v1023_v50 }
0x11f9   :  { %v3014_v52 = vsel %vm977_vm15, 1.0, %v3652_v30 }
0x11fa   :  { %v980_v53 = vpack.c.bf16 %v3014_v52, %v3014_v52  ;;  %3281 = vpow2.f32 %v1026_v27 }
0x11fc   :  { %3121 = vmatmul.mubr.msk.bf16.vlgmr.msra.gmra.mrb[12].mxu0 %vm572_vm9, %v980_v53 }
0x11fd   :  { %1421 = vmatpush1.bf16.msra.mxu0 %v3790_v2  ;;  %1452 = vmatprep.mubr.bf16.mxu0 %v3648_v0 }
0x11fe   :  { %1422 = vmatprep.subr.bf16.mxu0 %v3793_v3 }
0x1201   :  { %1423 = vmatpush1.bf16.msra.mxu0 %v3797_v4 }
0x1202   :  { %3136 = vmatprep.subr.bf16.mxu0 %v3652_v30 }
0x1204   :  { %v3282_v1 = vpop.eup %3281 }
0x1205   :  { %v1037_v59 = vrot.slane %v3282_v1, %v3853_v41 }
0x1207   :  { %v1038_v63 = vsel %vm276_vm1, %v1037_v59, %v1033_v54 }
0x1208   :  { %v1040_v9 = vsel %vm279_vm2, %v1038_v63, 0.0 }
0x1209   :  { %1041 = vadd.xlane.f32.xlu1 %v1040_v9 }
0x1296   :  { %v1042_v2 = vpop.xlane.xlu1 %1041 }
0x1297   :  { %3283 = vrcp.f32 %v1042_v2 }
0x12a1   :  { %v3284_v12 = vpop.eup %3283 }
0x12a2   :  { %v1052_v3 = vrot.slane %v3284_v12, %v3860_v49  ;;  %v1048_v4 = vrot.slane %v3284_v12, %v3813_v11 }
0x12a4   :  { %v1056_v10 = vmul.f32 %v3282_v1, %v1052_v3  ;;  %v1055_v13 = vmul.f32 %v3280_v31, %v1048_v4 }
0x12a6   :  { %1064 = vperm.xlu1 %3215, %v1056_v10   ;;  %1059 = vperm.xlu0 %3216, %v1055_v13  }
0x12aa   :  { %1138 = vrot.lane.b32.xlu1 %v4076_v42, %s3640_s23 }
0x12cf   :  { %v1124_v16 = vpop.f32.mrb[12].mxu0 }
0x12d0   :  { %v3122_v24 = vpop.f32.mrb[13].mxu0 }
0x12d1   :  { %v1127_v20 = vpop.f32.mrb[14].mxu0 }
0x12d2   :  { %v3123_v21 = vpop.f32.mrb[15].mxu0 }
0x1325   :  { %v4115_v22 = vpop.permute.xlu1 %1064  ;;  %v4117_v25 = vpop.permute.xlu0 %1059 }
0x1326   :  { %v1068_v33 = vmul.f32 %v4115_v22, %v3866_v55  ;;  %v1067_v19 = vmul.f32 %v4117_v25, %v3868_v56 }
0x1328   :  { %v1076_v7 = vsel %vm309_vm3, %v1068_v33, 0.0  ;;  %v1069_v39 = vsel %vm309_vm3, %v1067_v19, 0.0 }
0x1329   :  { %v1077_v61 = vrot.slane %v1076_v7, 4  ;;  %v1070_v38 = vrot.slane %v1069_v39, 4  ;;  %v1139_v12 = vpop.permute.xlu1 %1138 }
0x132b   :  { %v1078_v51 = vadd.f32 %v1077_v61, %v1076_v7  ;;  %v1071_v36 = vadd.f32 %v1070_v38, %v1069_v39 }
0x132d   :  { %v1079_v17 = vrot.slane %v1078_v51, 2  ;;  %v1072_v47 = vrot.slane %v1071_v36, 2 }
0x132f   :  { %v1080_v48 = vadd.f32 %v1079_v17, %v1078_v51  ;;  %v1073_v50 = vadd.f32 %v1072_v47, %v1071_v36  ;;  %v4161_v17 = vld [vmem:[#allocation7] sm:$0xff] }
0x1331   :  { %v1081_v27 = vrot.slane %v1080_v48, 1  ;;  %v1074_v52 = vrot.slane %v1073_v50, 1 }
0x1333   :  { %v1082_v53 = vadd.f32 %v1081_v27, %v1080_v48  ;;  %v1075_v31 = vadd.f32 %v1074_v52, %v1073_v50  ;;  %v4167_v50 = vld [vmem:[%s4734_s3] ss:$0 sm:$0xff] }
0x1335   :  { %v1085_v55 = vsel %vm276_vm1, %v1082_v53, %v1075_v31 }
0x1336   :  { %v1125_v1 = vadd.f32 %v1124_v16, %v1085_v55 }
0x1338   :  { %v1130_v56 = vadd.f32 %v3888_v29, %v1125_v1 }
0x133a   :  { %v1131_v54 = vadd.f32 %v1130_v56, %v4076_v42 }
0x133c   :  { %v3016_v59 = vmul.f32 -1.442695, %v1131_v54 }
0x133e   :  { %3285 = vpow2.f32 %v3016_v59 }
0x1348   :  { %v3286_v63 = vpop.eup %3285 }
0x1349   :  { %v1135_v9 = vadd.f32 1.0, %v3286_v63  ;;  %v4178_v63 = vld [vmem:[#allocation7 + $0x8] sm:$0xff] }
0x134b   :  { %3287 = vrcp.f32 %v1135_v9 }
0x1355   :  { %v3288_v2 = vpop.eup %3287 }
0x1356   :  { %v1141_v3 = vmul.f32 %v3288_v2, %v1139_v12  ;;  %v1148_v16 = vsub.f32 1.0, %v3288_v2  ;;  %v1154_v42 = vmul.f32 %v3288_v2, %v4059_v37  ;;  %v4146_v37 = vld [vmem:[#allocation10 + $0x4] ss:$8 sps:$4 sm:$0xff]  }
0x1358   :  { %1143 = vrot.lane.b32.xlu0 %v1141_v3, %s3640_s23 }
0x13ca   :  { %v1144_v4 = vpop.permute.xlu0 %1143 }
0x13cb   :  { %v1146_v10 = vadd.f32 %v1144_v4, %v1130_v56 }
0x13cd   :  { %3289 = vtanh.f32 %v1146_v10 }
0x13d7   :  { %v3290_v13 = vpop.eup %3289 }
0x13d8   :  { %1150 = vrot.lane.b32.xlu1 %v3290_v13, %s3650_s1 }
0x144a   :  { %v1151_v29 = vpop.permute.xlu1 %1150 }
0x144b   :  { %v1153_v24 = vmul.f32 %v1151_v29, %v1148_v16 }
0x144d   :  { %v4131_v20 = vadd.f32 %v1154_v42, %v1153_v24 }
0x144f   :  { %v1156_v21 = vpack.c.bf16 %v4131_v20, %v4131_v20 }
0x1451   :  { %1158 = vrot.lane.b32.xlu0 %v1156_v21, %s3650_s1 }
0x14c3   :  { %v1159_v33 = vpop.permute.xlu0 %1158 }
0x14c4   :  { %3017 = vmatmul.mubr.msk.bf16.vlgmr.msra.gmra.mrb[12].mxu1 %vm175_vm0, %v1159_v33 }
0x14c5   :  { %3125 = vmatpush3.bf16.msra.mxu1 %v3931_v28  ;;  %3132 = vmatprep.mubr.msk.bf16.mxu1 %vm3653_vm7, %v3652_v30 }
0x14c6   :  { %3126 = vmatprep.subr.bf16.mxu1 %v3652_v30 }
0x14c9   :  { %3127 = vmatpush3.bf16.msra.mxu1 %v3936_v32 }
0x14ca   :  { %3128 = vmatprep.subr.bf16.mxu1 %v3652_v30 }
0x14cd   :  { %3129 = vmatpush3.bf16.msra.mxu1 %v3945_v43 }
0x14ce   :  { %3130 = vmatprep.subr.bf16.mxu1 %v3652_v30 }
0x14d1   :  { %3131 = vmatpush3.bf16.msra.mxu1 %v3949_v44 }
0x14d2   :  { %1677 = vmatprep.subr.bf16.mxu1 %v4146_v37 }
0x1597   :  { %v1197_v19 = vpop.f32.mrb[12].mxu1 }
0x1598   :  { %v4150_v7 = vadd.f32 %v1197_v19, %v3822_v14  ;;  %v1199_v39 = vpop.f32.mrb[13].mxu1 }
0x1599   :  { %v4153_v61 = vadd.f32 %v1199_v39, %v3908_v5  ;;  %v1201_v32 = vpop.f32.mrb[14].mxu1 }
0x159a   :  { %v1245_v43 = vrot.slane %v4150_v7, %v3825_v15  ;;  %v1202_v38 = vpop.f32.mrb[15].mxu1 }
0x159b   :  { %v1204_v44 = vsel %vm407_vm4, %v4153_v61, -inf }
0x159c   :  { %v1253_v51 = vrot.slane %v1245_v43, %v3825_v15  ;;  %1205 = vmax.xlane.f32.xlu1 %v1204_v44  ;;  %v1246_v56 = vcombine.high %v1245_v43, %v1245_v43  ;;  %v4185_v44 = vld [vmem:[#allocation10] ss:$8 sps:$4 sm:$0xff]  }
0x159e   :  { %v1264_v36 = vrot.slane %v1253_v51, %v3813_v11  ;;  %v1260_v54 = vrot.slane %v1246_v56, %v3825_v15  ;;  %v4189_v51 = vld [vmem:[#allocation10 + $0x14] ss:$8 sps:$4 sm:$0xff]  }
0x15a0   :  { %v1271_v47 = vadd.f32 %v4161_v17, %v1264_v36  ;;  %v1268_v59 = vrot.slane %v1260_v54, %v3813_v11  ;;  %v4192_v36 = vld [vmem:[#allocation10 + $0x10] ss:$8 sps:$4 sm:$0xff]  }
0x15a2   :  { %3291 = vtanh.f32 %v1271_v47  ;;  %v1272_v9 = vadd.f32 %v4178_v63, %v1268_v59 }
0x15a4   :  { %3293 = vtanh.f32 %v1272_v9 }
0x15ac   :  { %v3292_v48 = vpop.eup %3291 }
0x15ad   :  { %v1275_v27 = vmul.f32 %v4167_v50, %v3292_v48 }
0x15ae   :  { %v3294_v4 = vpop.eup %3293 }
0x15af   :  { %1277 = vadd.xlane.f32.xlu1 %v1275_v27  ;;  %v1276_v13 = vmul.f32 %v4167_v50, %v3294_v4 }
0x1629   :  { %v4170_v52 = vpop.xlane.xlu1 %1205 }
0x162a   :  { %vm1217_vm5 = vcmp.eq.f32.partialorder %v4153_v61, %v4170_v52 }
0x162b   :  { %v1218_v53 = vsel %vm1217_vm5, %v3849_v40, 64  ;;  %vm2938_vm5 = vcmask 326656  }
0x162c   :  { %v1219_v31 = vsel %vm407_vm4, %v1218_v53, 2147483647 }
0x162d   :  { %v1221_v55 = vshra.s32 %v1219_v31, 16  ;;  %v1220_v2 = vand.u32 65535, %v1219_v31 }
0x162f   :  { %v1223_v1 = vcvt.s32.f32 %v1221_v55  ;;  %v1222_v3 = vcvt.s32.f32 %v1220_v2 }
0x1631   :  { %1224 = vmin.xlane.f32.xlu0 %v1223_v1 }
0x163c   :  { %v1278_v29 = vpop.xlane.xlu1 %1277 }
0x163d   :  { %v1281_v24 = vmul.f32 1.442695, %v1278_v29  ;;  %v2854_v29 = vadd.s32 4294967272, %v3849_v40 }
0x163f   :  { %3295 = vpow2.f32 %v1281_v24 }
0x1649   :  { %v3296_v47 = vpop.eup %3295 }
0x164a   :  { %v1290_v27 = vrot.slane %v3296_v47, %v3853_v41 }
0x16be   :  { %v1225_v12 = vpop.xlane.xlu0 %1224 }
0x16bf   :  { %vm1226_vm6 = vcmp.eq.f32.partialorder %v1223_v1, %v1225_v12  ;;  %v1231_v16 = vcvt.f32.s32 %v1225_v12 }
0x16c0   :  { %v1227_v10 = vsel %vm1226_vm6, %v1222_v3, inf }
0x16c1   :  { %1228 = vmin.xlane.f32.xlu0 %v1227_v10  ;;  %v1232_v21 = vshll.u32 %v1231_v16, 16  ;;  %v2843_v16 = vadd.s32 4294967280, %v3849_v40 }
0x16c3   :  { %v2846_v24 = vsub.s32 %v2843_v16, %v3810_v8 }
0x16c5   :  { %1279 = vadd.xlane.f32.xlu0 %v1276_v13  ;;  %v2832_v13 = vadd.s32 4294967288, %v3849_v40 }
0x174e   :  { %v1229_v42 = vpop.xlane.xlu0 %1228 }
0x174f   :  { %v1230_v33 = vcvt.f32.s32 %v1229_v42  ;;  %v2835_v42 = vsub.s32 %v2832_v13, %v3810_v8 }
0x1751   :  { %v1233_v19 = vadd.s32 %v1232_v21, %v1230_v33  ;;  %v2857_v21 = vsub.s32 %v2854_v29, %v3810_v8  ;;  %v2840_v33 = vrot.slane %v3971_v34, %v2835_v42 }
0x1752   :  { %v1280_v39 = vpop.xlane.xlu0 %1279 }
0x1753   :  { %vm1234_vm8 = vcmp.eq.s32.totalorder %v3849_v40, %v1233_v19  ;;  %v1283_v32 = vmul.f32 1.442695, %v1280_v39  ;;  %v2836_v19 = vrot.slane %v3973_v35, %v2835_v42  ;;  %v2865_v39 = vadd.s32 4294967264, %v3849_v40 }
0x1754   :  { %v3018_v43 = vsel %vm1234_vm8, 1.0, %v3652_v30 }
0x1755   :  { %v1237_v38 = vpack.c.bf16 %v3018_v43, %v3018_v43  ;;  %3297 = vpow2.f32 %v1283_v32  ;;  %v2829_v32 = vrot.slane %v3870_v57, %v3853_v41  ;;  %v2825_v43 = vrot.slane %v3872_v58, %v3853_v41 }
0x1756   :  { %v2841_v34 = vsel %vm276_vm1, %v2840_v33, %v2836_v19  ;;  %v2868_v35 = vsub.s32 %v2865_v39, %v3810_v8 }
0x1757   :  { %3133 = vmatmul.mubr.msk.bf16.vlgmr.msra.gmra.mrb[16].mxu1 %vm572_vm9, %v1237_v38  ;;  %v2851_v38 = vrot.slane %v4043_v23, %v2846_v24 }
0x1758   :  { %1678 = vmatpush1.bf16.msra.mxu1 %v4185_v44  ;;  %1709 = vmatprep.mubr.bf16.mxu1 %v3648_v0 }
0x1759   :  { %1679 = vmatprep.subr.bf16.mxu1 %v4189_v51 }
0x175c   :  { %1680 = vmatpush1.bf16.msra.mxu1 %v4192_v36 }
0x175d   :  { %3148 = vmatprep.subr.bf16.mxu1 %v3652_v30 }
0x175f   :  { %v3298_v48 = vpop.eup %3297 }
0x1760   :  { %v1294_v53 = vrot.slane %v3298_v48, %v3853_v41 }
0x1762   :  { %v1295_v31 = vsel %vm276_vm1, %v1294_v53, %v1290_v27  ;;  %v2858_v27 = vrot.slane %v4117_v25, %v2857_v21  ;;  %v2830_v53 = vsel %vm276_vm1, %v2829_v32, %v2825_v43 }
0x1763   :  { %v1297_v55 = vsel %vm279_vm2, %v1295_v31, 0.0  ;;  %v2932_v31 = vsel %vm2931_vm10, %v2830_v53, %v2841_v34 }
0x1764   :  { %1298 = vadd.xlane.f32.xlu1 %v1297_v55  ;;  %v4226_v55 = vld [vmem:[#allocation8 + $0x8] sm:$0xff] }
0x17f1   :  { %v1299_v1 = vpop.xlane.xlu1 %1298 }
0x17f2   :  { %3299 = vrcp.f32 %v1299_v1  ;;  %v4229_v1 = vld [vmem:[#allocation8] sm:$0xff] }
0x17fc   :  { %v3300_v56 = vpop.eup %3299 }
0x17fd   :  { %v1309_v54 = vrot.slane %v3300_v56, %v3860_v49  ;;  %v1305_v59 = vrot.slane %v3300_v56, %v3813_v11 }
0x17ff   :  { %v1313_v9 = vmul.f32 %v3298_v48, %v1309_v54  ;;  %v1312_v2 = vmul.f32 %v3296_v47, %v1305_v59  ;;  %v2847_v47 = vrot.slane %v4045_v26, %v2846_v24  ;;  %v2862_v48 = vrot.slane %v4115_v22, %v2857_v21 }
0x1801   :  { %1321 = vperm.xlu1 %3215, %v1313_v9   ;;  %1316 = vperm.xlu0 %3216, %v1312_v2   ;;  %v2852_v57 = vsel %vm276_vm1, %v2851_v38, %v2847_v47  ;;  %v2863_v58 = vsel %vm276_vm1, %v2862_v48, %v2858_v27  ;;  %v4242_v27 = vld [vmem:[%s4738_s7] ss:$0 sm:$0xff] }
0x1802   :  { %v2934_v59 = vsel %vm2933_vm11, %v2932_v31, %v2852_v57  ;;  %vm2940_vm11 = vcmask 392192  }
0x1803   :  { %v2936_v9 = vsel %vm2935_vm12, %v2934_v59, %v2863_v58 }
0x1805   :  { %1395 = vrot.lane.b32.xlu1 %v4150_v7, %s3640_s23 }
0x182a   :  { %v1381_v12 = vpop.f32.mrb[16].mxu1 }
0x182b   :  { %v3134_v3 = vpop.f32.mrb[17].mxu1 }
0x182c   :  { %v1384_v4 = vpop.f32.mrb[18].mxu1 }
0x182d   :  { %v3135_v10 = vpop.f32.mrb[19].mxu1 }
0x1880   :  { %v1322_v23 = vpop.permute.xlu1 %1321  ;;  %v1317_v26 = vpop.permute.xlu0 %1316 }
0x1881   :  { %v1325_v22 = vmul.f32 %v4226_v55, %v1322_v23  ;;  %v2873_v25 = vrot.slane %v1322_v23, %v2868_v35  ;;  %v1324_v56 = vmul.f32 %v4229_v1, %v1317_v26  ;;  %v2869_v54 = vrot.slane %v1317_v26, %v2868_v35 }
0x1883   :  { %v1333_v2 = vsel %vm309_vm3, %v1325_v22, 0.0  ;;  %v1326_v3 = vsel %vm309_vm3, %v1324_v56, 0.0  ;;  %v2874_v4 = vsel %vm276_vm1, %v2873_v25, %v2869_v54 }
0x1884   :  { %v1334_v10 = vrot.slane %v1333_v2, 4  ;;  %v1327_v13 = vrot.slane %v1326_v3, 4  ;;  %v4236_v16 = vsel %vm175_vm0, %v2936_v9, %v2874_v4  ;;  %v1396_v23 = vpop.permute.xlu1 %1395  ;;  %v4259_v4 = vld [vmem:[#allocation5 + $0x8] sm:$0xff]  }
0x1886   :  { %v1335_v29 = vadd.f32 %v1334_v10, %v1333_v2  ;;  %v1328_v42 = vadd.f32 %v1327_v13, %v1326_v3  ;;  %v4267_v10 = vld [vmem:[#allocation5 + $0x18] sm:$0xff]  }
0x1888   :  { %v1336_v24 = vrot.slane %v1335_v29, 2  ;;  %v1329_v21 = vrot.slane %v1328_v42, 2 }
0x188a   :  { %v1337_v33 = vadd.f32 %v1336_v24, %v1335_v29  ;;  %v1330_v19 = vadd.f32 %v1329_v21, %v1328_v42 }
0x188c   :  { %v1338_v39 = vrot.slane %v1337_v33, 1  ;;  %v1331_v32 = vrot.slane %v1330_v19, 1 }
0x188e   :  { %v1339_v43 = vadd.f32 %v1338_v39, %v1337_v33  ;;  %v1332_v38 = vadd.f32 %v1331_v32, %v1330_v19 }
0x1890   :  { %v1342_v47 = vsel %vm276_vm1, %v1339_v43, %v1332_v38 }
0x1891   :  { %v1382_v48 = vadd.f32 %v1381_v12, %v1342_v47 }
0x1893   :  { %v1387_v34 = vadd.f32 %v4242_v27, %v1382_v48 }
0x1895   :  { %v1388_v35 = vadd.f32 %v1387_v34, %v4150_v7 }
0x1897   :  { %v3020_v53 = vmul.f32 -1.442695, %v1388_v35 }
0x1899   :  { %3301 = vpow2.f32 %v3020_v53 }
0x18a3   :  { %v3302_v57 = vpop.eup %3301 }
0x18a4   :  { %v1392_v31 = vadd.f32 1.0, %v3302_v57 }
0x18a6   :  { %3303 = vrcp.f32 %v1392_v31 }
0x18b0   :  { %v3304_v58 = vpop.eup %3303 }
0x18b1   :  { %v1398_v26 = vmul.f32 %v3304_v58, %v1396_v23  ;;  %v1405_v56 = vsub.f32 1.0, %v3304_v58  ;;  %v1411_v7 = vmul.f32 %v3304_v58, %v4131_v20  ;;  %v4263_v20 = vld [vmem:[#allocation5 + $0x10] sm:$0xff]  }
0x18b3   :  { %1400 = vrot.lane.b32.xlu0 %v1398_v26, %s3640_s23 }
0x1925   :  { %v1401_v12 = vpop.permute.xlu0 %1400 }
0x1926   :  { %v1403_v22 = vadd.f32 %v1401_v12, %v1387_v34 }
0x1928   :  { %3305 = vtanh.f32 %v1403_v22 }
0x1932   :  { %v3306_v25 = vpop.eup %3305 }
0x1933   :  { %1407 = vrot.lane.b32.xlu1 %v3306_v25, %s3650_s1 }
0x19a5   :  { %v1408_v54 = vpop.permute.xlu1 %1407 }
0x19a6   :  { %v1410_v59 = vmul.f32 %v1408_v54, %v1405_v56 }
0x19a8   :  { %v4249_v9 = vadd.f32 %v1411_v7, %v1410_v59 }
0x19aa   :  { %v1413_v2 = vpack.c.bf16 %v4249_v9, %v4249_v9 }
0x19ac   :  { %1415 = vrot.lane.b32.xlu0 %v1413_v2, %s3650_s1 }
0x1a1e   :  { %v1416_v3 = vpop.permute.xlu0 %1415 }
0x1a1f   :  { %3021 = vmatmul.mubr.msk.bf16.vlgmr.msra.gmra.mrb[16].mxu0 %vm175_vm0, %v1416_v3 }
0x1a20   :  { %3137 = vmatpush3.bf16.msra.mxu0 %v3931_v28  ;;  %3144 = vmatprep.mubr.msk.bf16.mxu0 %vm3653_vm7, %v3652_v30 }
0x1a21   :  { %3138 = vmatprep.subr.bf16.mxu0 %v3652_v30 }
0x1a24   :  { %3139 = vmatpush3.bf16.msra.mxu0 %v4259_v4 }
0x1a25   :  { %3140 = vmatprep.subr.bf16.mxu0 %v3652_v30 }
0x1a28   :  { %3141 = vmatpush3.bf16.msra.mxu0 %v4263_v20 }
0x1a29   :  { %3142 = vmatprep.subr.bf16.mxu0 %v3652_v30 }
0x1a2c   :  { %3143 = vmatpush3.bf16.msra.mxu0 %v4267_v10 }
0x1a2d   :  { %1934 = vmatprep.subr.bf16.mxu0 %v4146_v37 }
0x1af2   :  { %v1454_v13 = vpop.f32.mrb[16].mxu0 }
0x1af3   :  { %v4272_v29 = vadd.f32 %v1454_v13, %v3822_v14  ;;  %v1456_v42 = vpop.f32.mrb[17].mxu0 }
0x1af4   :  { %v4275_v24 = vadd.f32 %v1456_v42, %v3908_v5  ;;  %v1458_v21 = vpop.f32.mrb[18].mxu0 }
0x1af5   :  { %v1502_v33 = vrot.slane %v4272_v29, %v3825_v15  ;;  %v1459_v19 = vpop.f32.mrb[19].mxu0 }
0x1af6   :  { %v1461_v39 = vsel %vm407_vm4, %v4275_v24, -inf }
0x1af7   :  { %v1510_v32 = vrot.slane %v1502_v33, %v3825_v15  ;;  %1462 = vmax.xlane.f32.xlu1 %v1461_v39  ;;  %v1503_v58 = vcombine.high %v1502_v33, %v1502_v33 }
0x1af9   :  { %v1521_v43 = vrot.slane %v1510_v32, %v3813_v11  ;;  %v1517_v23 = vrot.slane %v1503_v58, %v3825_v15 }
0x1afb   :  { %v1528_v38 = vadd.f32 %v4161_v17, %v1521_v43  ;;  %v1525_v26 = vrot.slane %v1517_v23, %v3813_v11 }
0x1afd   :  { %3307 = vtanh.f32 %v1528_v38  ;;  %v1529_v12 = vadd.f32 %v4178_v63, %v1525_v26 }
0x1aff   :  { %3309 = vtanh.f32 %v1529_v12 }
0x1b07   :  { %v3308_v47 = vpop.eup %3307 }
0x1b08   :  { %v1532_v48 = vmul.f32 %v4167_v50, %v3308_v47 }
0x1b09   :  { %v3310_v54 = vpop.eup %3309 }
0x1b0a   :  { %1534 = vadd.xlane.f32.xlu1 %v1532_v48  ;;  %v1533_v59 = vmul.f32 %v4167_v50, %v3310_v54 }
0x1b84   :  { %v4285_v34 = vpop.xlane.xlu1 %1462 }
0x1b85   :  { %vm1474_vm13 = vcmp.eq.f32.partialorder %v4275_v24, %v4285_v34 }
0x1b86   :  { %v1475_v35 = vsel %vm1474_vm13, %v3849_v40, 64 }
0x1b87   :  { %v1476_v53 = vsel %vm407_vm4, %v1475_v35, 2147483647 }
0x1b88   :  { %v1478_v57 = vshra.s32 %v1476_v53, 16  ;;  %v1477_v22 = vand.u32 65535, %v1476_v53 }
0x1b8a   :  { %v1480_v31 = vcvt.s32.f32 %v1478_v57  ;;  %v1479_v56 = vcvt.s32.f32 %v1477_v22 }
0x1b8c   :  { %1481 = vmin.xlane.f32.xlu0 %v1480_v31 }
0x1b97   :  { %v1535_v3 = vpop.xlane.xlu1 %1534 }
0x1b98   :  { %v1538_v42 = vmul.f32 1.442695, %v1535_v3 }
0x1b9a   :  { %3311 = vpow2.f32 %v1538_v42 }
0x1ba4   :  { %v3312_v47 = vpop.eup %3311 }
0x1ba5   :  { %v1547_v35 = vrot.slane %v3312_v47, %v3853_v41 }
0x1c19   :  { %v1482_v25 = vpop.xlane.xlu0 %1481 }
0x1c1a   :  { %vm1483_vm14 = vcmp.eq.f32.partialorder %v1480_v31, %v1482_v25  ;;  %v1488_v2 = vcvt.f32.s32 %v1482_v25 }
0x1c1b   :  { %v1484_v7 = vsel %vm1483_vm14, %v1479_v56, inf }
0x1c1c   :  { %1485 = vmin.xlane.f32.xlu0 %v1484_v7  ;;  %v1489_v21 = vshll.u32 %v1488_v2, 16  ;;  %v2876_v2 = vadd.s32 4294967256, %v3849_v40 }
0x1c1e   :  { %v2879_v3 = vsub.s32 %v2876_v2, %v3810_v8 }
0x1c20   :  { %1536 = vadd.xlane.f32.xlu0 %v1533_v59 }
0x1ca9   :  { %v1486_v13 = vpop.xlane.xlu0 %1485 }
0x1caa   :  { %v1487_v33 = vcvt.f32.s32 %v1486_v13 }
0x1cac   :  { %v1490_v19 = vadd.s32 %v1489_v21, %v1487_v33 }
0x1cad   :  { %v1537_v39 = vpop.xlane.xlu0 %1536 }
0x1cae   :  { %vm1491_vm15 = vcmp.eq.s32.totalorder %v3849_v40, %v1490_v19  ;;  %v1540_v32 = vmul.f32 1.442695, %v1537_v39 }
0x1caf   :  { %v3022_v43 = vsel %vm1491_vm15, 1.0, %v3652_v30  ;;  %vm2942_vm15 = vcmask 457728  }
0x1cb0   :  { %v1494_v38 = vpack.c.bf16 %v3022_v43, %v3022_v43  ;;  %3313 = vpow2.f32 %v1540_v32 }
0x1cb2   :  { %3145 = vmatmul.mubr.msk.bf16.vlgmr.msra.gmra.mrb[20].mxu0 %vm572_vm9, %v1494_v38 }
0x1cb3   :  { %1935 = vmatpush1.bf16.msra.mxu0 %v4185_v44  ;;  %1966 = vmatprep.mubr.bf16.mxu0 %v3648_v0 }
0x1cb4   :  { %1936 = vmatprep.subr.bf16.mxu0 %v4189_v51 }
0x1cb7   :  { %1937 = vmatpush1.bf16.msra.mxu0 %v4192_v36 }
0x1cb8   :  { %3160 = vmatprep.subr.bf16.mxu0 %v3652_v30 }
0x1cba   :  { %v3314_v48 = vpop.eup %3313 }
0x1cbb   :  { %v1551_v53 = vrot.slane %v3314_v48, %v3853_v41 }
0x1cbd   :  { %v1552_v57 = vsel %vm276_vm1, %v1551_v53, %v1547_v35 }
0x1cbe   :  { %v1554_v31 = vsel %vm279_vm2, %v1552_v57, 0.0 }
0x1cbf   :  { %1555 = vadd.xlane.f32.xlu1 %v1554_v31 }
0x1d4c   :  { %v1556_v58 = vpop.xlane.xlu1 %1555 }
0x1d4d   :  { %3315 = vrcp.f32 %v1556_v58 }
0x1d57   :  { %v3316_v23 = vpop.eup %3315 }
0x1d58   :  { %v1566_v26 = vrot.slane %v3316_v23, %v3860_v49  ;;  %v1562_v12 = vrot.slane %v3316_v23, %v3813_v11 }
0x1d5a   :  { %v1570_v22 = vmul.f32 %v3314_v48, %v1566_v26  ;;  %v1569_v25 = vmul.f32 %v3312_v47, %v1562_v12 }
0x1d5c   :  { %1578 = vperm.xlu1 %3215, %v1570_v22   ;;  %1573 = vperm.xlu0 %3216, %v1569_v25  }
0x1d60   :  { %1652 = vrot.lane.b32.xlu1 %v4272_v29, %s3640_s23 }
0x1d85   :  { %v1638_v56 = vpop.f32.mrb[20].mxu0 }
0x1d86   :  { %v3146_v54 = vpop.f32.mrb[21].mxu0 }
0x1d87   :  { %v1641_v7 = vpop.f32.mrb[22].mxu0 }
0x1d88   :  { %v3147_v59 = vpop.f32.mrb[23].mxu0 }
0x1ddb   :  { %v1579_v13 = vpop.permute.xlu1 %1578  ;;  %v1574_v42 = vpop.permute.xlu0 %1573 }
0x1ddc   :  { %v1582_v21 = vmul.f32 %v4226_v55, %v1579_v13  ;;  %v2884_v33 = vrot.slane %v1579_v13, %v2879_v3  ;;  %v1581_v19 = vmul.f32 %v4229_v1, %v1574_v42  ;;  %v2880_v39 = vrot.slane %v1574_v42, %v2879_v3 }
0x1dde   :  { %v1590_v32 = vsel %vm309_vm3, %v1582_v21, 0.0  ;;  %v1583_v43 = vsel %vm309_vm3, %v1581_v19, 0.0  ;;  %v2885_v38 = vsel %vm276_vm1, %v2884_v33, %v2880_v39 }
0x1ddf   :  { %v1591_v47 = vrot.slane %v1590_v32, 4  ;;  %v1584_v48 = vrot.slane %v1583_v43, 4  ;;  %v4319_v35 = vsel %vm2938_vm5, %v4236_v16, %v2885_v38  ;;  %v1653_v33 = vpop.permute.xlu1 %1652 }
0x1de1   :  { %v1592_v53 = vadd.f32 %v1591_v47, %v1590_v32  ;;  %v1585_v57 = vadd.f32 %v1584_v48, %v1583_v43 }
0x1de3   :  { %v1593_v31 = vrot.slane %v1592_v53, 2  ;;  %v1586_v58 = vrot.slane %v1585_v57, 2 }
0x1de5   :  { %v1594_v23 = vadd.f32 %v1593_v31, %v1592_v53  ;;  %v1587_v26 = vadd.f32 %v1586_v58, %v1585_v57 }
0x1de7   :  { %v1595_v12 = vrot.slane %v1594_v23, 1  ;;  %v1588_v22 = vrot.slane %v1587_v26, 1 }
0x1de9   :  { %v1596_v25 = vadd.f32 %v1595_v12, %v1594_v23  ;;  %v1589_v54 = vadd.f32 %v1588_v22, %v1587_v26 }
0x1deb   :  { %v1599_v7 = vsel %vm276_vm1, %v1596_v25, %v1589_v54 }
0x1dec   :  { %v1639_v59 = vadd.f32 %v1638_v56, %v1599_v7 }
0x1dee   :  { %v1644_v2 = vadd.f32 %v4242_v27, %v1639_v59 }
0x1df0   :  { %v1645_v3 = vadd.f32 %v1644_v2, %v4272_v29 }
0x1df2   :  { %v3024_v13 = vmul.f32 -1.442695, %v1645_v3 }
0x1df4   :  { %3317 = vpow2.f32 %v3024_v13 }
0x1dfe   :  { %v3318_v16 = vpop.eup %3317 }
0x1dff   :  { %v1649_v42 = vadd.f32 1.0, %v3318_v16 }
0x1e01   :  { %3319 = vrcp.f32 %v1649_v42 }
0x1e0b   :  { %v3320_v21 = vpop.eup %3319 }
0x1e0c   :  { %v1655_v19 = vmul.f32 %v3320_v21, %v1653_v33  ;;  %v1662_v56 = vsub.f32 1.0, %v3320_v21  ;;  %v1668_v29 = vmul.f32 %v3320_v21, %v4249_v9 }
0x1e0e   :  { %1657 = vrot.lane.b32.xlu0 %v1655_v19, %s3640_s23 }
0x1e80   :  { %v1658_v39 = vpop.permute.xlu0 %1657 }
0x1e81   :  { %v1660_v32 = vadd.f32 %v1658_v39, %v1644_v2 }
0x1e83   :  { %3321 = vtanh.f32 %v1660_v32 }
0x1e8d   :  { %v3322_v43 = vpop.eup %3321 }
0x1e8e   :  { %1664 = vrot.lane.b32.xlu1 %v3322_v43, %s3650_s1 }
0x1f00   :  { %v1665_v38 = vpop.permute.xlu1 %1664 }
0x1f01   :  { %v1667_v47 = vmul.f32 %v1665_v38, %v1662_v56 }
0x1f03   :  { %v4327_v48 = vadd.f32 %v1668_v29, %v1667_v47 }
0x1f05   :  { %v1670_v53 = vpack.c.bf16 %v4327_v48, %v4327_v48 }
0x1f07   :  { %1672 = vrot.lane.b32.xlu0 %v1670_v53, %s3650_s1 }
0x1f79   :  { %v1673_v57 = vpop.permute.xlu0 %1672 }
0x1f7a   :  { %3025 = vmatmul.mubr.msk.bf16.vlgmr.msra.gmra.mrb[20].mxu1 %vm175_vm0, %v1673_v57 }
0x1f7b   :  { %3149 = vmatpush3.bf16.msra.mxu1 %v3931_v28  ;;  %3156 = vmatprep.mubr.msk.bf16.mxu1 %vm3653_vm7, %v3652_v30 }
0x1f7c   :  { %3150 = vmatprep.subr.bf16.mxu1 %v3652_v30 }
0x1f7f   :  { %3151 = vmatpush3.bf16.msra.mxu1 %v4259_v4 }
0x1f80   :  { %3152 = vmatprep.subr.bf16.mxu1 %v3652_v30 }
0x1f83   :  { %3153 = vmatpush3.bf16.msra.mxu1 %v4263_v20 }
0x1f84   :  { %3154 = vmatprep.subr.bf16.mxu1 %v3652_v30 }
0x1f87   :  { %3155 = vmatpush3.bf16.msra.mxu1 %v4267_v10 }
0x1f88   :  { %2191 = vmatprep.subr.bf16.mxu1 %v4146_v37 }
0x204d   :  { %v1711_v9 = vpop.f32.mrb[20].mxu1 }
0x204e   :  { %v4344_v31 = vadd.f32 %v1711_v9, %v3822_v14  ;;  %v1713_v58 = vpop.f32.mrb[21].mxu1 }
0x204f   :  { %v4347_v23 = vadd.f32 %v1713_v58, %v3908_v5  ;;  %v1715_v26 = vpop.f32.mrb[22].mxu1 }
0x2050   :  { %v1759_v12 = vrot.slane %v4344_v31, %v3825_v15  ;;  %v1716_v22 = vpop.f32.mrb[23].mxu1 }
0x2051   :  { %v1718_v25 = vsel %vm407_vm4, %v4347_v23, -inf }
0x2052   :  { %v1767_v54 = vrot.slane %v1759_v12, %v3825_v15  ;;  %1719 = vmax.xlane.f32.xlu1 %v1718_v25  ;;  %v1760_v19 = vcombine.high %v1759_v12, %v1759_v12 }
0x2054   :  { %v1778_v7 = vrot.slane %v1767_v54, %v3813_v11  ;;  %v1774_v39 = vrot.slane %v1760_v19, %v3825_v15 }
0x2056   :  { %v1785_v59 = vadd.f32 %v4161_v17, %v1778_v7  ;;  %v1782_v32 = vrot.slane %v1774_v39, %v3813_v11 }
0x2058   :  { %3323 = vtanh.f32 %v1785_v59  ;;  %v1786_v43 = vadd.f32 %v4178_v63, %v1782_v32 }
0x205a   :  { %3325 = vtanh.f32 %v1786_v43 }
0x2062   :  { %v3324_v2 = vpop.eup %3323 }
0x2063   :  { %v1789_v3 = vmul.f32 %v4167_v50, %v3324_v2 }
0x2064   :  { %v3326_v47 = vpop.eup %3325 }
0x2065   :  { %1791 = vadd.xlane.f32.xlu1 %v1789_v3  ;;  %v1790_v57 = vmul.f32 %v4167_v50, %v3326_v47 }
0x20df   :  { %v4357_v13 = vpop.xlane.xlu1 %1719 }
0x20e0   :  { %vm1731_vm6 = vcmp.eq.f32.partialorder %v4347_v23, %v4357_v13 }
0x20e1   :  { %v1732_v16 = vsel %vm1731_vm6, %v3849_v40, 64 }
0x20e2   :  { %v1733_v42 = vsel %vm407_vm4, %v1732_v16, 2147483647 }
0x20e3   :  { %v1735_v21 = vshra.s32 %v1733_v42, 16  ;;  %v1734_v56 = vand.u32 65535, %v1733_v42 }
0x20e5   :  { %v1737_v33 = vcvt.s32.f32 %v1735_v21  ;;  %v1736_v29 = vcvt.s32.f32 %v1734_v56 }
0x20e7   :  { %1738 = vmin.xlane.f32.xlu0 %v1737_v33 }
0x20f2   :  { %v1792_v58 = vpop.xlane.xlu1 %1791 }
0x20f3   :  { %v1795_v12 = vmul.f32 1.442695, %v1792_v58 }
0x20f5   :  { %3327 = vpow2.f32 %v1795_v12 }
0x20ff   :  { %v3328_v16 = vpop.eup %3327 }
0x2100   :  { %v1804_v21 = vrot.slane %v3328_v16, %v3853_v41 }
0x2174   :  { %v1739_v38 = vpop.xlane.xlu0 %1738 }
0x2175   :  { %vm1740_vm8 = vcmp.eq.f32.partialorder %v1737_v33, %v1739_v38  ;;  %v1745_v9 = vcvt.f32.s32 %v1739_v38 }
0x2176   :  { %v1741_v53 = vsel %vm1740_vm8, %v1736_v29, inf }
0x2177   :  { %1742 = vmin.xlane.f32.xlu0 %v1741_v53  ;;  %v1746_v22 = vshll.u32 %v1745_v9, 16 }
0x217b   :  { %1793 = vadd.xlane.f32.xlu0 %v1790_v57 }
0x2204   :  { %v1743_v26 = vpop.xlane.xlu0 %1742 }
0x2205   :  { %v1744_v25 = vcvt.f32.s32 %v1743_v26  ;;  %v2887_v26 = vadd.s32 4294967248, %v3849_v40 }
0x2207   :  { %v1747_v54 = vadd.s32 %v1746_v22, %v1744_v25  ;;  %v2890_v12 = vsub.s32 %v2887_v26, %v3810_v8 }
0x2208   :  { %v1794_v7 = vpop.xlane.xlu0 %1793 }
0x2209   :  { %vm1748_vm10 = vcmp.eq.s32.totalorder %v3849_v40, %v1747_v54  ;;  %v1797_v59 = vmul.f32 1.442695, %v1794_v7 }
0x220a   :  { %v3026_v2 = vsel %vm1748_vm10, 1.0, %v3652_v30 }
0x220b   :  { %v1751_v3 = vpack.c.bf16 %v3026_v2, %v3026_v2  ;;  %3329 = vpow2.f32 %v1797_v59 }
0x220d   :  { %3157 = vmatmul.mubr.msk.bf16.vlgmr.msra.gmra.mrb[24].mxu1 %vm572_vm9, %v1751_v3 }
0x220e   :  { %2192 = vmatpush1.bf16.msra.mxu1 %v4185_v44  ;;  %2223 = vmatprep.mubr.bf16.mxu1 %v3648_v0 }
0x220f   :  { %2193 = vmatprep.subr.bf16.mxu1 %v4189_v51 }
0x2212   :  { %2194 = vmatpush1.bf16.msra.mxu1 %v4192_v36 }
0x2213   :  { %3172 = vmatprep.subr.bf16.mxu1 %v3652_v30 }
0x2215   :  { %v3330_v42 = vpop.eup %3329 }
0x2216   :  { %v1808_v33 = vrot.slane %v3330_v42, %v3853_v41 }
0x2218   :  { %v1809_v19 = vsel %vm276_vm1, %v1808_v33, %v1804_v21 }
0x2219   :  { %v1811_v39 = vsel %vm279_vm2, %v1809_v19, 0.0 }
0x221a   :  { %1812 = vadd.xlane.f32.xlu1 %v1811_v39 }
0x22a7   :  { %v1813_v32 = vpop.xlane.xlu1 %1812 }
0x22a8   :  { %3331 = vrcp.f32 %v1813_v32 }
0x22b2   :  { %v3332_v43 = vpop.eup %3331 }
0x22b3   :  { %v1823_v56 = vrot.slane %v3332_v43, %v3860_v49  ;;  %v1819_v38 = vrot.slane %v3332_v43, %v3813_v11 }
0x22b5   :  { %v1827_v29 = vmul.f32 %v3330_v42, %v1823_v56  ;;  %v1826_v47 = vmul.f32 %v3328_v16, %v1819_v38 }
0x22b7   :  { %1835 = vperm.xlu1 %3215, %v1827_v29   ;;  %1830 = vperm.xlu0 %3216, %v1826_v47  }
0x22bb   :  { %1909 = vrot.lane.b32.xlu1 %v4344_v31, %s3640_s23 }
0x22e0   :  { %v1895_v53 = vpop.f32.mrb[24].mxu1 }
0x22e1   :  { %v3158_v57 = vpop.f32.mrb[25].mxu1 }
0x22e2   :  { %v1898_v9 = vpop.f32.mrb[26].mxu1 }
0x22e3   :  { %v3159_v58 = vpop.f32.mrb[27].mxu1 }
0x2336   :  { %v1836_v22 = vpop.permute.xlu1 %1835  ;;  %v1831_v25 = vpop.permute.xlu0 %1830 }
0x2337   :  { %v1839_v54 = vmul.f32 %v4226_v55, %v1836_v22  ;;  %v2895_v7 = vrot.slane %v1836_v22, %v2890_v12  ;;  %v1838_v59 = vmul.f32 %v4229_v1, %v1831_v25  ;;  %v2891_v2 = vrot.slane %v1831_v25, %v2890_v12 }
0x2339   :  { %v1847_v3 = vsel %vm309_vm3, %v1839_v54, 0.0  ;;  %v1840_v16 = vsel %vm309_vm3, %v1838_v59, 0.0  ;;  %v2896_v42 = vsel %vm276_vm1, %v2895_v7, %v2891_v2 }
0x233a   :  { %v1848_v21 = vrot.slane %v1847_v3, 4  ;;  %v1841_v33 = vrot.slane %v1840_v16, 4  ;;  %v4391_v19 = vsel %vm2940_vm11, %v4319_v35, %v2896_v42  ;;  %v1910_v2 = vpop.permute.xlu1 %1909 }
0x233c   :  { %v1849_v39 = vadd.f32 %v1848_v21, %v1847_v3  ;;  %v1842_v32 = vadd.f32 %v1841_v33, %v1840_v16 }
0x233e   :  { %v1850_v43 = vrot.slane %v1849_v39, 2  ;;  %v1843_v56 = vrot.slane %v1842_v32, 2 }
0x2340   :  { %v1851_v38 = vadd.f32 %v1850_v43, %v1849_v39  ;;  %v1844_v29 = vadd.f32 %v1843_v56, %v1842_v32 }
0x2342   :  { %v1852_v47 = vrot.slane %v1851_v38, 1  ;;  %v1845_v57 = vrot.slane %v1844_v29, 1 }
0x2344   :  { %v1853_v9 = vadd.f32 %v1852_v47, %v1851_v38  ;;  %v1846_v58 = vadd.f32 %v1845_v57, %v1844_v29 }
0x2346   :  { %v1856_v26 = vsel %vm276_vm1, %v1853_v9, %v1846_v58 }
0x2347   :  { %v1896_v12 = vadd.f32 %v1895_v53, %v1856_v26 }
0x2349   :  { %v1901_v22 = vadd.f32 %v4242_v27, %v1896_v12 }
0x234b   :  { %v1902_v25 = vadd.f32 %v1901_v22, %v4344_v31 }
0x234d   :  { %v3028_v54 = vmul.f32 -1.442695, %v1902_v25 }
0x234f   :  { %3333 = vpow2.f32 %v3028_v54 }
0x2359   :  { %v3334_v35 = vpop.eup %3333 }
0x235a   :  { %v1906_v7 = vadd.f32 1.0, %v3334_v35 }
0x235c   :  { %3335 = vrcp.f32 %v1906_v7 }
0x2366   :  { %v3336_v59 = vpop.eup %3335 }
0x2367   :  { %v1912_v3 = vmul.f32 %v3336_v59, %v1910_v2  ;;  %v1919_v53 = vsub.f32 1.0, %v3336_v59  ;;  %v1925_v31 = vmul.f32 %v3336_v59, %v4327_v48 }
0x2369   :  { %1914 = vrot.lane.b32.xlu0 %v1912_v3, %s3640_s23 }
0x23db   :  { %v1915_v16 = vpop.permute.xlu0 %1914 }
0x23dc   :  { %v1917_v42 = vadd.f32 %v1915_v16, %v1901_v22 }
0x23de   :  { %3337 = vtanh.f32 %v1917_v42 }
0x23e8   :  { %v3338_v21 = vpop.eup %3337 }
0x23e9   :  { %1921 = vrot.lane.b32.xlu1 %v3338_v21, %s3650_s1 }
0x245b   :  { %v1922_v33 = vpop.permute.xlu1 %1921 }
0x245c   :  { %v1924_v39 = vmul.f32 %v1922_v33, %v1919_v53 }
0x245e   :  { %v4399_v32 = vadd.f32 %v1925_v31, %v1924_v39 }
0x2460   :  { %v1927_v43 = vpack.c.bf16 %v4399_v32, %v4399_v32 }
0x2462   :  { %1929 = vrot.lane.b32.xlu0 %v1927_v43, %s3650_s1 }
0x24d4   :  { %v1930_v56 = vpop.permute.xlu0 %1929 }
0x24d5   :  { %3029 = vmatmul.mubr.msk.bf16.vlgmr.msra.gmra.mrb[24].mxu0 %vm175_vm0, %v1930_v56 }
0x24d6   :  { %3161 = vmatpush3.bf16.msra.mxu0 %v3931_v28  ;;  %3168 = vmatprep.mubr.msk.bf16.mxu0 %vm3653_vm7, %v3652_v30 }
0x24d7   :  { %3162 = vmatprep.subr.bf16.mxu0 %v3652_v30 }
0x24da   :  { %3163 = vmatpush3.bf16.msra.mxu0 %v4259_v4 }
0x24db   :  { %3164 = vmatprep.subr.bf16.mxu0 %v3652_v30 }
0x24de   :  { %3165 = vmatpush3.bf16.msra.mxu0 %v4263_v20 }
0x24df   :  { %3166 = vmatprep.subr.bf16.mxu0 %v3652_v30 }
0x24e2   :  { %3167 = vmatpush3.bf16.msra.mxu0 %v4267_v10 }
0x24e3   :  { %2448 = vmatprep.subr.bf16.mxu0 %v4146_v37 }
0x25a8   :  { %v1968_v48 = vpop.f32.mrb[24].mxu0 }
0x25a9   :  { %v4416_v38 = vadd.f32 %v1968_v48, %v3822_v14  ;;  %v1970_v29 = vpop.f32.mrb[25].mxu0 }
0x25aa   :  { %v4419_v47 = vadd.f32 %v1970_v29, %v3908_v5  ;;  %v1972_v57 = vpop.f32.mrb[26].mxu0 }
0x25ab   :  { %v2016_v9 = vrot.slane %v4416_v38, %v3825_v15  ;;  %v1973_v58 = vpop.f32.mrb[27].mxu0 }
0x25ac   :  { %v1975_v26 = vsel %vm407_vm4, %v4419_v47, -inf }
0x25ad   :  { %v2024_v12 = vrot.slane %v2016_v9, %v3825_v15  ;;  %1976 = vmax.xlane.f32.xlu1 %v1975_v26  ;;  %v2017_v16 = vcombine.high %v2016_v9, %v2016_v9 }
0x25af   :  { %v2035_v37 = vrot.slane %v2024_v12, %v3813_v11 }
0x25b1   :  { %v2042_v22 = vadd.f32 %v4161_v17, %v2035_v37  ;;  %v2031_v17 = vrot.slane %v2017_v16, %v3825_v15 }
0x25b3   :  { %3339 = vtanh.f32 %v2042_v22  ;;  %v2039_v42 = vrot.slane %v2031_v17, %v3813_v11 }
0x25b5   :  { %v2043_v21 = vadd.f32 %v4178_v63, %v2039_v42 }
0x25b7   :  { %3341 = vtanh.f32 %v2043_v21 }
0x25bd   :  { %v3340_v25 = vpop.eup %3339 }
0x25be   :  { %v2046_v54 = vmul.f32 %v4167_v50, %v3340_v25 }
0x25c0   :  { %2048 = vadd.xlane.f32.xlu1 %v2046_v54 }
0x25c1   :  { %v3342_v39 = vpop.eup %3341 }
0x25c2   :  { %v2047_v56 = vmul.f32 %v4167_v50, %v3342_v39  ;;  %v2898_v39 = vadd.s32 4294967240, %v3849_v40 }
0x263a   :  { %v4429_v35 = vpop.xlane.xlu1 %1976 }
0x263b   :  { %vm1988_vm12 = vcmp.eq.f32.partialorder %v4419_v47, %v4429_v35 }
0x263c   :  { %v1989_v7 = vsel %vm1988_vm12, %v3849_v40, 64  ;;  %vm2947_vm12 = vcmask 648192  }
0x263d   :  { %v1990_v59 = vsel %vm407_vm4, %v1989_v7, 2147483647 }
0x263e   :  { %v1992_v2 = vshra.s32 %v1990_v59, 16  ;;  %v1991_v53 = vand.u32 65535, %v1990_v59 }
0x2640   :  { %v1994_v3 = vcvt.s32.f32 %v1992_v2  ;;  %v1993_v31 = vcvt.s32.f32 %v1991_v53 }
0x2642   :  { %1995 = vmin.xlane.f32.xlu0 %v1994_v3 }
0x264d   :  { %v2049_v29 = vpop.xlane.xlu1 %2048 }
0x264e   :  { %v2052_v9 = vmul.f32 1.442695, %v2049_v29 }
0x2650   :  { %3343 = vpow2.f32 %v2052_v9 }
0x265a   :  { %v3344_v50 = vpop.eup %3343 }
0x265b   :  { %v2061_v7 = vrot.slane %v3344_v50, %v3853_v41 }
0x26cf   :  { %v1996_v33 = vpop.xlane.xlu0 %1995 }
0x26d0   :  { %vm1997_vm13 = vcmp.eq.f32.partialorder %v1994_v3, %v1996_v33  ;;  %v2002_v48 = vcvt.f32.s32 %v1996_v33 }
0x26d1   :  { %v1998_v43 = vsel %vm1997_vm13, %v1993_v31, inf }
0x26d2   :  { %1999 = vmin.xlane.f32.xlu0 %v1998_v43  ;;  %v2003_v58 = vshll.u32 %v2002_v48, 16  ;;  %v2901_v43 = vsub.s32 %v2898_v39, %v3810_v8 }
0x26d6   :  { %2050 = vadd.xlane.f32.xlu0 %v2047_v56 }
0x275f   :  { %v2000_v57 = vpop.xlane.xlu0 %1999 }
0x2760   :  { %v2001_v26 = vcvt.f32.s32 %v2000_v57 }
0x2762   :  { %v2004_v12 = vadd.s32 %v2003_v58, %v2001_v26 }
0x2763   :  { %v2051_v37 = vpop.xlane.xlu0 %2050 }
0x2764   :  { %vm2005_vm14 = vcmp.eq.s32.totalorder %v3849_v40, %v2004_v12  ;;  %v2054_v63 = vmul.f32 1.442695, %v2051_v37 }
0x2765   :  { %v3030_v22 = vsel %vm2005_vm14, 1.0, %v3652_v30 }
0x2766   :  { %v2008_v25 = vpack.c.bf16 %v3030_v22, %v3030_v22  ;;  %3345 = vpow2.f32 %v2054_v63 }
0x2768   :  { %3169 = vmatmul.mubr.msk.bf16.vlgmr.msra.gmra.mrb[28].mxu0 %vm572_vm9, %v2008_v25 }
0x2769   :  { %2449 = vmatpush1.bf16.msra.mxu0 %v4185_v44  ;;  %2480 = vmatprep.mubr.bf16.mxu0 %v3648_v0 }
0x276a   :  { %2450 = vmatprep.subr.bf16.mxu0 %v4189_v51 }
0x276d   :  { %2451 = vmatpush1.bf16.msra.mxu0 %v4192_v36 }
0x276e   :  { %3184 = vmatprep.subr.bf16.mxu0 %v3652_v30 }
0x2770   :  { %v3346_v54 = vpop.eup %3345 }
0x2771   :  { %v2065_v59 = vrot.slane %v3346_v54, %v3853_v41 }
0x2773   :  { %v2066_v2 = vsel %vm276_vm1, %v2065_v59, %v2061_v7 }
0x2774   :  { %v2068_v3 = vsel %vm279_vm2, %v2066_v2, 0.0 }
0x2775   :  { %2069 = vadd.xlane.f32.xlu1 %v2068_v3 }
0x2802   :  { %v2070_v44 = vpop.xlane.xlu1 %2069 }
0x2803   :  { %3347 = vrcp.f32 %v2070_v44 }
0x280d   :  { %v3348_v16 = vpop.eup %3347 }
0x280e   :  { %v2080_v51 = vrot.slane %v3348_v16, %v3860_v49  ;;  %v2076_v36 = vrot.slane %v3348_v16, %v3813_v11 }
0x2810   :  { %v2084_v17 = vmul.f32 %v3346_v54, %v2080_v51  ;;  %v2083_v42 = vmul.f32 %v3344_v50, %v2076_v36 }
0x2812   :  { %2092 = vperm.xlu1 %3215, %v2084_v17   ;;  %2087 = vperm.xlu0 %3216, %v2083_v42  }
0x2816   :  { %2166 = vrot.lane.b32.xlu1 %v4416_v38, %s3640_s23 }
0x283b   :  { %v2152_v21 = vpop.f32.mrb[28].mxu0 }
0x283c   :  { %v3170_v53 = vpop.f32.mrb[29].mxu0 }
0x283d   :  { %v2155_v33 = vpop.f32.mrb[30].mxu0 }
0x283e   :  { %v3171_v31 = vpop.f32.mrb[31].mxu0 }
0x2891   :  { %v2093_v56 = vpop.permute.xlu1 %2092  ;;  %v2088_v48 = vpop.permute.xlu0 %2087 }
0x2892   :  { %v2096_v29 = vmul.f32 %v4226_v55, %v2093_v56  ;;  %v2906_v57 = vrot.slane %v2093_v56, %v2901_v43  ;;  %v2095_v9 = vmul.f32 %v4229_v1, %v2088_v48  ;;  %v2902_v58 = vrot.slane %v2088_v48, %v2901_v43 }
0x2894   :  { %v2104_v26 = vsel %vm309_vm3, %v2096_v29, 0.0  ;;  %v2097_v12 = vsel %vm309_vm3, %v2095_v9, 0.0  ;;  %v2907_v37 = vsel %vm276_vm1, %v2906_v57, %v2902_v58 }
0x2895   :  { %v2105_v63 = vrot.slane %v2104_v26, 4  ;;  %v2098_v22 = vrot.slane %v2097_v12, 4  ;;  %v4463_v25 = vsel %vm2942_vm15, %v4391_v19, %v2907_v37  ;;  %v2167_v39 = vpop.permute.xlu1 %2166 }
0x2897   :  { %v2106_v50 = vadd.f32 %v2105_v63, %v2104_v26  ;;  %v2099_v54 = vadd.f32 %v2098_v22, %v2097_v12 }
0x2899   :  { %v2107_v7 = vrot.slane %v2106_v50, 2  ;;  %v2100_v59 = vrot.slane %v2099_v54, 2 }
0x289b   :  { %v2108_v55 = vadd.f32 %v2107_v7, %v2106_v50  ;;  %v2101_v2 = vadd.f32 %v2100_v59, %v2099_v54  ;;  %v4498_v59 = vld [vmem:[#allocation7] sm:$0xff] }
0x289d   :  { %v2109_v3 = vrot.slane %v2108_v55, 1  ;;  %v2102_v1 = vrot.slane %v2101_v2, 1 }
0x289f   :  { %v2110_v44 = vadd.f32 %v2109_v3, %v2108_v55  ;;  %v2103_v16 = vadd.f32 %v2102_v1, %v2101_v2  ;;  %v4504_v3 = vld [vmem:[%s4734_s3] ss:$0 sm:$0xff] }
0x28a1   :  { %v2113_v51 = vsel %vm276_vm1, %v2110_v44, %v2103_v16 }
0x28a2   :  { %v2153_v36 = vadd.f32 %v2152_v21, %v2113_v51 }
0x28a4   :  { %v2158_v17 = vadd.f32 %v4242_v27, %v2153_v36 }
0x28a6   :  { %v2159_v42 = vadd.f32 %v2158_v17, %v4416_v38 }
0x28a8   :  { %v3032_v53 = vmul.f32 -1.442695, %v2159_v42 }
0x28aa   :  { %3349 = vpow2.f32 %v3032_v53 }
0x28b4   :  { %v3350_v19 = vpop.eup %3349 }
0x28b5   :  { %v2163_v33 = vadd.f32 1.0, %v3350_v19 }
0x28b7   :  { %3351 = vrcp.f32 %v2163_v33  ;;  %v4515_v33 = vld [vmem:[#allocation7 + $0x8] sm:$0xff] }
0x28c1   :  { %v3352_v31 = vpop.eup %3351 }
0x28c2   :  { %v2169_v43 = vmul.f32 %v3352_v31, %v2167_v39  ;;  %v2176_v21 = vsub.f32 1.0, %v3352_v31  ;;  %v2182_v38 = vmul.f32 %v3352_v31, %v4399_v32  ;;  %v3440_v32 = vld [vmem:[#allocation10 + $0x4] ss:$8 sps:$4 sm:$0xff]  }
0x28c4   :  { %2171 = vrot.lane.b32.xlu0 %v2169_v43, %s3640_s23 }
0x2936   :  { %v2172_v56 = vpop.permute.xlu0 %2171 }
0x2937   :  { %v2174_v48 = vadd.f32 %v2172_v56, %v2158_v17 }
0x2939   :  { %3353 = vtanh.f32 %v2174_v48 }
0x2943   :  { %v3354_v29 = vpop.eup %3353 }
0x2944   :  { %2178 = vrot.lane.b32.xlu1 %v3354_v29, %s3650_s1 }
0x29b6   :  { %v2179_v27 = vpop.permute.xlu1 %2178 }
0x29b7   :  { %v2181_v57 = vmul.f32 %v2179_v27, %v2176_v21 }
0x29b9   :  { %v4471_v9 = vadd.f32 %v2182_v38, %v2181_v57 }
0x29bb   :  { %v2184_v58 = vpack.c.bf16 %v4471_v9, %v4471_v9 }
0x29bd   :  { %2186 = vrot.lane.b32.xlu0 %v2184_v58, %s3650_s1 }
0x2a2f   :  { %v2187_v26 = vpop.permute.xlu0 %2186 }
0x2a30   :  { %3033 = vmatmul.mubr.msk.bf16.vlgmr.msra.gmra.mrb[28].mxu1 %vm175_vm0, %v2187_v26 }
0x2a31   :  { %3173 = vmatpush3.bf16.msra.mxu1 %v3931_v28  ;;  %3180 = vmatprep.mubr.msk.bf16.mxu1 %vm3653_vm7, %v3652_v30 }
0x2a32   :  { %3174 = vmatprep.subr.bf16.mxu1 %v3652_v30 }
0x2a35   :  { %3175 = vmatpush3.bf16.msra.mxu1 %v4259_v4 }
0x2a36   :  { %3176 = vmatprep.subr.bf16.mxu1 %v3652_v30 }
0x2a39   :  { %3177 = vmatpush3.bf16.msra.mxu1 %v4263_v20 }
0x2a3a   :  { %3178 = vmatprep.subr.bf16.mxu1 %v3652_v30 }
0x2a3d   :  { %3179 = vmatpush3.bf16.msra.mxu1 %v4267_v10 }
0x2a3e   :  { %2705 = vmatprep.subr.bf16.mxu1 %v3440_v32 }
0x2b03   :  { %v2225_v12 = vpop.f32.mrb[28].mxu1 }
0x2b04   :  { %v4487_v37 = vadd.f32 %v2225_v12, %v3822_v14  ;;  %v2227_v63 = vpop.f32.mrb[29].mxu1 }
0x2b05   :  { %v4490_v22 = vadd.f32 %v2227_v63, %v3908_v5  ;;  %v2229_v50 = vpop.f32.mrb[30].mxu1 }
0x2b06   :  { %v2273_v4 = vrot.slane %v4487_v37, %v3825_v15  ;;  %v2230_v54 = vpop.f32.mrb[31].mxu1 }
0x2b07   :  { %v2232_v20 = vsel %vm407_vm4, %v4490_v22, -inf }
0x2b08   :  { %v2281_v10 = vrot.slane %v2273_v4, %v3825_v15  ;;  %2233 = vmax.xlane.f32.xlu1 %v2232_v20  ;;  %v2274_v42 = vcombine.high %v2273_v4, %v2273_v4  ;;  %v3444_v20 = vld [vmem:[#allocation10] ss:$8 sps:$4 sm:$0xff]  }
0x2b0a   :  { %v2292_v7 = vrot.slane %v2281_v10, %v3813_v11  ;;  %v2288_v53 = vrot.slane %v2274_v42, %v3825_v15  ;;  %v3445_v10 = vld [vmem:[#allocation10 + $0x14] ss:$8 sps:$4 sm:$0xff]  }
0x2b0c   :  { %v2299_v55 = vadd.f32 %v4498_v59, %v2292_v7  ;;  %v2296_v19 = vrot.slane %v2288_v53, %v3813_v11  ;;  %v3446_v7 = vld [vmem:[#allocation10 + $0x10] ss:$8 sps:$4 sm:$0xff]  }
0x2b0e   :  { %3355 = vtanh.f32 %v2299_v55  ;;  %v2300_v31 = vadd.f32 %v4515_v33, %v2296_v19 }
0x2b10   :  { %3357 = vtanh.f32 %v2300_v31 }
0x2b18   :  { %v3356_v2 = vpop.eup %3355 }
0x2b19   :  { %v2303_v1 = vmul.f32 %v4504_v3, %v3356_v2 }
0x2b1a   :  { %v3358_v48 = vpop.eup %3357 }
0x2b1b   :  { %2305 = vadd.xlane.f32.xlu1 %v2303_v1  ;;  %v2304_v21 = vmul.f32 %v4504_v3, %v3358_v48 }
0x2b95   :  { %v4507_v44 = vpop.xlane.xlu1 %2233 }
0x2b96   :  { %vm2245_vm5 = vcmp.eq.f32.partialorder %v4490_v22, %v4507_v44 }
0x2b97   :  { %v2246_v16 = vsel %vm2245_vm5, %v3849_v40, 64 }
0x2b98   :  { %v2247_v51 = vsel %vm407_vm4, %v2246_v16, 2147483647 }
0x2b99   :  { %v2249_v36 = vshra.s32 %v2247_v51, 16  ;;  %v2248_v39 = vand.u32 65535, %v2247_v51 }
0x2b9b   :  { %v2251_v17 = vcvt.s32.f32 %v2249_v36  ;;  %v2250_v56 = vcvt.s32.f32 %v2248_v39 }
0x2b9d   :  { %2252 = vmin.xlane.f32.xlu0 %v2251_v17 }
0x2ba8   :  { %v2306_v38 = vpop.xlane.xlu1 %2305 }
0x2ba9   :  { %v2309_v58 = vmul.f32 1.442695, %v2306_v38 }
0x2bab   :  { %3359 = vpow2.f32 %v2309_v58 }
0x2bb5   :  { %v3360_v55 = vpop.eup %3359 }
0x2bb6   :  { %v2318_v1 = vrot.slane %v3360_v55, %v3853_v41 }
0x2c2a   :  { %v2253_v43 = vpop.xlane.xlu0 %2252 }
0x2c2b   :  { %vm2254_vm6 = vcmp.eq.f32.partialorder %v2251_v17, %v2253_v43  ;;  %v2259_v27 = vcvt.f32.s32 %v2253_v43 }
0x2c2c   :  { %v2255_v29 = vsel %vm2254_vm6, %v2250_v56, inf }
0x2c2d   :  { %2256 = vmin.xlane.f32.xlu0 %v2255_v29  ;;  %v2260_v26 = vshll.u32 %v2259_v27, 16  ;;  %v2909_v29 = vadd.s32 4294967232, %v3849_v40 }
0x2c31   :  { %2307 = vadd.xlane.f32.xlu0 %v2304_v21  ;;  %v2912_v21 = vsub.s32 %v2909_v29, %v3810_v8 }
0x2cba   :  { %v2257_v57 = vpop.xlane.xlu0 %2256 }
0x2cbb   :  { %v2258_v32 = vcvt.f32.s32 %v2257_v57  ;;  %v4533_v57 = vld [vmem:[#allocation8 + $0x8] sm:$0xff] }
0x2cbd   :  { %v2261_v12 = vadd.s32 %v2260_v26, %v2258_v32  ;;  %v4536_v32 = vld [vmem:[#allocation8] sm:$0xff] }
0x2cbe   :  { %v2308_v63 = vpop.xlane.xlu0 %2307 }
0x2cbf   :  { %vm2262_vm8 = vcmp.eq.s32.totalorder %v3849_v40, %v2261_v12  ;;  %v2311_v50 = vmul.f32 1.442695, %v2308_v63 }
0x2cc0   :  { %v3034_v4 = vsel %vm2262_vm8, 1.0, %v3652_v30 }
0x2cc1   :  { %v2265_v54 = vpack.c.bf16 %v3034_v4, %v3034_v4  ;;  %3361 = vpow2.f32 %v2311_v50 }
0x2cc3   :  { %3181 = vmatmul.mubr.msk.bf16.vlgmr.msra.gmra.mrb[32].mxu1 %vm572_vm9, %v2265_v54 }
0x2cc4   :  { %2706 = vmatpush1.bf16.msra.mxu1 %v3444_v20  ;;  %2737 = vmatprep.mubr.bf16.mxu1 %v3648_v0 }
0x2cc5   :  { %2707 = vmatprep.subr.bf16.mxu1 %v3445_v10 }
0x2cc8   :  { %2708 = vmatpush1.bf16.msra.mxu1 %v3446_v7 }
0x2ccb   :  { %v3362_v2 = vpop.eup %3361 }
0x2ccc   :  { %v2322_v16 = vrot.slane %v3362_v2, %v3853_v41 }
0x2cce   :  { %v2323_v51 = vsel %vm276_vm1, %v2322_v16, %v2318_v1 }
0x2ccf   :  { %v2325_v36 = vsel %vm279_vm2, %v2323_v51, 0.0 }
0x2cd0   :  { %2326 = vadd.xlane.f32.xlu1 %v2325_v36 }
0x2d5d   :  { %v2327_v17 = vpop.xlane.xlu1 %2326 }
0x2d5e   :  { %3363 = vrcp.f32 %v2327_v17 }
0x2d68   :  { %v3364_v42 = vpop.eup %3363 }
0x2d69   :  { %v2337_v0 = vrot.slane %v3364_v42, %v3860_v49  ;;  %v2333_v53 = vrot.slane %v3364_v42, %v3813_v11 }
0x2d6b   :  { %v2341_v19 = vmul.f32 %v3362_v2, %v2337_v0  ;;  %v2340_v31 = vmul.f32 %v3360_v55, %v2333_v53 }
0x2d6d   :  { %2349 = vperm.xlu1 %3215, %v2341_v19   ;;  %2344 = vperm.xlu0 %3216, %v2340_v31  }
0x2d71   :  { %2423 = vrot.lane.b32.xlu1 %v4487_v37, %s3640_s23 }
0x2d96   :  { %v2409_v39 = vpop.f32.mrb[32].mxu1 }
0x2d97   :  { %v3182_v43 = vpop.f32.mrb[33].mxu1 }
0x2d98   :  { %v2412_v56 = vpop.f32.mrb[34].mxu1  ;;  %v4550_v43 = vld [vmem:[%s4738_s7] ss:$0 sm:$0xff]  ;;  %s3654_s7 = smov [#allocation12]  }
0x2d99   :  { %v3183_v48 = vpop.f32.mrb[35].mxu1  ;;  %s2965_s27 = sshll.u32 %s3654_s7, 4  ;;  %s2966_s27 = int_to_ptr.vmem [resolvable:$true] %s2965_s27 }
0x2d9a   :  { %s3563_s29 = scalar_lea.vmem %s2966_s27, 32  ;;  %p3568_p13 = scmp.lt.s32.totalorder %s2966_s27, %s2966_s27 }
0x2d9b   :  { %p3564_p12 = scmp.ne.s32.totalorder %s2966_s27, %s3563_s29  ;;  %p3569_p0 = scmp.lt.s32.totalorder %s3563_s29, %s3563_s29 }
0x2d9d   :  { %p3570_p1 = por %p3569_p0, %p3568_p13 }
0x2d9f   :  { %p3571_p2 = pnand %p3570_p1, %p3564_p12 }
0x2dec   :  { %v2350_v27 = vpop.permute.xlu1 %2349  ;;  %v2345_v38 = vpop.permute.xlu0 %2344 }
0x2ded   :  { %v2353_v58 = vmul.f32 %v4533_v57, %v2350_v27  ;;  %v2917_v26 = vrot.slane %v2350_v27, %v2912_v21  ;;  %v2352_v12 = vmul.f32 %v4536_v32, %v2345_v38  ;;  %v2913_v63 = vrot.slane %v2345_v38, %v2912_v21 }
0x2def   :  { %v2361_v50 = vsel %vm309_vm3, %v2353_v58, 0.0  ;;  %v2354_v4 = vsel %vm309_vm3, %v2352_v12, 0.0  ;;  %v2918_v54 = vsel %vm276_vm1, %v2917_v26, %v2913_v63 }
0x2df0   :  { %v2362_v20 = vrot.slane %v2361_v50, 4  ;;  %v2355_v10 = vrot.slane %v2354_v4, 4  ;;  %v4544_v7 = vsel %vm572_vm9, %v4463_v25, %v2918_v54  ;;  %v2424_v38 = vpop.permute.xlu1 %2423 }
0x2df2   :  { %v2363_v55 = vadd.f32 %v2362_v20, %v2361_v50  ;;  %v2356_v2 = vadd.f32 %v2355_v10, %v2354_v4 }
0x2df4   :  { %v2364_v1 = vrot.slane %v2363_v55, 2  ;;  %v2357_v16 = vrot.slane %v2356_v2, 2 }
0x2df6   :  { %v2365_v51 = vadd.f32 %v2364_v1, %v2363_v55  ;;  %v2358_v36 = vadd.f32 %v2357_v16, %v2356_v2  ;;  %v3450_v55 = vld [vmem:[#allocation5 + $0x8] sm:$0xff]   ;;  %v3452_v2 = vld [vmem:[#allocation5 + $0x18] sm:$0xff]  }
0x2df8   :  { %v2366_v17 = vrot.slane %v2365_v51, 1  ;;  %v2359_v42 = vrot.slane %v2358_v36, 1 }
0x2dfa   :  { %v2367_v0 = vadd.f32 %v2366_v17, %v2365_v51  ;;  %v2360_v53 = vadd.f32 %v2359_v42, %v2358_v36 }
0x2dfc   :  { %v2370_v19 = vsel %vm276_vm1, %v2367_v0, %v2360_v53 }
0x2dfd   :  { %v2410_v31 = vadd.f32 %v2409_v39, %v2370_v19 }
0x2dff   :  { %v2415_v25 = vadd.f32 %v4550_v43, %v2410_v31 }
0x2e01   :  { %v2416_v56 = vadd.f32 %v2415_v25, %v4487_v37 }
0x2e03   :  { %v3036_v48 = vmul.f32 -1.442695, %v2416_v56 }
0x2e05   :  { %3365 = vpow2.f32 %v3036_v48 }
0x2e0f   :  { %v3366_v29 = vpop.eup %3365 }
0x2e10   :  { %v2420_v21 = vadd.f32 1.0, %v3366_v29 }
0x2e12   :  { %3367 = vrcp.f32 %v2420_v21 }
0x2e1c   :  { %v3368_v27 = vpop.eup %3367 }
0x2e1d   :  { %v2426_v58 = vmul.f32 %v3368_v27, %v2424_v38  ;;  %v2433_v63 = vsub.f32 1.0, %v3368_v27  ;;  %v2439_v37 = vmul.f32 %v3368_v27, %v4471_v9  ;;  %v3451_v9 = vld [vmem:[#allocation5 + $0x10] sm:$0xff]  }
0x2e1f   :  { %2428 = vrot.lane.b32.xlu0 %v2426_v58, %s3640_s23 }
0x2e91   :  { %v2429_v39 = vpop.permute.xlu0 %2428 }
0x2e92   :  { %v2431_v26 = vadd.f32 %v2429_v39, %v2415_v25 }
0x2e94   :  { %3369 = vtanh.f32 %v2431_v26 }
0x2e9e   :  { %v3370_v12 = vpop.eup %3369 }
0x2e9f   :  { %2435 = vrot.lane.b32.xlu1 %v3370_v12, %s3650_s1 }
0x2f11   :  { %v2436_v50 = vpop.permute.xlu1 %2435 }
0x2f12   :  { %v2438_v4 = vmul.f32 %v2436_v50, %v2433_v63 }
0x2f14   :  { %v4557_v54 = vadd.f32 %v2439_v37, %v2438_v4 }
0x2f16   :  { %v2441_v20 = vpack.c.bf16 %v4557_v54, %v4557_v54 }
0x2f18   :  { %2443 = vrot.lane.b32.xlu0 %v2441_v20, %s3650_s1 }
0x2f8a   :  { %v2444_v10 = vpop.permute.xlu0 %2443 }
0x2f8b   :  { %3037 = vmatmul.mubr.msk.bf16.vlgmr.msra.gmra.mrb[32].mxu0 %vm175_vm0, %v2444_v10 }
0x2f8c   :  { %3185 = vmatpush3.bf16.msra.mxu0 %v3931_v28  ;;  %3192 = vmatprep.mubr.msk.bf16.mxu0 %vm3653_vm7, %v3652_v30 }
0x2f8d   :  { %3186 = vmatprep.subr.bf16.mxu0 %v3652_v30 }
0x2f90   :  { %3187 = vmatpush3.bf16.msra.mxu0 %v3450_v55 }
0x2f91   :  { %3188 = vmatprep.subr.bf16.mxu0 %v3652_v30 }
0x2f94   :  { %3189 = vmatpush3.bf16.msra.mxu0 %v3451_v9 }
0x2f95   :  { %3190 = vmatprep.subr.bf16.mxu0 %v3652_v30 }
0x2f98   :  { %3191 = vmatpush3.bf16.msra.mxu0 %v3452_v2 }
0x305e   :  { %v2482_v1 = vpop.f32.mrb[32].mxu0 }
0x305f   :  { %v4570_v16 = vadd.f32 %v2482_v1, %v3822_v14  ;;  %v2484_v28 = vpop.f32.mrb[33].mxu0 }
0x3060   :  { %v4573_v51 = vadd.f32 %v2484_v28, %v3908_v5  ;;  %v2486_v36 = vpop.f32.mrb[34].mxu0 }
0x3061   :  { %v2530_v17 = vrot.slane %v4570_v16, %v3825_v15  ;;  %v2487_v42 = vpop.f32.mrb[35].mxu0 }
0x3062   :  { %v2489_v0 = vsel %vm407_vm4, %v4573_v51, -inf }
0x3063   :  { %v2538_v53 = vrot.slane %v2530_v17, %v3825_v15  ;;  %2490 = vmax.xlane.f32.xlu1 %v2489_v0  ;;  %v2531_v38 = vcombine.high %v2530_v17, %v2530_v17 }
0x3065   :  { %v2549_v19 = vrot.slane %v2538_v53, %v3813_v11 }
0x3067   :  { %v2556_v14 = vadd.f32 %v4498_v59, %v2549_v19  ;;  %v2545_v59 = vrot.slane %v2531_v38, %v3825_v15 }
0x3069   :  { %3371 = vtanh.f32 %v2556_v14  ;;  %v2553_v58 = vrot.slane %v2545_v59, %v3813_v11 }
0x306b   :  { %v2557_v39 = vadd.f32 %v4515_v33, %v2553_v58  ;;  %v2920_v58 = vadd.s32 4294967224, %v3849_v40 }
0x306d   :  { %3373 = vtanh.f32 %v2557_v39  ;;  %v2923_v39 = vsub.s32 %v2920_v58, %v3810_v8  ;;  %v693_v58 = vsub.f32 %v4007_v45, %v4017_v62 }
0x3073   :  { %v3372_v31 = vpop.eup %3371 }
0x3074   :  { %v2560_v25 = vmul.f32 %v4504_v3, %v3372_v31 }
0x3076   :  { %2562 = vadd.xlane.f32.xlu1 %v2560_v25 }
0x3077   :  { %v3374_v50 = vpop.eup %3373 }
0x3078   :  { %v2561_v4 = vmul.f32 %v4504_v3, %v3374_v50 }
0x30f0   :  { %v4583_v56 = vpop.xlane.xlu1 %2490 }
0x30f1   :  { %vm2502_vm7 = vcmp.eq.f32.partialorder %v4573_v51, %v4583_v56 }
0x30f2   :  { %v2503_v48 = vsel %vm2502_vm7, %v3849_v40, 64 }
0x30f3   :  { %v2504_v29 = vsel %vm407_vm4, %v2503_v48, 2147483647 }
0x30f4   :  { %v2506_v21 = vshra.s32 %v2504_v29, 16  ;;  %v2505_v26 = vand.u32 65535, %v2504_v29 }
0x30f6   :  { %v2508_v27 = vcvt.s32.f32 %v2506_v21  ;;  %v2507_v63 = vcvt.s32.f32 %v2505_v26 }
0x30f8   :  { %2509 = vmin.xlane.f32.xlu0 %v2508_v27 }
0x3103   :  { %v2563_v10 = vpop.xlane.xlu1 %2562 }
0x3104   :  { %v2566_v9 = vmul.f32 1.442695, %v2563_v10 }
0x3106   :  { %3375 = vpow2.f32 %v2566_v9 }
0x3110   :  { %v3376_v3 = vpop.eup %3375 }
0x3111   :  { %v2575_v0 = vrot.slane %v3376_v3, %v3853_v41 }
0x3185   :  { %v2510_v12 = vpop.xlane.xlu0 %2509 }
0x3186   :  { %vm2511_vm10 = vcmp.eq.f32.partialorder %v2508_v27, %v2510_v12  ;;  %v2516_v20 = vcvt.f32.s32 %v2510_v12 }
0x3187   :  { %v2512_v37 = vsel %vm2511_vm10, %v2507_v63, inf }
0x3188   :  { %2513 = vmin.xlane.f32.xlu0 %v2512_v37  ;;  %v2517_v15 = vshll.u32 %v2516_v20, 16 }
0x318c   :  { %2564 = vadd.xlane.f32.xlu0 %v2561_v4 }
0x3215   :  { %v2514_v55 = vpop.xlane.xlu0 %2513 }
0x3216   :  { %v2515_v2 = vcvt.f32.s32 %v2514_v55 }
0x3218   :  { %v2518_v1 = vadd.s32 %v2517_v15, %v2515_v2 }
0x3219   :  { %v2565_v28 = vpop.xlane.xlu0 %2564 }
0x321a   :  { %vm2519_vm11 = vcmp.eq.s32.totalorder %v3849_v40, %v2518_v1  ;;  %v2568_v33 = vmul.f32 1.442695, %v2565_v28 }
0x321b   :  { %v3038_v36 = vsel %vm2519_vm11, 1.0, %v3652_v30 }
0x321c   :  { %v2522_v17 = vpack.c.bf16 %v3038_v36, %v3038_v36  ;;  %3377 = vpow2.f32 %v2568_v33 }
0x321e   :  { %3193 = vmatmul.mubr.msk.bf16.vlgmr.msra.gmra.mrb[36].mxu0 %vm572_vm9, %v2522_v17 }
0x3226   :  { %v3378_v42 = vpop.eup %3377 }
0x3227   :  { %v2579_v53 = vrot.slane %v3378_v42, %v3853_v41 }
0x3229   :  { %v2580_v19 = vsel %vm276_vm1, %v2579_v53, %v2575_v0 }
0x322a   :  { %v2582_v14 = vsel %vm279_vm2, %v2580_v19, 0.0  ;;  %vm2945_vm2 = vcmask 588800  }
0x322b   :  { %2583 = vadd.xlane.f32.xlu1 %v2582_v14 }
0x32b8   :  { %v2584_v31 = vpop.xlane.xlu1 %2583 }
0x32b9   :  { %3379 = vrcp.f32 %v2584_v31 }
0x32c3   :  { %v3380_v25 = vpop.eup %3379 }
0x32c4   :  { %v2594_v30 = vrot.slane %v3380_v25, %v3860_v49  ;;  %v2590_v48 = vrot.slane %v3380_v25, %v3813_v11 }
0x32c6   :  { %v2598_v29 = vmul.f32 %v3378_v42, %v2594_v30  ;;  %v2597_v21 = vmul.f32 %v3376_v3, %v2590_v48 }
0x32c8   :  { %2606 = vperm.xlu1 %3215, %v2598_v29   ;;  %2601 = vperm.xlu0 %3216, %v2597_v21  }
0x32cc   :  { %2680 = vrot.lane.b32.xlu1 %v4570_v16, %s3640_s23 }
0x32f1   :  { %v2666_v41 = vpop.f32.mrb[36].mxu0 }
0x32f2   :  { %v3194_v27 = vpop.f32.mrb[37].mxu0 }
0x32f3   :  { %v2669_v38 = vpop.f32.mrb[38].mxu0 }
0x32f4   :  { %v3195_v59 = vpop.f32.mrb[39].mxu0 }
0x3347   :  { %v2607_v26 = vpop.permute.xlu1 %2606  ;;  %v2602_v12 = vpop.permute.xlu0 %2601 }
0x3348   :  { %v2610_v11 = vmul.f32 %v4533_v57, %v2607_v26  ;;  %v2928_v49 = vrot.slane %v2607_v26, %v2923_v39  ;;  %v2609_v63 = vmul.f32 %v4536_v32, %v2602_v12  ;;  %v2924_v50 = vrot.slane %v2602_v12, %v2923_v39 }
0x3349   :  { %v694_v39 = vmul.f32 1.442695, %v693_v58  ;;  %v1207_v26 = vsub.f32 %v4153_v61, %v4170_v52 }
0x334a   :  { %v2618_v37 = vsel %vm309_vm3, %v2610_v11, 0.0  ;;  %v2611_v4 = vsel %vm309_vm3, %v2609_v63, 0.0  ;;  %v2929_v20 = vsel %vm276_vm1, %v2928_v49, %v2924_v50  ;;  %v2235_v11 = vsub.f32 %v4490_v22, %v4507_v44 }
0x334b   :  { %v2619_v10 = vrot.slane %v2618_v37, 4  ;;  %v2612_v40 = vrot.slane %v2611_v4, 4  ;;  %v2946_v55 = vsel %vm2945_vm2, %v4544_v7, %v2929_v20  ;;  %v2681_v25 = vpop.permute.xlu1 %2680  ;;  %v1208_v12 = vmul.f32 1.442695, %v1207_v26 }
0x334c   :  { %2948 = vst.msk [vmem:[#allocation14] sm:$0x3] %vm2947_vm12, %v2946_v55  ;;  %v2236_v49 = vmul.f32 1.442695, %v2235_v11  ;;  %v1464_v50 = vsub.f32 %v4275_v24, %v4285_v34  ;;  %v2492_v20 = vsub.f32 %v4573_v51, %v4583_v56  ;;  %v1978_v11 = vsub.f32 %v4419_v47, %v4429_v35 }
0x334d   :  { %v2620_v9 = vadd.f32 %v2619_v10, %v2618_v37  ;;  %v2613_v15 = vadd.f32 %v2612_v40, %v2611_v4 }
0x334e   :  { %v1465_v4 = vmul.f32 1.442695, %v1464_v50  ;;  %v2493_v55 = vmul.f32 1.442695, %v2492_v20 }
0x334f   :  { %v2621_v2 = vrot.slane %v2620_v9, 2  ;;  %v2614_v57 = vrot.slane %v2613_v15, 2 }
0x3351   :  { %v2622_v1 = vadd.f32 %v2621_v2, %v2620_v9  ;;  %v2615_v28 = vadd.f32 %v2614_v57, %v2613_v15 }
0x3353   :  { %v2623_v32 = vrot.slane %v2622_v1, 1  ;;  %v2616_v33 = vrot.slane %v2615_v28, 1 }
0x3355   :  { %v2624_v36 = vadd.f32 %v2623_v32, %v2622_v1  ;;  %v2617_v17 = vadd.f32 %v2616_v33, %v2615_v28 }
0x3357   :  { %v2627_v3 = vsel %vm276_vm1, %v2624_v36, %v2617_v17 }
0x3358   :  { %v2667_v42 = vadd.f32 %v2666_v41, %v2627_v3 }
0x335a   :  { %v2672_v0 = vadd.f32 %v4550_v43, %v2667_v42 }
0x335c   :  { %v2673_v53 = vadd.f32 %v2672_v0, %v4570_v16 }
0x335e   :  { %v3040_v19 = vmul.f32 -1.442695, %v2673_v53 }
0x3360   :  { %3381 = vpow2.f32 %v3040_v19 }
0x336a   :  { %v3382_v7 = vpop.eup %3381 }
0x336b   :  { %v2677_v14 = vadd.f32 1.0, %v3382_v7 }
0x336d   :  { %3383 = vrcp.f32 %v2677_v14 }
0x3377   :  { %v3384_v31 = vpop.eup %3383 }
0x3378   :  { %v2683_v30 = vmul.f32 %v3384_v31, %v2681_v25  ;;  %v2690_v41 = vsub.f32 1.0, %v3384_v31  ;;  %v2696_v16 = vmul.f32 %v3384_v31, %v4557_v54  ;;  %v411_v54 = vsub.f32 %v3911_v60, %v3923_v18 }
0x337a   :  { %2685 = vrot.lane.b32.xlu0 %v2683_v30, %s3640_s23  ;;  %v412_v63 = vmul.f32 1.442695, %v411_v54 }
0x33ec   :  { %v2686_v48 = vpop.permute.xlu0 %2685 }
0x33ed   :  { %v2688_v29 = vadd.f32 %v2686_v48, %v2672_v0 }
0x33ef   :  { %3385 = vtanh.f32 %v2688_v29 }
0x33f0   :  { %3387 = vpow2.f32 %v694_v39  ;;  %v950_v39 = vsub.f32 %v4079_v46, %v4089_v6 }
0x33f1   :  { %3389 = vpow2.f32 %v1208_v12 }
0x33f2   :  { %3391 = vpow2.f32 %v2236_v49  ;;  %v1979_v49 = vmul.f32 1.442695, %v1978_v11 }
0x33f3   :  { %3393 = vpow2.f32 %v412_v63 }
0x33f4   :  { %3395 = vpow2.f32 %v1465_v4 }
0x33f5   :  { %3397 = vpow2.f32 %v2493_v55 }
0x33f9   :  { %v3386_v21 = vpop.eup %3385 }
0x33fa   :  { %2692 = vrot.lane.b32.xlu1 %v3386_v21, %s3650_s1  ;;  %v3388_v37 = vpop.eup %3387  ;;  %v1721_v21 = vsub.f32 %v4347_v23, %v4357_v13 }
0x33fb   :  { %v696_v10 = vsel %vm407_vm4, %v3388_v37, 0.0  ;;  %v3390_v40 = vpop.eup %3389 }
0x33fc   :  { %v1210_v9 = vsel %vm407_vm4, %v3390_v40, 0.0  ;;  %v3392_v15 = vpop.eup %3391 }
0x33fd   :  { %v2238_v2 = vsel %vm407_vm4, %v3392_v15, 0.0  ;;  %v3394_v57 = vpop.eup %3393 }
0x33fe   :  { %v414_v1 = vsel %vm407_vm4, %v3394_v57, 0.0  ;;  %v3396_v28 = vpop.eup %3395 }
0x33ff   :  { %v1467_v32 = vsel %vm407_vm4, %v3396_v28, 0.0  ;;  %v3398_v33 = vpop.eup %3397 }
0x3400   :  { %v2495_v36 = vsel %vm407_vm4, %v3398_v33, 0.0 }
0x346c   :  { %v2693_v43 = vpop.permute.xlu1 %2692 }
0x346d   :  { %v2695_v27 = vmul.f32 %v2693_v43, %v2690_v41 }
0x346f   :  { %v2697_v38 = vadd.f32 %v2696_v16, %v2695_v27 }
0x3471   :  { %v2698_v59 = vpack.c.bf16 %v2697_v38, %v2697_v38 }
0x3473   :  { %2700 = vrot.lane.b32.xlu0 %v2698_v59, %s3650_s1 }
0x3492   :  { %697 = vadd.xlane.f32.xlu0 %v696_v10 }
0x3496   :  { %1211 = vadd.xlane.f32.xlu0 %v1210_v9 }
0x349a   :  { %2239 = vadd.xlane.f32.xlu0 %v2238_v2 }
0x349e   :  { %415 = vadd.xlane.f32.xlu0 %v414_v1 }
0x34a2   :  { %1468 = vadd.xlane.f32.xlu0 %v1467_v32 }
0x34a6   :  { %2496 = vadd.xlane.f32.xlu0 %v2495_v36 }
0x34e5   :  { %v2701_v17 = vpop.permute.xlu0 %2700 }
0x34e6   :  { %3041 = vmatmul.mubr.msk.bf16.vlgmr.msra.gmra.mrb[36].mxu1 %vm175_vm0, %v2701_v17  ;;  %vm2762_vm0 = vcmask 254976  }
0x351f   :  { %v698_v3 = vpop.xlane.xlu0 %697 }
0x3523   :  { %v1212_v42 = vpop.xlane.xlu0 %1211 }
0x3524   :  { %3399 = vlog2.f32 %v1212_v42 }
0x3527   :  { %v2240_v14 = vpop.xlane.xlu0 %2239 }
0x352b   :  { %v416_v31 = vpop.xlane.xlu0 %415 }
0x352e   :  { %v3400_v0 = vpop.eup %3399 }
0x352f   :  { %v1214_v53 = vmul.f32 0.6931472, %v3400_v0  ;;  %v1469_v25 = vpop.xlane.xlu0 %1468 }
0x3531   :  { %v1215_v19 = vadd.f32 %v1214_v53, %v4170_v52  ;;  %v1722_v52 = vmul.f32 1.442695, %v1721_v21 }
0x3533   :  { %v1216_v7 = vsub.f32 %v4153_v61, %v1215_v19  ;;  %v4642_v30 = vpop.xlane.xlu0 %2496  ;;  %3401 = vpow2.f32 %v1722_v52 }
0x3535   :  { %2769 = vrot.lane.b32.xlu0 %v1216_v7, %s3640_s23 }
0x3539   :  { %2759 = vrot.lane.b32.xlu0 %v2697_v38, %s3650_s1 }
0x353d   :  { %v3402_v59 = vpop.eup %3401 }
0x353e   :  { %v1724_v58 = vsel %vm407_vm4, %v3402_v59, 0.0 }
0x35a7   :  { %v4644_v48 = vpop.permute.xlu0 %2769 }
0x35ab   :  { %v2760_v29 = vpop.permute.xlu0 %2759 }
0x35ac   :  { %2763 = vst.msk [vmem:[#allocation12] sm:$0x3] %vm2762_vm0, %v2760_v29 }
0x35b9   :  { %v2739_v61 = vpop.f32.mrb[36].mxu1 }
0x35ba   :  { %v2740_v41 = vpop.f32.mrb[37].mxu1 }
0x35bb   :  { %v4649_v43 = vadd.f32 %v2740_v41, %v3908_v5  ;;  %v2742_v16 = vpop.f32.mrb[38].mxu1  ;;  %v951_v5 = vmul.f32 1.442695, %v950_v39 }
0x35bc   :  { %v2743_v27 = vpop.f32.mrb[39].mxu1 }
0x35bd   :  { %v2745_v38 = vsel %vm407_vm4, %v4649_v43, -inf }
0x35be   :  { %2746 = vmax.xlane.f32.xlu1 %v2745_v38 }
0x35c2   :  { %1725 = vadd.xlane.f32.xlu1 %v1724_v58 }
0x364b   :  { %v4656_v26 = vpop.xlane.xlu1 %2746 }
0x364c   :  { %v2748_v12 = vsub.f32 %v4649_v43, %v4656_v26 }
0x364e   :  { %v2749_v54 = vmul.f32 1.442695, %v2748_v12 }
0x364f   :  { %v1726_v4 = vpop.xlane.xlu1 %1725 }
0x3650   :  { %3403 = vpow2.f32 %v2749_v54 }
0x3651   :  { %3405 = vpow2.f32 %v951_v5 }
0x3652   :  { %3407 = vpow2.f32 %v1979_v49 }
0x3653   :  { %3409 = vlog2.f32 %v698_v3 }
0x3654   :  { %3411 = vlog2.f32 %v1726_v4 }
0x3655   :  { %3413 = vlog2.f32 %v2240_v14 }
0x3656   :  { %3415 = vlog2.f32 %v416_v31 }
0x365a   :  { %v3404_v63 = vpop.eup %3403 }
0x365b   :  { %v2751_v50 = vsel %vm407_vm4, %v3404_v63, 0.0  ;;  %v3406_v37 = vpop.eup %3405 }
0x365c   :  { %2752 = vadd.xlane.f32.xlu1 %v2751_v50  ;;  %v953_v20 = vsel %vm407_vm4, %v3406_v37, 0.0  ;;  %v3408_v10 = vpop.eup %3407 }
0x365d   :  { %v1981_v40 = vsel %vm407_vm4, %v3408_v10, 0.0  ;;  %v3410_v55 = vpop.eup %3409 }
0x365e   :  { %v700_v9 = vmul.f32 0.6931472, %v3410_v55  ;;  %v3412_v15 = vpop.eup %3411 }
0x365f   :  { %v1728_v57 = vmul.f32 0.6931472, %v3412_v15  ;;  %v3414_v1 = vpop.eup %3413 }
0x3660   :  { %954 = vadd.xlane.f32.xlu1 %v953_v20  ;;  %v701_v2 = vadd.f32 %v700_v9, %v4017_v62  ;;  %v2242_v28 = vmul.f32 0.6931472, %v3414_v1 }
0x3661   :  { %v1729_v32 = vadd.f32 %v1728_v57, %v4357_v13 }
0x3662   :  { %v702_v33 = vsub.f32 %v4007_v45, %v701_v2  ;;  %v2243_v36 = vadd.f32 %v2242_v28, %v4507_v44 }
0x3663   :  { %v1730_v17 = vsub.f32 %v4347_v23, %v1729_v32 }
0x3664   :  { %1982 = vadd.xlane.f32.xlu1 %v1981_v40  ;;  %v2244_v3 = vsub.f32 %v4490_v22, %v2243_v36 }
0x3675   :  { %2765 = vrot.lane.b32.xlu1 %v702_v33, %s3640_s23 }
0x3679   :  { %2773 = vrot.lane.b32.xlu1 %v1730_v17, %s3640_s23 }
0x367d   :  { %2777 = vrot.lane.b32.xlu1 %v2244_v3, %s3640_s23 }
0x36e9   :  { %v2753_v62 = vpop.xlane.xlu1 %2752 }
0x36ea   :  { %3417 = vlog2.f32 %v2753_v62 }
0x36eb   :  { %3419 = vlog2.f32 %v1469_v25 }
0x36ed   :  { %v955_v42 = vpop.xlane.xlu1 %954 }
0x36ee   :  { %3421 = vlog2.f32 %v955_v42 }
0x36ef   :  { %3574 = shalt.err (!%p3571_p2)
}
0x36f0   :  { %s3575_s4 = scalar_lea.hbm %s4740_s9, 32 }
0x36f1   :  { %p3576_p3 = scmp.ne.s32.totalorder %s4740_s9, %s3575_s4  ;;  %p3579_p4 = scmp.lt.u32.totalorder %s3575_s4, %s4740_s9 }
0x36f3   :  { %p3581_p5 = pnand %p3579_p4, %p3576_p3 }
0x36f5   :  { %3584 = shalt.err (!%p3581_p5)
}
0x36f6   :  { %2968 = dma.vmem_to_hbm [thread:$0]  %s2966_s27, 32, %s4740_s9, [#allocation13]   ;;  %v1983_v45 = vpop.xlane.xlu1 %1982  ;;  %v3416_v23 = vpop.eup %3415 }
0x36f7   :  { %3423 = vlog2.f32 %v1983_v45  ;;  %s3655_s14 = smov [#allocation14]   ;;  %v3418_v13 = vpop.eup %3417 }
0x36f8   :  { %s2975_s6 = sshll.u32 %s3655_s14, 4  ;;  %s2976_s6 = int_to_ptr.vmem [resolvable:$true] %s2975_s6 }
0x36f9   :  { %s3585_s19 = scalar_lea.vmem %s2976_s6, 32  ;;  %p3590_p7 = scmp.lt.s32.totalorder %s2976_s6, %s2976_s6 }
0x36fa   :  { %p3586_p6 = scmp.ne.s32.totalorder %s2976_s6, %s3585_s19  ;;  %p3591_p8 = scmp.lt.s32.totalorder %s3585_s19, %s3585_s19 }
0x36fc   :  { %p3592_p9 = por %p3591_p8, %p3590_p7 }
0x36fe   :  { %p3593_p10 = pnand %p3592_p9, %p3586_p6 }
0x3700   :  { %3596 = shalt.err (!%p3593_p10)
}
0x3701   :  { %s3597_s1 = scalar_lea.hbm %s4741_s10, 32 }
0x3702   :  { %p3598_p11 = scmp.ne.s32.totalorder %s4741_s10, %s3597_s1  ;;  %p3601_p12 = scmp.lt.u32.totalorder %s3597_s1, %s4741_s10 }
0x3704   :  { %p3603_p13 = pnand %p3601_p12, %p3598_p11 }
0x3706   :  { %3606 = shalt.err (!%p3603_p13)
}
0x3707   :  { %2978 = dma.vmem_to_hbm [thread:$0]  %s2976_s6, 32, %s4741_s10, [#allocation13]   ;;  %v2755_v22 = vmul.f32 0.6931472, %v3418_v13  ;;  %v3420_v44 = vpop.eup %3419  ;;  %v2766_v0 = vpop.permute.xlu1 %2765  ;;  %v418_v53 = vmul.f32 0.6931472, %v3416_v23  ;;  %3425 = vlog2.f32 %v4642_v30 }
0x3708   :  { %v3422_v7 = vpop.eup %3421  ;;  %v1471_v14 = vmul.f32 0.6931472, %v3420_v44  ;;  %v3656_v29 = vmov 1983009808   ;;  %s3657_s10 = smov [#allocation11]  }
0x3709   :  { %v2756_v19 = vadd.f32 %v2755_v22, %v4656_v26  ;;  %v957_v31 = vmul.f32 0.6931472, %v3422_v7  ;;  %v2797_v21 = vunpack.c.l.s4 %v3656_v29  ;;  %v419_v52 = vadd.f32 %v418_v53, %v3923_v18  ;;  %v3424_v41 = vpop.eup %3423 }
0x370a   :  { %v1472_v27 = vadd.f32 %v1471_v14, %v4285_v34  ;;  %v1985_v59 = vmul.f32 0.6931472, %v3424_v41 }
0x370b   :  { %v2757_v25 = vsub.f32 %v4649_v43, %v2756_v19  ;;  %v958_v61 = vadd.f32 %v957_v31, %v4089_v6  ;;  %v2774_v16 = vpop.permute.xlu1 %2773  ;;  %v2798_v58 = vunpack.c.0.s8 %v2797_v21  ;;  %v420_v43 = vsub.f32 %v3911_v60, %v419_v52 }
0x370c   :  { %v1986_v39 = vadd.f32 %v1985_v59, %v4429_v35  ;;  %v1473_v6 = vsub.f32 %v4275_v24, %v1472_v27 }
0x370d   :  { %2781 = vrot.lane.b32.xlu1 %v2757_v25, %s3640_s23  ;;  %v959_v38 = vsub.f32 %v4079_v46, %v958_v61  ;;  %v2784_v18 = vsel %vm572_vm9, %v420_v43, %v2766_v0  ;;  %v2801_v5 = vsub.s32 %v2798_v58, %v3810_v8  ;;  %s2955_s23 = sshll.u32 %s3657_s10, 4  ;;  %s2956_s23 = int_to_ptr.vmem [resolvable:$true] %s2955_s23 }
0x370e   :  { %v1987_v12 = vsub.f32 %v4419_v47, %v1986_v39  ;;  %v2786_v46 = vsel %vm572_vm9, %v1473_v6, %v2774_v16  ;;  %s3607_s0 = scalar_lea.vmem %s2956_s23, 160  ;;  %p3612_p1 = scmp.lt.s32.totalorder %s2956_s23, %s2956_s23 }
0x370f   :  { %v2785_v26 = vsel %vm572_vm9, %v959_v38, %v4644_v48  ;;  %v2778_v11 = vpop.permute.xlu1 %2777  ;;  %p3608_p0 = scmp.ne.s32.totalorder %s2956_s23, %s3607_s0  ;;  %p3613_p2 = scmp.lt.s32.totalorder %s3607_s0, %s3607_s0 }
0x3710   :  { %v2794_v34 = vcombine.low %v2784_v18, %v2785_v26  ;;  %v2787_v54 = vsel %vm572_vm9, %v1987_v12, %v2778_v11 }
0x3711   :  { %v2795_v35 = vcombine.low %v2786_v46, %v2787_v54  ;;  %v3426_v48 = vpop.eup %3425  ;;  %p3614_p3 = por %p3613_p2, %p3612_p1 }
0x3712   :  { %v2802_v49 = vrot.slane %v2794_v34, %v2801_v5  ;;  %v2499_v50 = vmul.f32 0.6931472, %v3426_v48 }
0x3713   :  { %v2809_v60 = vrot.slane %v2795_v35, %v2801_v5  ;;  %p3615_p4 = pnand %p3614_p3, %p3608_p0 }
0x3714   :  { %v2500_v24 = vadd.f32 %v2499_v50, %v4583_v56 }
0x3715   :  { %v2810_v63 = vcombine.low %v2802_v49, %v2809_v60 }
0x3716   :  { %v2501_v8 = vsub.f32 %v4573_v51, %v2500_v24 }
0x3717   :  { %2820 = vst [vmem:[#allocation11] sm:$0xff] %v2810_v63 }
0x377f   :  { %v2782_v47 = vpop.permute.xlu1 %2781 }
0x3780   :  { %v2788_v37 = vsel %vm572_vm9, %v2501_v8, %v2782_v47 }
0x3781   :  { %3042 = vst.sshfl [vmem:[#allocation11 + $0x8] sm:$0x3 pattern:$0x76325410] %v2788_v37 }
0x3782   :  { %3618 = shalt.err (!%p3615_p4)
}
0x3783   :  { %s3619_s26 = scalar_lea.hbm %s4739_s8, 160 }
0x3784   :  { %p3620_p5 = scmp.ne.s32.totalorder %s4739_s8, %s3619_s26  ;;  %p3623_p6 = scmp.lt.u32.totalorder %s3619_s26, %s4739_s8 }
0x3786   :  { %p3625_p7 = pnand %p3623_p6, %p3620_p5 }
0x3788   :  { %3628 = shalt.err (!%p3625_p7)
}
0x3789   :  { %2958 = dma.vmem_to_hbm [thread:$0]  %s2956_s23, 160, %s4739_s8, [#allocation4]  }
0x378a   :  { %3635 = dma.done.wait [#allocation4], 160  }
0x378b   :  { %3636 = vsyncadd [#allocation4], 4294967136 }
0x378c   :  { %3637 = dma.done.wait [#allocation13], 64  }
0x378d   :  { %3638 = vsyncadd [#allocation13], 4294967232 }
0x378e   :  { %2988 = vsyncpa [#allocation3], 1 }
0x378f   :  { %2989 = vsyncpa [#allocation6], 1 }
0x3790   :  { %2990 = vsyncpa [#allocation9], 1 }
0x3791   :  { %2991 = vsyncpa [#allocation4], 1 }
0x3792   :  { %2992 = vsyncpa [#allocation13], 1 }

</bundles_post_ra>
